<compile_context>
chip_gen: v7x
topology: tpu7x:2x2x1
jax: 0.10.0
libtpu: 0.0.40
codegen_flags: <defaults>
</compile_context>

<pallas_src>
import math
import functools

import jax
import jax.numpy as jnp
from jax import lax
from jax.experimental import pallas as pl
from jax.experimental.pallas import tpu as pltpu


# ----------------------------------------------------------------------------
# Pallas kernel: full MAB forward for a tile of `b_tile` batch elements
# ----------------------------------------------------------------------------
def _mab_kernel(len_ref, q_ref, k_ref,
                wq_ref, bq_ref, wk_ref, bk_ref, wv_ref, bv_ref, wo_ref, bo_ref,
                out_ref, *, dim_V, dim_split, mask_q, mask_k):
    f32 = jnp.float32
    bf16 = jnp.bfloat16
    Bt, Nq, Dq = q_ref.shape
    _, Nk, Dk = k_ref.shape

    q_in = q_ref[...]                         # (Bt, Nq, Dq) f32  (residual input)
    k_in = k_ref[...]                         # (Bt, Nk, Dk) f32

    # ---- Q/K/V projections: flatten batch into the MXU row dimension ------
    q2 = q_in.reshape(Bt * Nq, Dq).astype(bf16)
    k2 = k_in.reshape(Bt * Nk, Dk).astype(bf16)
    Qp = (jnp.dot(q2, wq_ref[...], preferred_element_type=f32)
          + bq_ref[...]).reshape(Bt, Nq, dim_V)
    Kp = (jnp.dot(k2, wk_ref[...], preferred_element_type=f32)
          + bk_ref[...]).reshape(Bt, Nk, dim_V)
    Vp = (jnp.dot(k2, wv_ref[...], preferred_element_type=f32)
          + bv_ref[...]).reshape(Bt, Nk, dim_V)

    # ---- length masks (mask_matrix): one vector compare per mask ----------
    # lengths arrive as a (Bt, 1, 1) int32 VMEM tile sliced by the index_map.
    if mask_q or mask_k:
        lens = len_ref[...]                                   # (Bt, 1, 1) i32
        if mask_q:
            rq = lax.broadcasted_iota(jnp.int32, (1, Nq, 1), 1)
            Qp = Qp * (rq < lens).astype(f32)
        if mask_k:
            rk = lax.broadcasted_iota(jnp.int32, (1, Nk, 1), 1)
            kvm = (rk < lens).astype(f32)
            Kp = Kp * kvm
            Vp = Vp * kvm

    # ---- multi-head attention, lane-dense via static per-head masks -------
    # Casts, score scale and the K transpose are hoisted out of the head loop;
    # per head we only zero the out-of-head rows/lanes (bitwise selects) so the
    # full-width contraction equals the per-head sliced matmuls, and the head
    # outputs accumulate directly into the 128-lane-dense result.
    scale = 1.0 / math.sqrt(dim_V)
    n_heads = dim_V // dim_split
    Qb = (Qp * scale).astype(bf16)                    # scale folded, cast once
    Vb = Vp.astype(bf16)                              # single f32->bf16 cast
    Kt = jnp.transpose(Kp, (0, 2, 1)).astype(bf16)    # one shared (Bt, D, Nk)

    lane = lax.broadcasted_iota(jnp.int32, (1, 1, dim_V), 2)   # V lanes
    subl = lax.broadcasted_iota(jnp.int32, (1, dim_V, 1), 1)   # Kt sublanes

    # NOTE: each batched matmul pushes only Nq(=16) rows per batch; fine while
    # fixed-overhead bound, first MXU-side lever if B/Nq grow (v6e/v7x 256x256).
    attn = jnp.zeros((Bt, Nq, dim_V), f32)
    for h in range(n_heads):
        lo, hi = h * dim_split, (h + 1) * dim_split
        kt_h = jnp.where((subl >= lo) & (subl < hi), Kt, 0)    # bf16 select
        v_h = jnp.where((lane >= lo) & (lane < hi), Vb, 0)     # bf16 select
        s = jnp.einsum('bqd,bdk->bqk', Qb, kt_h, preferred_element_type=f32)
        s = s - jnp.max(s, axis=-1, keepdims=True)
        e = jnp.exp(s)
        a = e * pl.reciprocal(jnp.sum(e, axis=-1, keepdims=True), approx=False)
        attn = attn + jnp.einsum('bqk,bkd->bqd', a.astype(bf16), v_h,
                                 preferred_element_type=f32)

    # ---- residual + feed-forward (fc_o + ReLU) -----------------------------
    O = q_in + attn                                       # requires dim_Q == dim_V
    ff = (jnp.dot(O.reshape(Bt * Nq, dim_V).astype(bf16), wo_ref[...],
                  preferred_element_type=f32)
          + bo_ref[...]).reshape(Bt, Nq, dim_V)
    out_ref[...] = O + jnp.maximum(ff, 0.0)


# ----------------------------------------------------------------------------
# Wrapper
# ----------------------------------------------------------------------------
def _is_v7x():
    try:
        kind = jax.devices()[0].device_kind.lower()
    except Exception:
        return False
    return ('v7' in kind) or ('7x' in kind)


def mab_pallas(params, Q, K, lengths=None, mask=(), num_heads=4):
    B, Nq, Dq = Q.shape
    Bk, Nk, Dk = K.shape
    assert Bk == B
    Dv = params['wq'].shape[1]
    # The PyTorch module's residual (cat of _input head-splits) only type-checks
    # when dim_Q == dim_V; enforce loudly rather than silently diverging.
    assert Dq == Dv, "MAB residual path requires dim_Q == dim_V"
    dim_split = 2 ** int(round(math.log2(Dv // num_heads)))
    assert Dv % dim_split == 0, "rounded head size must divide dim_V"

    if lengths is None:
        lengths = jnp.full((B,), max(Nq, Nk), jnp.int32)
    lengths3 = lengths.astype(jnp.int32).reshape(B, 1, 1)

    # Grid: 1 step on single-TensorCore v5e/v6e (whole batch fused, no per-step
    # overhead); 2 steps only on the two-TensorCore v7x so each core gets a tile.
    n_tiles = 2 if (_is_v7x() and B >= 2 and B % 2 == 0) else 1
    b_tile = B // n_tiles

    kern = functools.partial(
        _mab_kernel, dim_V=Dv, dim_split=dim_split,
        mask_q=('Q' in mask), mask_k=('K' in mask))

    bf16 = jnp.bfloat16
    args = (lengths3, Q, K,
            params['wq'].astype(bf16), params['bq'],
            params['wk'].astype(bf16), params['bk'],
            params['wv'].astype(bf16), params['bv'],
            params['wo'].astype(bf16), params['bo'])

    def build(semantics, weight_buffering):
        def wspec(shape):
            imap = lambda bt: (0,) * len(shape)
            if weight_buffering is None:
                return pl.BlockSpec(shape, imap)
            return pl.BlockSpec(shape, imap, pipeline_mode=weight_buffering)

        grid_spec = pltpu.PrefetchScalarGridSpec(
            num_scalar_prefetch=0,
            grid=(n_tiles,),
            in_specs=[
                pl.BlockSpec((b_tile, 1, 1), lambda bt: (bt, 0, 0)),    # lengths
                pl.BlockSpec((b_tile, Nq, Dq), lambda bt: (bt, 0, 0)),  # Q
                pl.BlockSpec((b_tile, Nk, Dk), lambda bt: (bt, 0, 0)),  # K
                wspec((Dq, Dv)), wspec((1, Dv)),
                wspec((Dk, Dv)), wspec((1, Dv)),
                wspec((Dk, Dv)), wspec((1, Dv)),
                wspec((Dv, Dv)), wspec((1, Dv)),
            ],
            out_specs=pl.BlockSpec((b_tile, Nq, Dv), lambda bt: (bt, 0, 0)),
        )
        return pl.pallas_call(
            kern,
            grid_spec=grid_spec,
            out_shape=jax.ShapeDtypeStruct((B, Nq, Dv), jnp.float32),
            compiler_params=pltpu.CompilerParams(
                dimension_semantics=semantics,
                vmem_limit_bytes=32 * 1024 * 1024),
        )

    try:
        # Preferred config: explicit core-parallel split across the two v7x
        # TensorCores; weights single-buffered (constant index_map, never
        # re-fetched) so the kernel stays scale-safe in v7x's 64 MiB VMEM.
        sem = (pltpu.CORE_PARALLEL,) if n_tiles == 2 else ("arbitrary",)
        return build(sem, pl.Buffered(1))(*args)
    except Exception:
        # Conservative fallback: plain semantics, default-buffered weights.
        sem = ("parallel",) if n_tiles == 2 else ("arbitrary",)
        return build(sem, None)(*args)


# ----------------------------------------------------------------------------
# Pure-JAX reference (f32, HIGHEST precision) mirroring the PyTorch forward
# ----------------------------------------------------------------------------
def _mab_ref(p, Q, K, lengths=None, mask=(), num_heads=4):
    hp = lax.Precision.HIGHEST
    Dv = p['wq'].shape[1]
    ds = 2 ** int(round(math.log2(Dv // num_heads)))
    B, Nq, _ = Q.shape
    _, Nk, _ = K.shape
    _input = Q
    Qp = jnp.einsum('bnd,de->bne', Q, p['wq'], precision=hp) + p['bq']
    if 'Q' in mask:
        qm = (jnp.arange(Nq)[None, :, None] < lengths[:, None, None]).astype(Q.dtype)
        Qp = Qp * qm
    Kp = jnp.einsum('bnd,de->bne', K, p['wk'], precision=hp) + p['bk']
    Vp = jnp.einsum('bnd,de->bne', K, p['wv'], precision=hp) + p['bv']
    if 'K' in mask:
        km = (jnp.arange(Nk)[None, :, None] < lengths[:, None, None]).astype(K.dtype)
        Kp = Kp * km
        Vp = Vp * km
    outs = []
    for h in range(Dv // ds):
        sl = slice(h * ds, (h + 1) * ds)
        s = jnp.einsum('bqd,bkd->bqk', Qp[..., sl], Kp[..., sl],
                       precision=hp) / math.sqrt(Dv)
        a = jax.nn.softmax(s, axis=-1)
        outs.append(_input[..., sl] + jnp.einsum('bqk,bkd->bqd', a, Vp[..., sl],
                                                 precision=hp))
    O = jnp.concatenate(outs, axis=-1)
    ff = jnp.einsum('bnd,de->bne', O, p['wo'], precision=hp) + p['bo']
    return O + jax.nn.relu(ff)


# ----------------------------------------------------------------------------
# Parameter initialization (PyTorch nn.Linear shaped, deterministic)
# ----------------------------------------------------------------------------
def _init_linear(key, din, dout):
    kw, kb = jax.random.split(key)
    bound = 1.0 / math.sqrt(din)
    w = jax.random.uniform(kw, (din, dout), jnp.float32, -bound, bound)
    b = jax.random.uniform(kb, (1, dout), jnp.float32, -bound, bound)
    return w, b


def init_mab(key, dim_Q, dim_K, dim_V):
    ks = jax.random.split(key, 4)
    wq, bq = _init_linear(ks[0], dim_Q, dim_V)
    wk, bk = _init_linear(ks[1], dim_K, dim_V)
    wv, bv = _init_linear(ks[2], dim_K, dim_V)
    wo, bo = _init_linear(ks[3], dim_V, dim_V)
    return dict(wq=wq, bq=bq, wk=wk, bk=bk, wv=wv, bv=bv, wo=wo, bo=bo)


# ----------------------------------------------------------------------------
if __name__ == "__main__":
    key = jax.random.PRNGKey(0)
    kp, kq, kk = jax.random.split(key, 3)

    B, Nq, Nk = 4, 16, 16
    D, num_heads = 128, 4            # dim_Q = dim_K = dim_V = 128 (module default)

    params = init_mab(kp, D, D, D)
    Q = jax.random.normal(kq, (B, Nq, D), jnp.float32)
    K = jax.random.normal(kk, (B, Nk, D), jnp.float32)
    lengths = jnp.array([16, 9, 5, 13], dtype=jnp.int32)   # exercise masking

    # Masked variant (mask=['Q','K'])
    out_m = jax.block_until_ready(
        mab_pallas(params, Q, K, lengths, ('Q', 'K'), num_heads))
    ref_m = jax.block_until_ready(
        _mab_ref(params, Q, K, lengths, ('Q', 'K'), num_heads))
    assert out_m.shape == (B, Nq, D), out_m.shape
    assert jnp.allclose(out_m, ref_m, rtol=5e-2, atol=5e-2)

    # Unmasked variant (mask=[]) — exercises static skip of the mask path
    out_u = jax.block_until_ready(mab_pallas(params, Q, K, None, (), num_heads))
    ref_u = jax.block_until_ready(_mab_ref(params, Q, K, None, (), num_heads))
    assert jnp.allclose(out_u, ref_u, rtol=5e-2, atol=5e-2)

    print("KERNEL_OK")
</pallas_src>

<mosaic_0001>
module attributes {stable_mosaic.version = 11 : i64} {
  func.func @_mab_kernel(%arg0: i32, %arg1: memref<4x1x1xi32, #tpu.memory_space<vmem>>, %arg2: memref<4x16x128xf32, #tpu.memory_space<vmem>>, %arg3: memref<4x16x128xf32, #tpu.memory_space<vmem>>, %arg4: memref<128x128xbf16, #tpu.memory_space<vmem>>, %arg5: memref<1x128xf32, #tpu.memory_space<vmem>>, %arg6: memref<128x128xbf16, #tpu.memory_space<vmem>>, %arg7: memref<1x128xf32, #tpu.memory_space<vmem>>, %arg8: memref<128x128xbf16, #tpu.memory_space<vmem>>, %arg9: memref<1x128xf32, #tpu.memory_space<vmem>>, %arg10: memref<128x128xbf16, #tpu.memory_space<vmem>>, %arg11: memref<1x128xf32, #tpu.memory_space<vmem>>, %arg12: memref<4x16x128xf32, #tpu.memory_space<vmem>>) attributes {dimension_semantics = [#tpu.dimension_semantics<arbitrary>], iteration_bounds = array<i64: 1>, scalar_prefetch = 0 : i64, scratch_operands = 0 : i64, tpu.core_type = #tpu.core_type<tc>, window_params = [{transform_indices = @transform_0, window_bounds = array<i64: 4, 1, 1>}, {transform_indices = @transform_1, window_bounds = array<i64: 4, 16, 128>}, {transform_indices = @transform_2, window_bounds = array<i64: 4, 16, 128>}, {pipeline_mode = #tpu.pipeline_mode<synchronous>, transform_indices = @transform_3, window_bounds = array<i64: 128, 128>}, {pipeline_mode = #tpu.pipeline_mode<synchronous>, transform_indices = @transform_4, window_bounds = array<i64: 1, 128>}, {pipeline_mode = #tpu.pipeline_mode<synchronous>, transform_indices = @transform_5, window_bounds = array<i64: 128, 128>}, {pipeline_mode = #tpu.pipeline_mode<synchronous>, transform_indices = @transform_6, window_bounds = array<i64: 1, 128>}, {pipeline_mode = #tpu.pipeline_mode<synchronous>, transform_indices = @transform_7, window_bounds = array<i64: 128, 128>}, {pipeline_mode = #tpu.pipeline_mode<synchronous>, transform_indices = @transform_8, window_bounds = array<i64: 1, 128>}, {pipeline_mode = #tpu.pipeline_mode<synchronous>, transform_indices = @transform_9, window_bounds = array<i64: 128, 128>}, {pipeline_mode = #tpu.pipeline_mode<synchronous>, transform_indices = @transform_10, window_bounds = array<i64: 1, 128>}, {transform_indices = @transform_11, window_bounds = array<i64: 4, 16, 128>}]} {
    %c0 = arith.constant 0 : index
    %c0_0 = arith.constant 0 : index
    %c0_1 = arith.constant 0 : index
    %0 = vector.load %arg2[%c0, %c0_0, %c0_1] : memref<4x16x128xf32, #tpu.memory_space<vmem>>, vector<4x16x128xf32>
    %c0_2 = arith.constant 0 : index
    %c0_3 = arith.constant 0 : index
    %c0_4 = arith.constant 0 : index
    %1 = vector.load %arg3[%c0_2, %c0_3, %c0_4] : memref<4x16x128xf32, #tpu.memory_space<vmem>>, vector<4x16x128xf32>
    %2 = vector.shape_cast %0 : vector<4x16x128xf32> to vector<64x128xf32>
    %3 = arith.truncf %2 : vector<64x128xf32> to vector<64x128xbf16>
    %4 = vector.shape_cast %1 : vector<4x16x128xf32> to vector<64x128xf32>
    %5 = arith.truncf %4 : vector<64x128xf32> to vector<64x128xbf16>
    %c0_5 = arith.constant 0 : index
    %c0_6 = arith.constant 0 : index
    %6 = vector.load %arg4[%c0_5, %c0_6] : memref<128x128xbf16, #tpu.memory_space<vmem>>, vector<128x128xbf16>
    %cst = arith.constant dense<0.000000e+00> : vector<64x128xf32>
    %7 = tpu.matmul %3, %6, %cst {dimension_numbers = #tpu.dot_dimension_numbers<[1], [0], [0], [1], [0, 0, 1, 1], [], []>} : vector<64x128xbf16>, vector<128x128xbf16>, vector<64x128xf32> -> vector<64x128xf32>
    %c0_7 = arith.constant 0 : index
    %c0_8 = arith.constant 0 : index
    %8 = vector.load %arg5[%c0_7, %c0_8] : memref<1x128xf32, #tpu.memory_space<vmem>>, vector<1x128xf32>
    %9 = vector.broadcast %8 : vector<1x128xf32> to vector<64x128xf32>
    %10 = arith.addf %7, %9 : vector<64x128xf32>
    %11 = vector.shape_cast %10 : vector<64x128xf32> to vector<4x16x128xf32>
    %c0_9 = arith.constant 0 : index
    %c0_10 = arith.constant 0 : index
    %12 = vector.load %arg6[%c0_9, %c0_10] : memref<128x128xbf16, #tpu.memory_space<vmem>>, vector<128x128xbf16>
    %cst_11 = arith.constant dense<0.000000e+00> : vector<64x128xf32>
    %13 = tpu.matmul %5, %12, %cst_11 {dimension_numbers = #tpu.dot_dimension_numbers<[1], [0], [0], [1], [0, 0, 1, 1], [], []>} : vector<64x128xbf16>, vector<128x128xbf16>, vector<64x128xf32> -> vector<64x128xf32>
    %c0_12 = arith.constant 0 : index
    %c0_13 = arith.constant 0 : index
    %14 = vector.load %arg7[%c0_12, %c0_13] : memref<1x128xf32, #tpu.memory_space<vmem>>, vector<1x128xf32>
    %15 = vector.broadcast %14 : vector<1x128xf32> to vector<64x128xf32>
    %16 = arith.addf %13, %15 : vector<64x128xf32>
    %17 = vector.shape_cast %16 : vector<64x128xf32> to vector<4x16x128xf32>
    %c0_14 = arith.constant 0 : index
    %c0_15 = arith.constant 0 : index
    %18 = vector.load %arg8[%c0_14, %c0_15] : memref<128x128xbf16, #tpu.memory_space<vmem>>, vector<128x128xbf16>
    %cst_16 = arith.constant dense<0.000000e+00> : vector<64x128xf32>
    %19 = tpu.matmul %5, %18, %cst_16 {dimension_numbers = #tpu.dot_dimension_numbers<[1], [0], [0], [1], [0, 0, 1, 1], [], []>} : vector<64x128xbf16>, vector<128x128xbf16>, vector<64x128xf32> -> vector<64x128xf32>
    %c0_17 = arith.constant 0 : index
    %c0_18 = arith.constant 0 : index
    %20 = vector.load %arg9[%c0_17, %c0_18] : memref<1x128xf32, #tpu.memory_space<vmem>>, vector<1x128xf32>
    %21 = vector.broadcast %20 : vector<1x128xf32> to vector<64x128xf32>
    %22 = arith.addf %19, %21 : vector<64x128xf32>
    %23 = vector.shape_cast %22 : vector<64x128xf32> to vector<4x16x128xf32>
    %c0_19 = arith.constant 0 : index
    %c0_20 = arith.constant 0 : index
    %c0_21 = arith.constant 0 : index
    %24 = vector.load %arg1[%c0_19, %c0_20, %c0_21] : memref<4x1x1xi32, #tpu.memory_space<vmem>>, vector<4x1x1xi32>
    %25 = tpu.iota {dimensions = array<i32: 1>} : vector<1x16x1xi32>
    %26 = vector.broadcast %25 : vector<1x16x1xi32> to vector<4x16x1xi32>
    %27 = vector.broadcast %24 : vector<4x1x1xi32> to vector<4x16x1xi32>
    %28 = arith.cmpi slt, %26, %27 : vector<4x16x1xi32>
    %29 = arith.extui %28 : vector<4x16x1xi1> to vector<4x16x1xi32>
    %30 = arith.sitofp %29 : vector<4x16x1xi32> to vector<4x16x1xf32>
    %31 = vector.broadcast %30 : vector<4x16x1xf32> to vector<4x16x128xf32>
    %32 = arith.mulf %11, %31 : vector<4x16x128xf32>
    %33 = tpu.iota {dimensions = array<i32: 1>} : vector<1x16x1xi32>
    %34 = vector.broadcast %33 : vector<1x16x1xi32> to vector<4x16x1xi32>
    %35 = vector.broadcast %24 : vector<4x1x1xi32> to vector<4x16x1xi32>
    %36 = arith.cmpi slt, %34, %35 : vector<4x16x1xi32>
    %37 = arith.extui %36 : vector<4x16x1xi1> to vector<4x16x1xi32>
    %38 = arith.sitofp %37 : vector<4x16x1xi32> to vector<4x16x1xf32>
    %39 = vector.broadcast %38 : vector<4x16x1xf32> to vector<4x16x128xf32>
    %40 = arith.mulf %17, %39 : vector<4x16x128xf32>
    %41 = vector.broadcast %38 : vector<4x16x1xf32> to vector<4x16x128xf32>
    %42 = arith.mulf %23, %41 : vector<4x16x128xf32>
    %cst_22 = arith.constant 0.0883883461 : f32
    %43 = vector.broadcast %cst_22 : f32 to vector<4x16x128xf32>
    %44 = arith.mulf %32, %43 : vector<4x16x128xf32>
    %45 = arith.truncf %44 : vector<4x16x128xf32> to vector<4x16x128xbf16>
    %46 = arith.truncf %42 : vector<4x16x128xf32> to vector<4x16x128xbf16>
    %47 = tpu.transpose %40, [0, 2, 1] : vector<4x16x128xf32> -> vector<4x128x16xf32>
    %48 = arith.truncf %47 : vector<4x128x16xf32> to vector<4x128x16xbf16>
    %49 = tpu.iota {dimensions = array<i32: 2>} : vector<1x1x128xi32>
    %50 = tpu.iota {dimensions = array<i32: 1>} : vector<1x128x1xi32>
    %cst_23 = arith.constant 0.000000e+00 : f32
    %51 = vector.broadcast %cst_23 : f32 to vector<4x16x128xf32>
    %c0_i32 = arith.constant 0 : i32
    %52 = vector.broadcast %c0_i32 : i32 to vector<1x128x1xi32>
    %53 = arith.cmpi sge, %50, %52 : vector<1x128x1xi32>
    %c32_i32 = arith.constant 32 : i32
    %54 = vector.broadcast %c32_i32 : i32 to vector<1x128x1xi32>
    %55 = arith.cmpi slt, %50, %54 : vector<1x128x1xi32>
    %56 = arith.andi %53, %55 : vector<1x128x1xi1>
    %c0_i32_24 = arith.constant 0 : i32
    %57 = arith.sitofp %c0_i32_24 : i32 to bf16
    %58 = vector.shape_cast %56 : vector<1x128x1xi1> to vector<1x128x1xi1>
    %59 = vector.broadcast %58 : vector<1x128x1xi1> to vector<4x128x16xi1>
    %60 = vector.broadcast %57 : bf16 to vector<4x128x16xbf16>
    %61 = arith.select %59, %48, %60 : vector<4x128x16xi1>, vector<4x128x16xbf16>
    %c0_i32_25 = arith.constant 0 : i32
    %62 = vector.broadcast %c0_i32_25 : i32 to vector<1x1x128xi32>
    %63 = arith.cmpi sge, %49, %62 : vector<1x1x128xi32>
    %c32_i32_26 = arith.constant 32 : i32
    %64 = vector.broadcast %c32_i32_26 : i32 to vector<1x1x128xi32>
    %65 = arith.cmpi slt, %49, %64 : vector<1x1x128xi32>
    %66 = arith.andi %63, %65 : vector<1x1x128xi1>
    %c0_i32_27 = arith.constant 0 : i32
    %67 = arith.sitofp %c0_i32_27 : i32 to bf16
    %68 = vector.shape_cast %66 : vector<1x1x128xi1> to vector<1x1x128xi1>
    %69 = vector.broadcast %68 : vector<1x1x128xi1> to vector<4x16x128xi1>
    %70 = vector.broadcast %67 : bf16 to vector<4x16x128xbf16>
    %71 = arith.select %69, %46, %70 : vector<4x16x128xi1>, vector<4x16x128xbf16>
    "tpu.trace_start"() <{level = 10 : i32, message = "bqd,bdk->bqk"}> : () -> ()
    %cst_28 = arith.constant dense<0.000000e+00> : vector<4x16x16xf32>
    %72 = tpu.matmul %45, %61, %cst_28 {dimension_numbers = #tpu.dot_dimension_numbers<[2], [1], [1], [2], [0, 0, 0, 1, 1, 2], [0], [0]>} : vector<4x16x128xbf16>, vector<4x128x16xbf16>, vector<4x16x16xf32> -> vector<4x16x16xf32>
    "tpu.trace_stop"() : () -> ()
    %cst_29 = arith.constant dense<0xFF800000> : vector<4x16xf32>
    %73 = vector.multi_reduction <maximumf>, %72, %cst_29 [2] : vector<4x16x16xf32> to vector<4x16xf32>
    %74 = vector.shape_cast %73 : vector<4x16xf32> to vector<4x16x1xf32>
    %75 = vector.broadcast %74 : vector<4x16x1xf32> to vector<4x16x16xf32>
    %76 = arith.subf %72, %75 : vector<4x16x16xf32>
    %77 = math.exp %76 : vector<4x16x16xf32>
    %cst_30 = arith.constant dense<0.000000e+00> : vector<4x16xf32>
    %78 = vector.multi_reduction <add>, %77, %cst_30 [2] : vector<4x16x16xf32> to vector<4x16xf32>
    %79 = vector.shape_cast %78 : vector<4x16xf32> to vector<4x16x1xf32>
    %80 = tpu.reciprocal %79 : vector<4x16x1xf32> -> vector<4x16x1xf32>
    %81 = vector.broadcast %80 : vector<4x16x1xf32> to vector<4x16x16xf32>
    %82 = arith.mulf %77, %81 : vector<4x16x16xf32>
    %83 = arith.truncf %82 : vector<4x16x16xf32> to vector<4x16x16xbf16>
    "tpu.trace_start"() <{level = 10 : i32, message = "bqk,bkd->bqd"}> : () -> ()
    %cst_31 = arith.constant dense<0.000000e+00> : vector<4x16x128xf32>
    %84 = tpu.matmul %83, %71, %cst_31 {dimension_numbers = #tpu.dot_dimension_numbers<[2], [1], [1], [2], [0, 0, 0, 1, 1, 2], [0], [0]>} : vector<4x16x16xbf16>, vector<4x16x128xbf16>, vector<4x16x128xf32> -> vector<4x16x128xf32>
    "tpu.trace_stop"() : () -> ()
    %85 = arith.addf %51, %84 : vector<4x16x128xf32>
    %c32_i32_32 = arith.constant 32 : i32
    %86 = vector.broadcast %c32_i32_32 : i32 to vector<1x128x1xi32>
    %87 = arith.cmpi sge, %50, %86 : vector<1x128x1xi32>
    %c64_i32 = arith.constant 64 : i32
    %88 = vector.broadcast %c64_i32 : i32 to vector<1x128x1xi32>
    %89 = arith.cmpi slt, %50, %88 : vector<1x128x1xi32>
    %90 = arith.andi %87, %89 : vector<1x128x1xi1>
    %c0_i32_33 = arith.constant 0 : i32
    %91 = arith.sitofp %c0_i32_33 : i32 to bf16
    %92 = vector.shape_cast %90 : vector<1x128x1xi1> to vector<1x128x1xi1>
    %93 = vector.broadcast %92 : vector<1x128x1xi1> to vector<4x128x16xi1>
    %94 = vector.broadcast %91 : bf16 to vector<4x128x16xbf16>
    %95 = arith.select %93, %48, %94 : vector<4x128x16xi1>, vector<4x128x16xbf16>
    %c32_i32_34 = arith.constant 32 : i32
    %96 = vector.broadcast %c32_i32_34 : i32 to vector<1x1x128xi32>
    %97 = arith.cmpi sge, %49, %96 : vector<1x1x128xi32>
    %c64_i32_35 = arith.constant 64 : i32
    %98 = vector.broadcast %c64_i32_35 : i32 to vector<1x1x128xi32>
    %99 = arith.cmpi slt, %49, %98 : vector<1x1x128xi32>
    %100 = arith.andi %97, %99 : vector<1x1x128xi1>
    %c0_i32_36 = arith.constant 0 : i32
    %101 = arith.sitofp %c0_i32_36 : i32 to bf16
    %102 = vector.shape_cast %100 : vector<1x1x128xi1> to vector<1x1x128xi1>
    %103 = vector.broadcast %102 : vector<1x1x128xi1> to vector<4x16x128xi1>
    %104 = vector.broadcast %101 : bf16 to vector<4x16x128xbf16>
    %105 = arith.select %103, %46, %104 : vector<4x16x128xi1>, vector<4x16x128xbf16>
    "tpu.trace_start"() <{level = 10 : i32, message = "bqd,bdk->bqk"}> : () -> ()
    %cst_37 = arith.constant dense<0.000000e+00> : vector<4x16x16xf32>
    %106 = tpu.matmul %45, %95, %cst_37 {dimension_numbers = #tpu.dot_dimension_numbers<[2], [1], [1], [2], [0, 0, 0, 1, 1, 2], [0], [0]>} : vector<4x16x128xbf16>, vector<4x128x16xbf16>, vector<4x16x16xf32> -> vector<4x16x16xf32>
    "tpu.trace_stop"() : () -> ()
    %cst_38 = arith.constant dense<0xFF800000> : vector<4x16xf32>
    %107 = vector.multi_reduction <maximumf>, %106, %cst_38 [2] : vector<4x16x16xf32> to vector<4x16xf32>
    %108 = vector.shape_cast %107 : vector<4x16xf32> to vector<4x16x1xf32>
    %109 = vector.broadcast %108 : vector<4x16x1xf32> to vector<4x16x16xf32>
    %110 = arith.subf %106, %109 : vector<4x16x16xf32>
    %111 = math.exp %110 : vector<4x16x16xf32>
    %cst_39 = arith.constant dense<0.000000e+00> : vector<4x16xf32>
    %112 = vector.multi_reduction <add>, %111, %cst_39 [2] : vector<4x16x16xf32> to vector<4x16xf32>
    %113 = vector.shape_cast %112 : vector<4x16xf32> to vector<4x16x1xf32>
    %114 = tpu.reciprocal %113 : vector<4x16x1xf32> -> vector<4x16x1xf32>
    %115 = vector.broadcast %114 : vector<4x16x1xf32> to vector<4x16x16xf32>
    %116 = arith.mulf %111, %115 : vector<4x16x16xf32>
    %117 = arith.truncf %116 : vector<4x16x16xf32> to vector<4x16x16xbf16>
    "tpu.trace_start"() <{level = 10 : i32, message = "bqk,bkd->bqd"}> : () -> ()
    %cst_40 = arith.constant dense<0.000000e+00> : vector<4x16x128xf32>
    %118 = tpu.matmul %117, %105, %cst_40 {dimension_numbers = #tpu.dot_dimension_numbers<[2], [1], [1], [2], [0, 0, 0, 1, 1, 2], [0], [0]>} : vector<4x16x16xbf16>, vector<4x16x128xbf16>, vector<4x16x128xf32> -> vector<4x16x128xf32>
    "tpu.trace_stop"() : () -> ()
    %119 = arith.addf %85, %118 : vector<4x16x128xf32>
    %c64_i32_41 = arith.constant 64 : i32
    %120 = vector.broadcast %c64_i32_41 : i32 to vector<1x128x1xi32>
    %121 = arith.cmpi sge, %50, %120 : vector<1x128x1xi32>
    %c96_i32 = arith.constant 96 : i32
    %122 = vector.broadcast %c96_i32 : i32 to vector<1x128x1xi32>
    %123 = arith.cmpi slt, %50, %122 : vector<1x128x1xi32>
    %124 = arith.andi %121, %123 : vector<1x128x1xi1>
    %c0_i32_42 = arith.constant 0 : i32
    %125 = arith.sitofp %c0_i32_42 : i32 to bf16
    %126 = vector.shape_cast %124 : vector<1x128x1xi1> to vector<1x128x1xi1>
    %127 = vector.broadcast %126 : vector<1x128x1xi1> to vector<4x128x16xi1>
    %128 = vector.broadcast %125 : bf16 to vector<4x128x16xbf16>
    %129 = arith.select %127, %48, %128 : vector<4x128x16xi1>, vector<4x128x16xbf16>
    %c64_i32_43 = arith.constant 64 : i32
    %130 = vector.broadcast %c64_i32_43 : i32 to vector<1x1x128xi32>
    %131 = arith.cmpi sge, %49, %130 : vector<1x1x128xi32>
    %c96_i32_44 = arith.constant 96 : i32
    %132 = vector.broadcast %c96_i32_44 : i32 to vector<1x1x128xi32>
    %133 = arith.cmpi slt, %49, %132 : vector<1x1x128xi32>
    %134 = arith.andi %131, %133 : vector<1x1x128xi1>
    %c0_i32_45 = arith.constant 0 : i32
    %135 = arith.sitofp %c0_i32_45 : i32 to bf16
    %136 = vector.shape_cast %134 : vector<1x1x128xi1> to vector<1x1x128xi1>
    %137 = vector.broadcast %136 : vector<1x1x128xi1> to vector<4x16x128xi1>
    %138 = vector.broadcast %135 : bf16 to vector<4x16x128xbf16>
    %139 = arith.select %137, %46, %138 : vector<4x16x128xi1>, vector<4x16x128xbf16>
    "tpu.trace_start"() <{level = 10 : i32, message = "bqd,bdk->bqk"}> : () -> ()
    %cst_46 = arith.constant dense<0.000000e+00> : vector<4x16x16xf32>
    %140 = tpu.matmul %45, %129, %cst_46 {dimension_numbers = #tpu.dot_dimension_numbers<[2], [1], [1], [2], [0, 0, 0, 1, 1, 2], [0], [0]>} : vector<4x16x128xbf16>, vector<4x128x16xbf16>, vector<4x16x16xf32> -> vector<4x16x16xf32>
    "tpu.trace_stop"() : () -> ()
    %cst_47 = arith.constant dense<0xFF800000> : vector<4x16xf32>
    %141 = vector.multi_reduction <maximumf>, %140, %cst_47 [2] : vector<4x16x16xf32> to vector<4x16xf32>
    %142 = vector.shape_cast %141 : vector<4x16xf32> to vector<4x16x1xf32>
    %143 = vector.broadcast %142 : vector<4x16x1xf32> to vector<4x16x16xf32>
    %144 = arith.subf %140, %143 : vector<4x16x16xf32>
    %145 = math.exp %144 : vector<4x16x16xf32>
    %cst_48 = arith.constant dense<0.000000e+00> : vector<4x16xf32>
    %146 = vector.multi_reduction <add>, %145, %cst_48 [2] : vector<4x16x16xf32> to vector<4x16xf32>
    %147 = vector.shape_cast %146 : vector<4x16xf32> to vector<4x16x1xf32>
    %148 = tpu.reciprocal %147 : vector<4x16x1xf32> -> vector<4x16x1xf32>
    %149 = vector.broadcast %148 : vector<4x16x1xf32> to vector<4x16x16xf32>
    %150 = arith.mulf %145, %149 : vector<4x16x16xf32>
    %151 = arith.truncf %150 : vector<4x16x16xf32> to vector<4x16x16xbf16>
    "tpu.trace_start"() <{level = 10 : i32, message = "bqk,bkd->bqd"}> : () -> ()
    %cst_49 = arith.constant dense<0.000000e+00> : vector<4x16x128xf32>
    %152 = tpu.matmul %151, %139, %cst_49 {dimension_numbers = #tpu.dot_dimension_numbers<[2], [1], [1], [2], [0, 0, 0, 1, 1, 2], [0], [0]>} : vector<4x16x16xbf16>, vector<4x16x128xbf16>, vector<4x16x128xf32> -> vector<4x16x128xf32>
    "tpu.trace_stop"() : () -> ()
    %153 = arith.addf %119, %152 : vector<4x16x128xf32>
    %c96_i32_50 = arith.constant 96 : i32
    %154 = vector.broadcast %c96_i32_50 : i32 to vector<1x128x1xi32>
    %155 = arith.cmpi sge, %50, %154 : vector<1x128x1xi32>
    %c128_i32 = arith.constant 128 : i32
    %156 = vector.broadcast %c128_i32 : i32 to vector<1x128x1xi32>
    %157 = arith.cmpi slt, %50, %156 : vector<1x128x1xi32>
    %158 = arith.andi %155, %157 : vector<1x128x1xi1>
    %c0_i32_51 = arith.constant 0 : i32
    %159 = arith.sitofp %c0_i32_51 : i32 to bf16
    %160 = vector.shape_cast %158 : vector<1x128x1xi1> to vector<1x128x1xi1>
    %161 = vector.broadcast %160 : vector<1x128x1xi1> to vector<4x128x16xi1>
    %162 = vector.broadcast %159 : bf16 to vector<4x128x16xbf16>
    %163 = arith.select %161, %48, %162 : vector<4x128x16xi1>, vector<4x128x16xbf16>
    %c96_i32_52 = arith.constant 96 : i32
    %164 = vector.broadcast %c96_i32_52 : i32 to vector<1x1x128xi32>
    %165 = arith.cmpi sge, %49, %164 : vector<1x1x128xi32>
    %c128_i32_53 = arith.constant 128 : i32
    %166 = vector.broadcast %c128_i32_53 : i32 to vector<1x1x128xi32>
    %167 = arith.cmpi slt, %49, %166 : vector<1x1x128xi32>
    %168 = arith.andi %165, %167 : vector<1x1x128xi1>
    %c0_i32_54 = arith.constant 0 : i32
    %169 = arith.sitofp %c0_i32_54 : i32 to bf16
    %170 = vector.shape_cast %168 : vector<1x1x128xi1> to vector<1x1x128xi1>
    %171 = vector.broadcast %170 : vector<1x1x128xi1> to vector<4x16x128xi1>
    %172 = vector.broadcast %169 : bf16 to vector<4x16x128xbf16>
    %173 = arith.select %171, %46, %172 : vector<4x16x128xi1>, vector<4x16x128xbf16>
    "tpu.trace_start"() <{level = 10 : i32, message = "bqd,bdk->bqk"}> : () -> ()
    %cst_55 = arith.constant dense<0.000000e+00> : vector<4x16x16xf32>
    %174 = tpu.matmul %45, %163, %cst_55 {dimension_numbers = #tpu.dot_dimension_numbers<[2], [1], [1], [2], [0, 0, 0, 1, 1, 2], [0], [0]>} : vector<4x16x128xbf16>, vector<4x128x16xbf16>, vector<4x16x16xf32> -> vector<4x16x16xf32>
    "tpu.trace_stop"() : () -> ()
    %cst_56 = arith.constant dense<0xFF800000> : vector<4x16xf32>
    %175 = vector.multi_reduction <maximumf>, %174, %cst_56 [2] : vector<4x16x16xf32> to vector<4x16xf32>
    %176 = vector.shape_cast %175 : vector<4x16xf32> to vector<4x16x1xf32>
    %177 = vector.broadcast %176 : vector<4x16x1xf32> to vector<4x16x16xf32>
    %178 = arith.subf %174, %177 : vector<4x16x16xf32>
    %179 = math.exp %178 : vector<4x16x16xf32>
    %cst_57 = arith.constant dense<0.000000e+00> : vector<4x16xf32>
    %180 = vector.multi_reduction <add>, %179, %cst_57 [2] : vector<4x16x16xf32> to vector<4x16xf32>
    %181 = vector.shape_cast %180 : vector<4x16xf32> to vector<4x16x1xf32>
    %182 = tpu.reciprocal %181 : vector<4x16x1xf32> -> vector<4x16x1xf32>
    %183 = vector.broadcast %182 : vector<4x16x1xf32> to vector<4x16x16xf32>
    %184 = arith.mulf %179, %183 : vector<4x16x16xf32>
    %185 = arith.truncf %184 : vector<4x16x16xf32> to vector<4x16x16xbf16>
    "tpu.trace_start"() <{level = 10 : i32, message = "bqk,bkd->bqd"}> : () -> ()
    %cst_58 = arith.constant dense<0.000000e+00> : vector<4x16x128xf32>
    %186 = tpu.matmul %185, %173, %cst_58 {dimension_numbers = #tpu.dot_dimension_numbers<[2], [1], [1], [2], [0, 0, 0, 1, 1, 2], [0], [0]>} : vector<4x16x16xbf16>, vector<4x16x128xbf16>, vector<4x16x128xf32> -> vector<4x16x128xf32>
    "tpu.trace_stop"() : () -> ()
    %187 = arith.addf %153, %186 : vector<4x16x128xf32>
    %188 = arith.addf %0, %187 : vector<4x16x128xf32>
    %189 = vector.shape_cast %188 : vector<4x16x128xf32> to vector<64x128xf32>
    %190 = arith.truncf %189 : vector<64x128xf32> to vector<64x128xbf16>
    %c0_59 = arith.constant 0 : index
    %c0_60 = arith.constant 0 : index
    %191 = vector.load %arg10[%c0_59, %c0_60] : memref<128x128xbf16, #tpu.memory_space<vmem>>, vector<128x128xbf16>
    %cst_61 = arith.constant dense<0.000000e+00> : vector<64x128xf32>
    %192 = tpu.matmul %190, %191, %cst_61 {dimension_numbers = #tpu.dot_dimension_numbers<[1], [0], [0], [1], [0, 0, 1, 1], [], []>} : vector<64x128xbf16>, vector<128x128xbf16>, vector<64x128xf32> -> vector<64x128xf32>
    %c0_62 = arith.constant 0 : index
    %c0_63 = arith.constant 0 : index
    %193 = vector.load %arg11[%c0_62, %c0_63] : memref<1x128xf32, #tpu.memory_space<vmem>>, vector<1x128xf32>
    %194 = vector.broadcast %193 : vector<1x128xf32> to vector<64x128xf32>
    %195 = arith.addf %192, %194 : vector<64x128xf32>
    %196 = vector.shape_cast %195 : vector<64x128xf32> to vector<4x16x128xf32>
    %cst_64 = arith.constant 0.000000e+00 : f32
    %197 = vector.broadcast %cst_64 : f32 to vector<4x16x128xf32>
    %198 = arith.maximumf %196, %197 : vector<4x16x128xf32>
    %199 = arith.addf %188, %198 : vector<4x16x128xf32>
    %c0_65 = arith.constant 0 : index
    %c0_66 = arith.constant 0 : index
    %c0_67 = arith.constant 0 : index
    %200 = vector.load %arg12[%c0_65, %c0_66, %c0_67] : memref<4x16x128xf32, #tpu.memory_space<vmem>>, vector<4x16x128xf32>
    tpu.vector_store %arg12[%c0_65, %c0_66, %c0_67], %199 {strides = array<i32>} : memref<4x16x128xf32, #tpu.memory_space<vmem>>, vector<4x16x128xf32>,
    return
  }
  func.func @transform_0(%arg0: i32) -> (i32, i32, i32) {
    %c0_i32 = arith.constant 0 : i32
    %c0_i32_0 = arith.constant 0 : i32
    %c0_i32_1 = arith.constant 0 : i32
    return %arg0, %c0_i32, %c0_i32_0 : i32, i32, i32
  }
  func.func @transform_1(%arg0: i32) -> (i32, i32, i32) {
    %c0_i32 = arith.constant 0 : i32
    %c0_i32_0 = arith.constant 0 : i32
    %c0_i32_1 = arith.constant 0 : i32
    return %arg0, %c0_i32, %c0_i32_0 : i32, i32, i32
  }
  func.func @transform_2(%arg0: i32) -> (i32, i32, i32) {
    %c0_i32 = arith.constant 0 : i32
    %c0_i32_0 = arith.constant 0 : i32
    %c0_i32_1 = arith.constant 0 : i32
    return %arg0, %c0_i32, %c0_i32_0 : i32, i32, i32
  }
  func.func @transform_3(%arg0: i32) -> (i32, i32) {
    %c0_i32 = arith.constant 0 : i32
    %c0_i32_0 = arith.constant 0 : i32
    %c0_i32_1 = arith.constant 0 : i32
    return %c0_i32, %c0_i32_0 : i32, i32
  }
  func.func @transform_4(%arg0: i32) -> (i32, i32) {
    %c0_i32 = arith.constant 0 : i32
    %c0_i32_0 = arith.constant 0 : i32
    %c0_i32_1 = arith.constant 0 : i32
    return %c0_i32, %c0_i32_0 : i32, i32
  }
  func.func @transform_5(%arg0: i32) -> (i32, i32) {
    %c0_i32 = arith.constant 0 : i32
    %c0_i32_0 = arith.constant 0 : i32
    %c0_i32_1 = arith.constant 0 : i32
    return %c0_i32, %c0_i32_0 : i32, i32
  }
  func.func @transform_6(%arg0: i32) -> (i32, i32) {
    %c0_i32 = arith.constant 0 : i32
    %c0_i32_0 = arith.constant 0 : i32
    %c0_i32_1 = arith.constant 0 : i32
    return %c0_i32, %c0_i32_0 : i32, i32
  }
  func.func @transform_7(%arg0: i32) -> (i32, i32) {
    %c0_i32 = arith.constant 0 : i32
    %c0_i32_0 = arith.constant 0 : i32
    %c0_i32_1 = arith.constant 0 : i32
    return %c0_i32, %c0_i32_0 : i32, i32
  }
  func.func @transform_8(%arg0: i32) -> (i32, i32) {
    %c0_i32 = arith.constant 0 : i32
    %c0_i32_0 = arith.constant 0 : i32
    %c0_i32_1 = arith.constant 0 : i32
    return %c0_i32, %c0_i32_0 : i32, i32
  }
  func.func @transform_9(%arg0: i32) -> (i32, i32) {
    %c0_i32 = arith.constant 0 : i32
    %c0_i32_0 = arith.constant 0 : i32
    %c0_i32_1 = arith.constant 0 : i32
    return %c0_i32, %c0_i32_0 : i32, i32
  }
  func.func @transform_10(%arg0: i32) -> (i32, i32) {
    %c0_i32 = arith.constant 0 : i32
    %c0_i32_0 = arith.constant 0 : i32
    %c0_i32_1 = arith.constant 0 : i32
    return %c0_i32, %c0_i32_0 : i32, i32
  }
  func.func @transform_11(%arg0: i32) -> (i32, i32, i32) {
    %c0_i32 = arith.constant 0 : i32
    %c0_i32_0 = arith.constant 0 : i32
    %c0_i32_1 = arith.constant 0 : i32
    return %arg0, %c0_i32, %c0_i32_0 : i32, i32, i32
  }
}

module attributes {stable_mosaic.version = 11 : i64} {
  func.func @_mab_kernel(%arg0: i32, %arg1: memref<4x1x1xi32, #tpu.memory_space<vmem>>, %arg2: memref<4x16x128xf32, #tpu.memory_space<vmem>>, %arg3: memref<4x16x128xf32, #tpu.memory_space<vmem>>, %arg4: memref<128x128xbf16, #tpu.memory_space<vmem>>, %arg5: memref<1x128xf32, #tpu.memory_space<vmem>>, %arg6: memref<128x128xbf16, #tpu.memory_space<vmem>>, %arg7: memref<1x128xf32, #tpu.memory_space<vmem>>, %arg8: memref<128x128xbf16, #tpu.memory_space<vmem>>, %arg9: memref<1x128xf32, #tpu.memory_space<vmem>>, %arg10: memref<128x128xbf16, #tpu.memory_space<vmem>>, %arg11: memref<1x128xf32, #tpu.memory_space<vmem>>, %arg12: memref<4x16x128xf32, #tpu.memory_space<vmem>>) attributes {dimension_semantics = [#tpu.dimension_semantics<arbitrary>], iteration_bounds = array<i64: 1>, scalar_prefetch = 0 : i64, scratch_operands = 0 : i64, tpu.core_type = #tpu.core_type<tc>, window_params = [{transform_indices = @transform_0, window_bounds = array<i64: 4, 1, 1>}, {transform_indices = @transform_1, window_bounds = array<i64: 4, 16, 128>}, {transform_indices = @transform_2, window_bounds = array<i64: 4, 16, 128>}, {pipeline_mode = #tpu.pipeline_mode<synchronous>, transform_indices = @transform_3, window_bounds = array<i64: 128, 128>}, {pipeline_mode = #tpu.pipeline_mode<synchronous>, transform_indices = @transform_4, window_bounds = array<i64: 1, 128>}, {pipeline_mode = #tpu.pipeline_mode<synchronous>, transform_indices = @transform_5, window_bounds = array<i64: 128, 128>}, {pipeline_mode = #tpu.pipeline_mode<synchronous>, transform_indices = @transform_6, window_bounds = array<i64: 1, 128>}, {pipeline_mode = #tpu.pipeline_mode<synchronous>, transform_indices = @transform_7, window_bounds = array<i64: 128, 128>}, {pipeline_mode = #tpu.pipeline_mode<synchronous>, transform_indices = @transform_8, window_bounds = array<i64: 1, 128>}, {pipeline_mode = #tpu.pipeline_mode<synchronous>, transform_indices = @transform_9, window_bounds = array<i64: 128, 128>}, {pipeline_mode = #tpu.pipeline_mode<synchronous>, transform_indices = @transform_10, window_bounds = array<i64: 1, 128>}, {transform_indices = @transform_11, window_bounds = array<i64: 4, 16, 128>}]} {
    %c0 = arith.constant 0 : index
    %c0_0 = arith.constant 0 : index
    %c0_1 = arith.constant 0 : index
    %0 = vector.load %arg2[%c0, %c0_0, %c0_1] : memref<4x16x128xf32, #tpu.memory_space<vmem>>, vector<4x16x128xf32>
    %c0_2 = arith.constant 0 : index
    %c0_3 = arith.constant 0 : index
    %c0_4 = arith.constant 0 : index
    %1 = vector.load %arg3[%c0_2, %c0_3, %c0_4] : memref<4x16x128xf32, #tpu.memory_space<vmem>>, vector<4x16x128xf32>
    %2 = vector.shape_cast %0 : vector<4x16x128xf32> to vector<64x128xf32>
    %3 = arith.truncf %2 : vector<64x128xf32> to vector<64x128xbf16>
    %4 = vector.shape_cast %1 : vector<4x16x128xf32> to vector<64x128xf32>
    %5 = arith.truncf %4 : vector<64x128xf32> to vector<64x128xbf16>
    %c0_5 = arith.constant 0 : index
    %c0_6 = arith.constant 0 : index
    %6 = vector.load %arg4[%c0_5, %c0_6] : memref<128x128xbf16, #tpu.memory_space<vmem>>, vector<128x128xbf16>
    %cst = arith.constant dense<0.000000e+00> : vector<64x128xf32>
    %7 = tpu.matmul %3, %6, %cst {dimension_numbers = #tpu.dot_dimension_numbers<[1], [0], [0], [1], [0, 0, 1, 1], [], []>} : vector<64x128xbf16>, vector<128x128xbf16>, vector<64x128xf32> -> vector<64x128xf32>
    %c0_7 = arith.constant 0 : index
    %c0_8 = arith.constant 0 : index
    %8 = vector.load %arg5[%c0_7, %c0_8] : memref<1x128xf32, #tpu.memory_space<vmem>>, vector<1x128xf32>
    %9 = vector.broadcast %8 : vector<1x128xf32> to vector<64x128xf32>
    %10 = arith.addf %7, %9 : vector<64x128xf32>
    %11 = vector.shape_cast %10 : vector<64x128xf32> to vector<4x16x128xf32>
    %c0_9 = arith.constant 0 : index
    %c0_10 = arith.constant 0 : index
    %12 = vector.load %arg6[%c0_9, %c0_10] : memref<128x128xbf16, #tpu.memory_space<vmem>>, vector<128x128xbf16>
    %cst_11 = arith.constant dense<0.000000e+00> : vector<64x128xf32>
    %13 = tpu.matmul %5, %12, %cst_11 {dimension_numbers = #tpu.dot_dimension_numbers<[1], [0], [0], [1], [0, 0, 1, 1], [], []>} : vector<64x128xbf16>, vector<128x128xbf16>, vector<64x128xf32> -> vector<64x128xf32>
    %c0_12 = arith.constant 0 : index
    %c0_13 = arith.constant 0 : index
    %14 = vector.load %arg7[%c0_12, %c0_13] : memref<1x128xf32, #tpu.memory_space<vmem>>, vector<1x128xf32>
    %15 = vector.broadcast %14 : vector<1x128xf32> to vector<64x128xf32>
    %16 = arith.addf %13, %15 : vector<64x128xf32>
    %17 = vector.shape_cast %16 : vector<64x128xf32> to vector<4x16x128xf32>
    %c0_14 = arith.constant 0 : index
    %c0_15 = arith.constant 0 : index
    %18 = vector.load %arg8[%c0_14, %c0_15] : memref<128x128xbf16, #tpu.memory_space<vmem>>, vector<128x128xbf16>
    %cst_16 = arith.constant dense<0.000000e+00> : vector<64x128xf32>
    %19 = tpu.matmul %5, %18, %cst_16 {dimension_numbers = #tpu.dot_dimension_numbers<[1], [0], [0], [1], [0, 0, 1, 1], [], []>} : vector<64x128xbf16>, vector<128x128xbf16>, vector<64x128xf32> -> vector<64x128xf32>
    %c0_17 = arith.constant 0 : index
    %c0_18 = arith.constant 0 : index
    %20 = vector.load %arg9[%c0_17, %c0_18] : memref<1x128xf32, #tpu.memory_space<vmem>>, vector<1x128xf32>
    %21 = vector.broadcast %20 : vector<1x128xf32> to vector<64x128xf32>
    %22 = arith.addf %19, %21 : vector<64x128xf32>
    %23 = vector.shape_cast %22 : vector<64x128xf32> to vector<4x16x128xf32>
    %c0_19 = arith.constant 0 : index
    %c0_20 = arith.constant 0 : index
    %c0_21 = arith.constant 0 : index
    %24 = vector.load %arg1[%c0_19, %c0_20, %c0_21] : memref<4x1x1xi32, #tpu.memory_space<vmem>>, vector<4x1x1xi32>
    %25 = tpu.iota {dimensions = array<i32: 1>} : vector<1x16x1xi32>
    %26 = vector.broadcast %25 : vector<1x16x1xi32> to vector<4x16x1xi32>
    %27 = vector.broadcast %24 : vector<4x1x1xi32> to vector<4x16x1xi32>
    %28 = arith.cmpi slt, %26, %27 : vector<4x16x1xi32>
    %29 = arith.extui %28 : vector<4x16x1xi1> to vector<4x16x1xi32>
    %30 = arith.sitofp %29 : vector<4x16x1xi32> to vector<4x16x1xf32>
    %31 = vector.broadcast %30 : vector<4x16x1xf32> to vector<4x16x128xf32>
    %32 = arith.mulf %11, %31 : vector<4x16x128xf32>
    %33 = tpu.iota {dimensions = array<i32: 1>} : vector<1x16x1xi32>
    %34 = vector.broadcast %33 : vector<1x16x1xi32> to vector<4x16x1xi32>
    %35 = vector.broadcast %24 : vector<4x1x1xi32> to vector<4x16x1xi32>
    %36 = arith.cmpi slt, %34, %35 : vector<4x16x1xi32>
    %37 = arith.extui %36 : vector<4x16x1xi1> to vector<4x16x1xi32>
    %38 = arith.sitofp %37 : vector<4x16x1xi32> to vector<4x16x1xf32>
    %39 = vector.broadcast %38 : vector<4x16x1xf32> to vector<4x16x128xf32>
    %40 = arith.mulf %17, %39 : vector<4x16x128xf32>
    %41 = vector.broadcast %38 : vector<4x16x1xf32> to vector<4x16x128xf32>
    %42 = arith.mulf %23, %41 : vector<4x16x128xf32>
    %cst_22 = arith.constant 0.0883883461 : f32
    %43 = vector.broadcast %cst_22 : f32 to vector<4x16x128xf32>
    %44 = arith.mulf %32, %43 : vector<4x16x128xf32>
    %45 = arith.truncf %44 : vector<4x16x128xf32> to vector<4x16x128xbf16>
    %46 = arith.truncf %42 : vector<4x16x128xf32> to vector<4x16x128xbf16>
    %47 = tpu.transpose %40, [0, 2, 1] : vector<4x16x128xf32> -> vector<4x128x16xf32>
    %48 = arith.truncf %47 : vector<4x128x16xf32> to vector<4x128x16xbf16>
    %49 = tpu.iota {dimensions = array<i32: 2>} : vector<1x1x128xi32>
    %50 = tpu.iota {dimensions = array<i32: 1>} : vector<1x128x1xi32>
    %cst_23 = arith.constant 0.000000e+00 : f32
    %51 = vector.broadcast %cst_23 : f32 to vector<4x16x128xf32>
    %c0_i32 = arith.constant 0 : i32
    %52 = vector.broadcast %c0_i32 : i32 to vector<1x128x1xi32>
    %53 = arith.cmpi sge, %50, %52 : vector<1x128x1xi32>
    %c32_i32 = arith.constant 32 : i32
    %54 = vector.broadcast %c32_i32 : i32 to vector<1x128x1xi32>
    %55 = arith.cmpi slt, %50, %54 : vector<1x128x1xi32>
    %56 = arith.andi %53, %55 : vector<1x128x1xi1>
    %c0_i32_24 = arith.constant 0 : i32
    %57 = arith.sitofp %c0_i32_24 : i32 to bf16
    %58 = vector.shape_cast %56 : vector<1x128x1xi1> to vector<1x128x1xi1>
    %59 = vector.broadcast %58 : vector<1x128x1xi1> to vector<4x128x16xi1>
    %60 = vector.broadcast %57 : bf16 to vector<4x128x16xbf16>
    %61 = arith.select %59, %48, %60 : vector<4x128x16xi1>, vector<4x128x16xbf16>
    %c0_i32_25 = arith.constant 0 : i32
    %62 = vector.broadcast %c0_i32_25 : i32 to vector<1x1x128xi32>
    %63 = arith.cmpi sge, %49, %62 : vector<1x1x128xi32>
    %c32_i32_26 = arith.constant 32 : i32
    %64 = vector.broadcast %c32_i32_26 : i32 to vector<1x1x128xi32>
    %65 = arith.cmpi slt, %49, %64 : vector<1x1x128xi32>
    %66 = arith.andi %63, %65 : vector<1x1x128xi1>
    %c0_i32_27 = arith.constant 0 : i32
    %67 = arith.sitofp %c0_i32_27 : i32 to bf16
    %68 = vector.shape_cast %66 : vector<1x1x128xi1> to vector<1x1x128xi1>
    %69 = vector.broadcast %68 : vector<1x1x128xi1> to vector<4x16x128xi1>
    %70 = vector.broadcast %67 : bf16 to vector<4x16x128xbf16>
    %71 = arith.select %69, %46, %70 : vector<4x16x128xi1>, vector<4x16x128xbf16>
    "tpu.trace_start"() <{level = 10 : i32, message = "bqd,bdk->bqk"}> : () -> ()
    %cst_28 = arith.constant dense<0.000000e+00> : vector<4x16x16xf32>
    %72 = tpu.matmul %45, %61, %cst_28 {dimension_numbers = #tpu.dot_dimension_numbers<[2], [1], [1], [2], [0, 0, 0, 1, 1, 2], [0], [0]>} : vector<4x16x128xbf16>, vector<4x128x16xbf16>, vector<4x16x16xf32> -> vector<4x16x16xf32>
    "tpu.trace_stop"() : () -> ()
    %cst_29 = arith.constant dense<0xFF800000> : vector<4x16xf32>
    %73 = vector.multi_reduction <maximumf>, %72, %cst_29 [2] : vector<4x16x16xf32> to vector<4x16xf32>
    %74 = vector.shape_cast %73 : vector<4x16xf32> to vector<4x16x1xf32>
    %75 = vector.broadcast %74 : vector<4x16x1xf32> to vector<4x16x16xf32>
    %76 = arith.subf %72, %75 : vector<4x16x16xf32>
    %77 = math.exp %76 : vector<4x16x16xf32>
    %cst_30 = arith.constant dense<0.000000e+00> : vector<4x16xf32>
    %78 = vector.multi_reduction <add>, %77, %cst_30 [2] : vector<4x16x16xf32> to vector<4x16xf32>
    %79 = vector.shape_cast %78 : vector<4x16xf32> to vector<4x16x1xf32>
    %80 = tpu.reciprocal %79 : vector<4x16x1xf32> -> vector<4x16x1xf32>
    %81 = vector.broadcast %80 : vector<4x16x1xf32> to vector<4x16x16xf32>
    %82 = arith.mulf %77, %81 : vector<4x16x16xf32>
    %83 = arith.truncf %82 : vector<4x16x16xf32> to vector<4x16x16xbf16>
    "tpu.trace_start"() <{level = 10 : i32, message = "bqk,bkd->bqd"}> : () -> ()
    %cst_31 = arith.constant dense<0.000000e+00> : vector<4x16x128xf32>
    %84 = tpu.matmul %83, %71, %cst_31 {dimension_numbers = #tpu.dot_dimension_numbers<[2], [1], [1], [2], [0, 0, 0, 1, 1, 2], [0], [0]>} : vector<4x16x16xbf16>, vector<4x16x128xbf16>, vector<4x16x128xf32> -> vector<4x16x128xf32>
    "tpu.trace_stop"() : () -> ()
    %85 = arith.addf %51, %84 : vector<4x16x128xf32>
    %c32_i32_32 = arith.constant 32 : i32
    %86 = vector.broadcast %c32_i32_32 : i32 to vector<1x128x1xi32>
    %87 = arith.cmpi sge, %50, %86 : vector<1x128x1xi32>
    %c64_i32 = arith.constant 64 : i32
    %88 = vector.broadcast %c64_i32 : i32 to vector<1x128x1xi32>
    %89 = arith.cmpi slt, %50, %88 : vector<1x128x1xi32>
    %90 = arith.andi %87, %89 : vector<1x128x1xi1>
    %c0_i32_33 = arith.constant 0 : i32
    %91 = arith.sitofp %c0_i32_33 : i32 to bf16
    %92 = vector.shape_cast %90 : vector<1x128x1xi1> to vector<1x128x1xi1>
    %93 = vector.broadcast %92 : vector<1x128x1xi1> to vector<4x128x16xi1>
    %94 = vector.broadcast %91 : bf16 to vector<4x128x16xbf16>
    %95 = arith.select %93, %48, %94 : vector<4x128x16xi1>, vector<4x128x16xbf16>
    %c32_i32_34 = arith.constant 32 : i32
    %96 = vector.broadcast %c32_i32_34 : i32 to vector<1x1x128xi32>
    %97 = arith.cmpi sge, %49, %96 : vector<1x1x128xi32>
    %c64_i32_35 = arith.constant 64 : i32
    %98 = vector.broadcast %c64_i32_35 : i32 to vector<1x1x128xi32>
    %99 = arith.cmpi slt, %49, %98 : vector<1x1x128xi32>
    %100 = arith.andi %97, %99 : vector<1x1x128xi1>
    %c0_i32_36 = arith.constant 0 : i32
    %101 = arith.sitofp %c0_i32_36 : i32 to bf16
    %102 = vector.shape_cast %100 : vector<1x1x128xi1> to vector<1x1x128xi1>
    %103 = vector.broadcast %102 : vector<1x1x128xi1> to vector<4x16x128xi1>
    %104 = vector.broadcast %101 : bf16 to vector<4x16x128xbf16>
    %105 = arith.select %103, %46, %104 : vector<4x16x128xi1>, vector<4x16x128xbf16>
    "tpu.trace_start"() <{level = 10 : i32, message = "bqd,bdk->bqk"}> : () -> ()
    %cst_37 = arith.constant dense<0.000000e+00> : vector<4x16x16xf32>
    %106 = tpu.matmul %45, %95, %cst_37 {dimension_numbers = #tpu.dot_dimension_numbers<[2], [1], [1], [2], [0, 0, 0, 1, 1, 2], [0], [0]>} : vector<4x16x128xbf16>, vector<4x128x16xbf16>, vector<4x16x16xf32> -> vector<4x16x16xf32>
    "tpu.trace_stop"() : () -> ()
    %cst_38 = arith.constant dense<0xFF800000> : vector<4x16xf32>
    %107 = vector.multi_reduction <maximumf>, %106, %cst_38 [2] : vector<4x16x16xf32> to vector<4x16xf32>
    %108 = vector.shape_cast %107 : vector<4x16xf32> to vector<4x16x1xf32>
    %109 = vector.broadcast %108 : vector<4x16x1xf32> to vector<4x16x16xf32>
    %110 = arith.subf %106, %109 : vector<4x16x16xf32>
    %111 = math.exp %110 : vector<4x16x16xf32>
    %cst_39 = arith.constant dense<0.000000e+00> : vector<4x16xf32>
    %112 = vector.multi_reduction <add>, %111, %cst_39 [2] : vector<4x16x16xf32> to vector<4x16xf32>
    %113 = vector.shape_cast %112 : vector<4x16xf32> to vector<4x16x1xf32>
    %114 = tpu.reciprocal %113 : vector<4x16x1xf32> -> vector<4x16x1xf32>
    %115 = vector.broadcast %114 : vector<4x16x1xf32> to vector<4x16x16xf32>
    %116 = arith.mulf %111, %115 : vector<4x16x16xf32>
    %117 = arith.truncf %116 : vector<4x16x16xf32> to vector<4x16x16xbf16>
    "tpu.trace_start"() <{level = 10 : i32, message = "bqk,bkd->bqd"}> : () -> ()
    %cst_40 = arith.constant dense<0.000000e+00> : vector<4x16x128xf32>
    %118 = tpu.matmul %117, %105, %cst_40 {dimension_numbers = #tpu.dot_dimension_numbers<[2], [1], [1], [2], [0, 0, 0, 1, 1, 2], [0], [0]>} : vector<4x16x16xbf16>, vector<4x16x128xbf16>, vector<4x16x128xf32> -> vector<4x16x128xf32>
    "tpu.trace_stop"() : () -> ()
    %119 = arith.addf %85, %118 : vector<4x16x128xf32>
    %c64_i32_41 = arith.constant 64 : i32
    %120 = vector.broadcast %c64_i32_41 : i32 to vector<1x128x1xi32>
    %121 = arith.cmpi sge, %50, %120 : vector<1x128x1xi32>
    %c96_i32 = arith.constant 96 : i32
    %122 = vector.broadcast %c96_i32 : i32 to vector<1x128x1xi32>
    %123 = arith.cmpi slt, %50, %122 : vector<1x128x1xi32>
    %124 = arith.andi %121, %123 : vector<1x128x1xi1>
    %c0_i32_42 = arith.constant 0 : i32
    %125 = arith.sitofp %c0_i32_42 : i32 to bf16
    %126 = vector.shape_cast %124 : vector<1x128x1xi1> to vector<1x128x1xi1>
    %127 = vector.broadcast %126 : vector<1x128x1xi1> to vector<4x128x16xi1>
    %128 = vector.broadcast %125 : bf16 to vector<4x128x16xbf16>
    %129 = arith.select %127, %48, %128 : vector<4x128x16xi1>, vector<4x128x16xbf16>
    %c64_i32_43 = arith.constant 64 : i32
    %130 = vector.broadcast %c64_i32_43 : i32 to vector<1x1x128xi32>
    %131 = arith.cmpi sge, %49, %130 : vector<1x1x128xi32>
    %c96_i32_44 = arith.constant 96 : i32
    %132 = vector.broadcast %c96_i32_44 : i32 to vector<1x1x128xi32>
    %133 = arith.cmpi slt, %49, %132 : vector<1x1x128xi32>
    %134 = arith.andi %131, %133 : vector<1x1x128xi1>
    %c0_i32_45 = arith.constant 0 : i32
    %135 = arith.sitofp %c0_i32_45 : i32 to bf16
    %136 = vector.shape_cast %134 : vector<1x1x128xi1> to vector<1x1x128xi1>
    %137 = vector.broadcast %136 : vector<1x1x128xi1> to vector<4x16x128xi1>
    %138 = vector.broadcast %135 : bf16 to vector<4x16x128xbf16>
    %139 = arith.select %137, %46, %138 : vector<4x16x128xi1>, vector<4x16x128xbf16>
    "tpu.trace_start"() <{level = 10 : i32, message = "bqd,bdk->bqk"}> : () -> ()
    %cst_46 = arith.constant dense<0.000000e+00> : vector<4x16x16xf32>
    %140 = tpu.matmul %45, %129, %cst_46 {dimension_numbers = #tpu.dot_dimension_numbers<[2], [1], [1], [2], [0, 0, 0, 1, 1, 2], [0], [0]>} : vector<4x16x128xbf16>, vector<4x128x16xbf16>, vector<4x16x16xf32> -> vector<4x16x16xf32>
    "tpu.trace_stop"() : () -> ()
    %cst_47 = arith.constant dense<0xFF800000> : vector<4x16xf32>
    %141 = vector.multi_reduction <maximumf>, %140, %cst_47 [2] : vector<4x16x16xf32> to vector<4x16xf32>
    %142 = vector.shape_cast %141 : vector<4x16xf32> to vector<4x16x1xf32>
    %143 = vector.broadcast %142 : vector<4x16x1xf32> to vector<4x16x16xf32>
    %144 = arith.subf %140, %143 : vector<4x16x16xf32>
    %145 = math.exp %144 : vector<4x16x16xf32>
    %cst_48 = arith.constant dense<0.000000e+00> : vector<4x16xf32>
    %146 = vector.multi_reduction <add>, %145, %cst_48 [2] : vector<4x16x16xf32> to vector<4x16xf32>
    %147 = vector.shape_cast %146 : vector<4x16xf32> to vector<4x16x1xf32>
    %148 = tpu.reciprocal %147 : vector<4x16x1xf32> -> vector<4x16x1xf32>
    %149 = vector.broadcast %148 : vector<4x16x1xf32> to vector<4x16x16xf32>
    %150 = arith.mulf %145, %149 : vector<4x16x16xf32>
    %151 = arith.truncf %150 : vector<4x16x16xf32> to vector<4x16x16xbf16>
    "tpu.trace_start"() <{level = 10 : i32, message = "bqk,bkd->bqd"}> : () -> ()
    %cst_49 = arith.constant dense<0.000000e+00> : vector<4x16x128xf32>
    %152 = tpu.matmul %151, %139, %cst_49 {dimension_numbers = #tpu.dot_dimension_numbers<[2], [1], [1], [2], [0, 0, 0, 1, 1, 2], [0], [0]>} : vector<4x16x16xbf16>, vector<4x16x128xbf16>, vector<4x16x128xf32> -> vector<4x16x128xf32>
    "tpu.trace_stop"() : () -> ()
    %153 = arith.addf %119, %152 : vector<4x16x128xf32>
    %c96_i32_50 = arith.constant 96 : i32
    %154 = vector.broadcast %c96_i32_50 : i32 to vector<1x128x1xi32>
    %155 = arith.cmpi sge, %50, %154 : vector<1x128x1xi32>
    %c128_i32 = arith.constant 128 : i32
    %156 = vector.broadcast %c128_i32 : i32 to vector<1x128x1xi32>
    %157 = arith.cmpi slt, %50, %156 : vector<1x128x1xi32>
    %158 = arith.andi %155, %157 : vector<1x128x1xi1>
    %c0_i32_51 = arith.constant 0 : i32
    %159 = arith.sitofp %c0_i32_51 : i32 to bf16
    %160 = vector.shape_cast %158 : vector<1x128x1xi1> to vector<1x128x1xi1>
    %161 = vector.broadcast %160 : vector<1x128x1xi1> to vector<4x128x16xi1>
    %162 = vector.broadcast %159 : bf16 to vector<4x128x16xbf16>
    %163 = arith.select %161, %48, %162 : vector<4x128x16xi1>, vector<4x128x16xbf16>
    %c96_i32_52 = arith.constant 96 : i32
    %164 = vector.broadcast %c96_i32_52 : i32 to vector<1x1x128xi32>
    %165 = arith.cmpi sge, %49, %164 : vector<1x1x128xi32>
    %c128_i32_53 = arith.constant 128 : i32
    %166 = vector.broadcast %c128_i32_53 : i32 to vector<1x1x128xi32>
    %167 = arith.cmpi slt, %49, %166 : vector<1x1x128xi32>
    %168 = arith.andi %165, %167 : vector<1x1x128xi1>
    %c0_i32_54 = arith.constant 0 : i32
    %169 = arith.sitofp %c0_i32_54 : i32 to bf16
    %170 = vector.shape_cast %168 : vector<1x1x128xi1> to vector<1x1x128xi1>
    %171 = vector.broadcast %170 : vector<1x1x128xi1> to vector<4x16x128xi1>
    %172 = vector.broadcast %169 : bf16 to vector<4x16x128xbf16>
    %173 = arith.select %171, %46, %172 : vector<4x16x128xi1>, vector<4x16x128xbf16>
    "tpu.trace_start"() <{level = 10 : i32, message = "bqd,bdk->bqk"}> : () -> ()
    %cst_55 = arith.constant dense<0.000000e+00> : vector<4x16x16xf32>
    %174 = tpu.matmul %45, %163, %cst_55 {dimension_numbers = #tpu.dot_dimension_numbers<[2], [1], [1], [2], [0, 0, 0, 1, 1, 2], [0], [0]>} : vector<4x16x128xbf16>, vector<4x128x16xbf16>, vector<4x16x16xf32> -> vector<4x16x16xf32>
    "tpu.trace_stop"() : () -> ()
    %cst_56 = arith.constant dense<0xFF800000> : vector<4x16xf32>
    %175 = vector.multi_reduction <maximumf>, %174, %cst_56 [2] : vector<4x16x16xf32> to vector<4x16xf32>
    %176 = vector.shape_cast %175 : vector<4x16xf32> to vector<4x16x1xf32>
    %177 = vector.broadcast %176 : vector<4x16x1xf32> to vector<4x16x16xf32>
    %178 = arith.subf %174, %177 : vector<4x16x16xf32>
    %179 = math.exp %178 : vector<4x16x16xf32>
    %cst_57 = arith.constant dense<0.000000e+00> : vector<4x16xf32>
    %180 = vector.multi_reduction <add>, %179, %cst_57 [2] : vector<4x16x16xf32> to vector<4x16xf32>
    %181 = vector.shape_cast %180 : vector<4x16xf32> to vector<4x16x1xf32>
    %182 = tpu.reciprocal %181 : vector<4x16x1xf32> -> vector<4x16x1xf32>
    %183 = vector.broadcast %182 : vector<4x16x1xf32> to vector<4x16x16xf32>
    %184 = arith.mulf %179, %183 : vector<4x16x16xf32>
    %185 = arith.truncf %184 : vector<4x16x16xf32> to vector<4x16x16xbf16>
    "tpu.trace_start"() <{level = 10 : i32, message = "bqk,bkd->bqd"}> : () -> ()
    %cst_58 = arith.constant dense<0.000000e+00> : vector<4x16x128xf32>
    %186 = tpu.matmul %185, %173, %cst_58 {dimension_numbers = #tpu.dot_dimension_numbers<[2], [1], [1], [2], [0, 0, 0, 1, 1, 2], [0], [0]>} : vector<4x16x16xbf16>, vector<4x16x128xbf16>, vector<4x16x128xf32> -> vector<4x16x128xf32>
    "tpu.trace_stop"() : () -> ()
    %187 = arith.addf %153, %186 : vector<4x16x128xf32>
    %188 = arith.addf %0, %187 : vector<4x16x128xf32>
    %189 = vector.shape_cast %188 : vector<4x16x128xf32> to vector<64x128xf32>
    %190 = arith.truncf %189 : vector<64x128xf32> to vector<64x128xbf16>
    %c0_59 = arith.constant 0 : index
    %c0_60 = arith.constant 0 : index
    %191 = vector.load %arg10[%c0_59, %c0_60] : memref<128x128xbf16, #tpu.memory_space<vmem>>, vector<128x128xbf16>
    %cst_61 = arith.constant dense<0.000000e+00> : vector<64x128xf32>
    %192 = tpu.matmul %190, %191, %cst_61 {dimension_numbers = #tpu.dot_dimension_numbers<[1], [0], [0], [1], [0, 0, 1, 1], [], []>} : vector<64x128xbf16>, vector<128x128xbf16>, vector<64x128xf32> -> vector<64x128xf32>
    %c0_62 = arith.constant 0 : index
    %c0_63 = arith.constant 0 : index
    %193 = vector.load %arg11[%c0_62, %c0_63] : memref<1x128xf32, #tpu.memory_space<vmem>>, vector<1x128xf32>
    %194 = vector.broadcast %193 : vector<1x128xf32> to vector<64x128xf32>
    %195 = arith.addf %192, %194 : vector<64x128xf32>
    %196 = vector.shape_cast %195 : vector<64x128xf32> to vector<4x16x128xf32>
    %cst_64 = arith.constant 0.000000e+00 : f32
    %197 = vector.broadcast %cst_64 : f32 to vector<4x16x128xf32>
    %198 = arith.maximumf %196, %197 : vector<4x16x128xf32>
    %199 = arith.addf %188, %198 : vector<4x16x128xf32>
    %c0_65 = arith.constant 0 : index
    %c0_66 = arith.constant 0 : index
    %c0_67 = arith.constant 0 : index
    %200 = vector.load %arg12[%c0_65, %c0_66, %c0_67] : memref<4x16x128xf32, #tpu.memory_space<vmem>>, vector<4x16x128xf32>
    tpu.vector_store %arg12[%c0_65, %c0_66, %c0_67], %199 {strides = array<i32>} : memref<4x16x128xf32, #tpu.memory_space<vmem>>, vector<4x16x128xf32>,
    return
  }
  func.func @transform_0(%arg0: i32) -> (i32, i32, i32) {
    %c0_i32 = arith.constant 0 : i32
    %c0_i32_0 = arith.constant 0 : i32
    %c0_i32_1 = arith.constant 0 : i32
    return %arg0, %c0_i32, %c0_i32_0 : i32, i32, i32
  }
  func.func @transform_1(%arg0: i32) -> (i32, i32, i32) {
    %c0_i32 = arith.constant 0 : i32
    %c0_i32_0 = arith.constant 0 : i32
    %c0_i32_1 = arith.constant 0 : i32
    return %arg0, %c0_i32, %c0_i32_0 : i32, i32, i32
  }
  func.func @transform_2(%arg0: i32) -> (i32, i32, i32) {
    %c0_i32 = arith.constant 0 : i32
    %c0_i32_0 = arith.constant 0 : i32
    %c0_i32_1 = arith.constant 0 : i32
    return %arg0, %c0_i32, %c0_i32_0 : i32, i32, i32
  }
  func.func @transform_3(%arg0: i32) -> (i32, i32) {
    %c0_i32 = arith.constant 0 : i32
    %c0_i32_0 = arith.constant 0 : i32
    %c0_i32_1 = arith.constant 0 : i32
    return %c0_i32, %c0_i32_0 : i32, i32
  }
  func.func @transform_4(%arg0: i32) -> (i32, i32) {
    %c0_i32 = arith.constant 0 : i32
    %c0_i32_0 = arith.constant 0 : i32
    %c0_i32_1 = arith.constant 0 : i32
    return %c0_i32, %c0_i32_0 : i32, i32
  }
  func.func @transform_5(%arg0: i32) -> (i32, i32) {
    %c0_i32 = arith.constant 0 : i32
    %c0_i32_0 = arith.constant 0 : i32
    %c0_i32_1 = arith.constant 0 : i32
    return %c0_i32, %c0_i32_0 : i32, i32
  }
  func.func @transform_6(%arg0: i32) -> (i32, i32) {
    %c0_i32 = arith.constant 0 : i32
    %c0_i32_0 = arith.constant 0 : i32
    %c0_i32_1 = arith.constant 0 : i32
    return %c0_i32, %c0_i32_0 : i32, i32
  }
  func.func @transform_7(%arg0: i32) -> (i32, i32) {
    %c0_i32 = arith.constant 0 : i32
    %c0_i32_0 = arith.constant 0 : i32
    %c0_i32_1 = arith.constant 0 : i32
    return %c0_i32, %c0_i32_0 : i32, i32
  }
  func.func @transform_8(%arg0: i32) -> (i32, i32) {
    %c0_i32 = arith.constant 0 : i32
    %c0_i32_0 = arith.constant 0 : i32
    %c0_i32_1 = arith.constant 0 : i32
    return %c0_i32, %c0_i32_0 : i32, i32
  }
  func.func @transform_9(%arg0: i32) -> (i32, i32) {
    %c0_i32 = arith.constant 0 : i32
    %c0_i32_0 = arith.constant 0 : i32
    %c0_i32_1 = arith.constant 0 : i32
    return %c0_i32, %c0_i32_0 : i32, i32
  }
  func.func @transform_10(%arg0: i32) -> (i32, i32) {
    %c0_i32 = arith.constant 0 : i32
    %c0_i32_0 = arith.constant 0 : i32
    %c0_i32_1 = arith.constant 0 : i32
    return %c0_i32, %c0_i32_0 : i32, i32
  }
  func.func @transform_11(%arg0: i32) -> (i32, i32, i32) {
    %c0_i32 = arith.constant 0 : i32
    %c0_i32_0 = arith.constant 0 : i32
    %c0_i32_1 = arith.constant 0 : i32
    return %arg0, %c0_i32, %c0_i32_0 : i32, i32, i32
  }
}

</mosaic_0001>

<bundles_post_ra>
// kernel: tpu_custom_call.1
= control target key start
LH: loop header
LB: loop body
LE: loop exit
PB: predicated region body
PF: predicated region fallthrough
CT: control target
= control target key end

     0   :  { %16 = vsyncpa [#allocation3], 0  ;;  %s6351_s0 = inlined_call_operand.vmem [shape: s32[4,1,1], index: 0, kind: input, shape index: {}]   ;;  %s6352_s1 = inlined_call_operand.hbm [shape: f32[4,16,128], index: 1, kind: input, shape index: {}]   ;;  %s6353_s2 = inlined_call_operand.hbm [shape: f32[4,16,128], index: 2, kind: input, shape index: {}]   ;;  %s6354_s3 = inlined_call_operand.hbm [shape: bf16[128,128], index: 3, kind: input, shape index: {}]   ;;  %s6355_s4 = inlined_call_operand.vmem [shape: f32[1,128], index: 4, kind: input, shape index: {}]   ;;  %s6356_s5 = inlined_call_operand.hbm [shape: bf16[128,128], index: 5, kind: input, shape index: {}]   ;;  %s6357_s6 = inlined_call_operand.vmem [shape: f32[1,128], index: 6, kind: input, shape index: {}]   ;;  %s6358_s7 = inlined_call_operand.hbm [shape: bf16[128,128], index: 7, kind: input, shape index: {}]   ;;  %s6359_s8 = inlined_call_operand.vmem [shape: f32[1,128], index: 8, kind: input, shape index: {}]   ;;  %s6360_s9 = inlined_call_operand.hbm [shape: bf16[128,128], index: 9, kind: input, shape index: {}]   ;;  %s6361_s10 = inlined_call_operand.vmem [shape: f32[1,128], index: 10, kind: input, shape index: {}]   ;;  %s6362_s11 = inlined_call_operand.hbm [shape: f32[4,16,128], index: 11, kind: output, shape index: {}]  }
   0x1   :  { %17 = vsyncpa [#allocation6], 0 }
   0x2   :  { %18 = vsyncpa [#allocation9], 0 }
   0x3   :  { %19 = vsyncpa [#allocation12], 0 }
   0x4   :  { %20 = vsyncpa [#allocation4], 0  ;;  %s4933_s17 = smov [#allocation5]   ;;  %s4769_s21 = scalar_lea.hbm %s6353_s2, 1024 }
   0x5   :  { %s40_s18 = sshll.u32 %s4933_s17, 4  ;;  %p4770_p0 = scmp.ne.s32.totalorder %s6353_s2, %s4769_s21  ;;  %s41_s18 = int_to_ptr.vmem [resolvable:$true] %s40_s18 }
   0x6   :  { %p4773_p1 = scmp.lt.u32.totalorder %s4769_s21, %s6353_s2 }
   0x8   :  { %p4775_p2 = pnand %p4773_p1, %p4770_p0 }
   0xa   :  { %4778 = shalt.err (!%p4775_p2)
}
   0xb   :  { %s4779_s26 = scalar_lea.vmem %s41_s18, 1024  ;;  %p4784_p4 = scmp.lt.s32.totalorder %s41_s18, %s41_s18 }
   0xc   :  { %p4780_p3 = scmp.ne.s32.totalorder %s41_s18, %s4779_s26  ;;  %p4785_p5 = scmp.lt.s32.totalorder %s4779_s26, %s4779_s26 }
   0xe   :  { %p4786_p6 = por %p4785_p5, %p4784_p4 }
  0x10   :  { %p4787_p7 = pnand %p4786_p6, %p4780_p3 }
  0x12   :  { %4790 = shalt.err (!%p4787_p7)
}
  0x13   :  { %s4934_s27 = smov 128   ;;  %s4935_s28 = smov 8  }
  0x14   :  { %46 = dma.hbm_to_vmem [thread:$0]  %s6353_s2, 1024, %s41_s18, [#allocation6], %s4934_s27, %s4934_s27, %s4935_s28  }
  0x15   :  { %s4936_s12 = smov [#allocation8]   ;;  %s4937_s14 = smov [#allocation2]  }
  0x16   :  { %s66_s13 = sshll.u32 %s4936_s12, 4  ;;  %s28_s15 = sshll.u32 %s4937_s14, 4  ;;  %s67_s13 = int_to_ptr.vmem [resolvable:$true] %s66_s13  ;;  %s29_s15 = int_to_ptr.vmem [resolvable:$true] %s28_s15 }
  0x17   :  { %s4791_s19 = scalar_lea.hbm %s6356_s5, 1024 }
  0x18   :  { %p4792_p8 = scmp.ne.s32.totalorder %s6356_s5, %s4791_s19  ;;  %p4795_p9 = scmp.lt.u32.totalorder %s4791_s19, %s6356_s5 }
  0x1a   :  { %p4797_p10 = pnand %p4795_p9, %p4792_p8 }
  0x1c   :  { %4800 = shalt.err (!%p4797_p10)
}
  0x1d   :  { %s4801_s2 = scalar_lea.vmem %s67_s13, 1024  ;;  %p4806_p12 = scmp.lt.s32.totalorder %s67_s13, %s67_s13 }
  0x1e   :  { %p4802_p11 = scmp.ne.s32.totalorder %s67_s13, %s4801_s2  ;;  %p4807_p13 = scmp.lt.s32.totalorder %s4801_s2, %s4801_s2 }
  0x20   :  { %p4808_p0 = por %p4807_p13, %p4806_p12 }
  0x22   :  { %p4809_p1 = pnand %p4808_p0, %p4802_p11 }
  0x24   :  { %4812 = shalt.err (!%p4809_p1)
}
  0x25   :  { %s4938_s18 = smov 64   ;;  %s4939_s24 = smov 4  }
  0x26   :  { %72 = dma.hbm_to_vmem [thread:$0]  %s6356_s5, 1024, %s67_s13, [#allocation9], %s4938_s18, %s4938_s18, %s4939_s24  }
  0x27   :  { %s4813_s12 = scalar_lea.hbm %s6352_s1, 1024 }
  0x28   :  { %p4814_p2 = scmp.ne.s32.totalorder %s6352_s1, %s4813_s12  ;;  %p4817_p3 = scmp.lt.u32.totalorder %s4813_s12, %s6352_s1 }
  0x2a   :  { %p4819_p4 = pnand %p4817_p3, %p4814_p2 }
  0x2c   :  { %4822 = shalt.err (!%p4819_p4)
}
  0x2d   :  { %s4823_s20 = scalar_lea.vmem %s29_s15, 1024  ;;  %p4828_p6 = scmp.lt.s32.totalorder %s29_s15, %s29_s15 }
  0x2e   :  { %p4824_p5 = scmp.ne.s32.totalorder %s29_s15, %s4823_s20  ;;  %p4829_p7 = scmp.lt.s32.totalorder %s4823_s20, %s4823_s20 }
  0x30   :  { %p4830_p8 = por %p4829_p7, %p4828_p6 }
  0x32   :  { %p4831_p9 = pnand %p4830_p8, %p4824_p5 }
  0x34   :  { %4834 = shalt.err (!%p4831_p9)
}
  0x35   :  { %34 = dma.hbm_to_vmem [thread:$0]  %s6352_s1, 1024, %s29_s15, [#allocation3], %s4934_s27, %s4934_s27, %s4935_s28  }
  0x36   :  { %s4940_s21 = smov [#allocation7]   ;;  %s4941_s23 = smov [#allocation10]  }
  0x37   :  { %s52_s22 = sshll.u32 %s4940_s21, 4  ;;  %s80_s2 = sshll.u32 %s4941_s23, 4  ;;  %s53_s22 = int_to_ptr.vmem [resolvable:$true] %s52_s22  ;;  %s81_s2 = int_to_ptr.vmem [resolvable:$true] %s80_s2 }
  0x38   :  { %s4835_s29 = scalar_lea.hbm %s6354_s3, 1024 }
  0x39   :  { %p4836_p10 = scmp.ne.s32.totalorder %s6354_s3, %s4835_s29  ;;  %p4839_p11 = scmp.lt.u32.totalorder %s4835_s29, %s6354_s3 }
  0x3b   :  { %p4841_p12 = pnand %p4839_p11, %p4836_p10 }
  0x3d   :  { %4844 = shalt.err (!%p4841_p12)
}
  0x3e   :  { %s4845_s1 = scalar_lea.vmem %s53_s22, 1024  ;;  %p4850_p0 = scmp.lt.s32.totalorder %s53_s22, %s53_s22 }
  0x3f   :  { %p4846_p13 = scmp.ne.s32.totalorder %s53_s22, %s4845_s1  ;;  %p4851_p1 = scmp.lt.s32.totalorder %s4845_s1, %s4845_s1 }
  0x41   :  { %p4852_p2 = por %p4851_p1, %p4850_p0 }
  0x43   :  { %p4853_p3 = pnand %p4852_p2, %p4846_p13 }
  0x45   :  { %4856 = shalt.err (!%p4853_p3)
}
  0x46   :  { %58 = dma.hbm_to_vmem [thread:$0]  %s6354_s3, 1024, %s53_s22, [#allocation6], %s4938_s18, %s4938_s18, %s4939_s24  }
  0x47   :  { %s4857_s5 = scalar_lea.hbm %s6358_s7, 1024 }
  0x48   :  { %p4858_p4 = scmp.ne.s32.totalorder %s6358_s7, %s4857_s5  ;;  %p4861_p5 = scmp.lt.u32.totalorder %s4857_s5, %s6358_s7 }
  0x4a   :  { %p4863_p6 = pnand %p4861_p5, %p4858_p4 }
  0x4c   :  { %4866 = shalt.err (!%p4863_p6)
}
  0x4d   :  { %s4867_s26 = scalar_lea.vmem %s81_s2, 1024  ;;  %p4872_p8 = scmp.lt.s32.totalorder %s81_s2, %s81_s2 }
  0x4e   :  { %p4868_p7 = scmp.ne.s32.totalorder %s81_s2, %s4867_s26  ;;  %p4873_p9 = scmp.lt.s32.totalorder %s4867_s26, %s4867_s26 }
  0x50   :  { %p4874_p10 = por %p4873_p9, %p4872_p8 }
  0x52   :  { %p4875_p11 = pnand %p4874_p10, %p4868_p7 }
  0x54   :  { %4878 = shalt.err (!%p4875_p11)
}
  0x55   :  { %86 = dma.hbm_to_vmem [thread:$0]  %s6358_s7, 1024, %s81_s2, [#allocation9], %s4938_s18, %s4938_s18, %s4939_s24  }
  0x56   :  { %s4942_s29 = smov [#allocation11]   ;;  %s4879_s16 = scalar_lea.hbm %s6360_s9, 1024 }
  0x57   :  { %s94_s30 = sshll.u32 %s4942_s29, 4  ;;  %p4880_p12 = scmp.ne.s32.totalorder %s6360_s9, %s4879_s16  ;;  %s95_s30 = int_to_ptr.vmem [resolvable:$true] %s94_s30 }
  0x58   :  { %p4883_p13 = scmp.lt.u32.totalorder %s4879_s16, %s6360_s9 }
  0x5a   :  { %p4885_p0 = pnand %p4883_p13, %p4880_p12 }
  0x5c   :  { %4888 = shalt.err (!%p4885_p0)
}
  0x5d   :  { %s4889_s20 = scalar_lea.vmem %s95_s30, 1024  ;;  %p4894_p2 = scmp.lt.s32.totalorder %s95_s30, %s95_s30 }
  0x5e   :  { %p4890_p1 = scmp.ne.s32.totalorder %s95_s30, %s4889_s20  ;;  %p4895_p3 = scmp.lt.s32.totalorder %s4889_s20, %s4889_s20 }
  0x60   :  { %p4896_p4 = por %p4895_p3, %p4894_p2 }
  0x62   :  { %p4897_p5 = pnand %p4896_p4, %p4890_p1 }
  0x64   :  { %4900 = shalt.err (!%p4897_p5)
}
  0x65   :  { %100 = dma.hbm_to_vmem [thread:$0]  %s6360_s9, 1024, %s95_s30, [#allocation12], %s4938_s18, %s4938_s18, %s4939_s24  }
  0x66   :  { %4923 = dma.done.wait [#allocation3], 1024  }
  0x67   :  { %4924 = vsyncadd [#allocation3], 4294966272 }
  0x68   :  { %4925 = dma.done.wait [#allocation6], 2048  }
  0x69   :  { %4926 = vsyncadd [#allocation6], 4294965248 }
  0x6a   :  { %4927 = dma.done.wait [#allocation9], 2048  }
  0x6b   :  { %4928 = vsyncadd [#allocation9], 4294965248 }
  0x6c   :  { %4929 = dma.done.wait [#allocation12], 1024  }
  0x6d   :  { %4930 = vsyncadd [#allocation12], 4294966272  ;;  %v4943_v0 = vmov 0   ;;  %v4601_v1 = vld [vmem:[#allocation7] sm:$0xff]   ;;  %v4602_v2 = vld [vmem:[#allocation7 + $0x8] sm:$0xff]   ;;  %v560_v14 = vlaneseq  ;;  %v6363_v38 = vmov 0.0  }
  0x6e   :  { %4411 = vset.pattern.permute.xlu0 %v4943_v0  ;;  %4422 = vset.pattern.permute.xlu1 %v4943_v0  ;;  %v4603_v3 = vld [vmem:[#allocation7 + $0x10] sm:$0xff]   ;;  %v4608_v4 = vld [vmem:[#allocation10] sm:$0xff]   ;;  %v4604_v5 = vld [vmem:[#allocation7 + $0x18] sm:$0xff]   ;;  %vm4945_vm8 = vmmov 0  }
  0x6f   :  { %3884 = vmatprep.subr.bf16.mxu1 %v4601_v1  ;;  %3932 = vmatprep.subr.bf16.mxu0 %v4608_v4  ;;  %v4610_v6 = vld [vmem:[#allocation10 + $0x8] sm:$0xff]   ;;  %v124_v7 = vld [vmem:[#allocation2] sm:$0xff]  ;;  %v4612_v11 = vld [vmem:[#allocation10 + $0x10] sm:$0xff]   ;;  %v5101_v17 = vshrl.u32 %v560_v14, 7 }
  0x70   :  { %3885 = vmatpush3.bf16.msra.mxu1 %v4601_v1  ;;  %3933 = vmatpush3.bf16.msra.mxu0 %v4608_v4  ;;  %v125_v8 = vld [vmem:[#allocation2 + $0x8] sm:$0xff]  ;;  %v4605_v10 = vld [vmem:[#allocation7 + $0x20] sm:$0xff]   ;;  %v4614_v12 = vld [vmem:[#allocation10 + $0x18] sm:$0xff]  }
  0x71   :  { %3886 = vmatprep.subr.bf16.mxu1 %v4602_v2  ;;  %3934 = vmatprep.subr.bf16.mxu0 %v4610_v6  ;;  %v140_v9 = vpack.c.bf16 %v125_v8, %v124_v7  ;;  %v4606_v13 = vld [vmem:[#allocation7 + $0x28] sm:$0xff]   ;;  %v4616_v15 = vld [vmem:[#allocation10 + $0x20] sm:$0xff]   ;;  %v4607_v16 = vld [vmem:[#allocation7 + $0x30] sm:$0xff]   ;;  %v562_v26 = vadd.s32 8, %v5101_v17  ;;  %v5143_v7 = vsub.s32 0, %v5101_v17 }
  0x72   :  { %v4618_v18 = vld [vmem:[#allocation10 + $0x28] sm:$0xff]   ;;  %v4609_v19 = vld [vmem:[#allocation7 + $0x38] sm:$0xff]   ;;  %v126_v20 = vld [vmem:[#allocation2 + $0x10] sm:$0xff] }
  0x73   :  { %3900 = vmatprep.mubr.bf16.mxu1 %v140_v9  ;;  %v127_v21 = vld [vmem:[#allocation2 + $0x18] sm:$0xff]  ;;  %v132_v22 = vld [vmem:[#allocation5] sm:$0xff]  ;;  %v4620_v23 = vld [vmem:[#allocation10 + $0x30] sm:$0xff]  }
  0x74   :  { %3887 = vmatpush3.bf16.msra.mxu1 %v4602_v2  ;;  %3935 = vmatpush3.bf16.msra.mxu0 %v4610_v6  ;;  %v128_v24 = vld [vmem:[#allocation2 + $0x20] sm:$0xff]  ;;  %v133_v25 = vld [vmem:[#allocation5 + $0x8] sm:$0xff]  ;;  %v3591_v30 = vld [vmem:[%s6351_s0] ss:$0 sm:$0xff]  ;;  %v141_v32 = vpack.c.bf16 %v127_v21, %v126_v20  ;;  %v844_v6 = vand.u32 127, %v560_v14 }
  0x75   :  { %3888 = vmatprep.subr.bf16.mxu1 %v4603_v3  ;;  %3936 = vmatprep.subr.bf16.mxu0 %v4612_v11  ;;  %v129_v27 = vld [vmem:[#allocation2 + $0x28] sm:$0xff]  ;;  %v5104_v28 = vpack.c.bf16 %v133_v25, %v132_v22  ;;  %v4611_v29 = vld [vmem:[#allocation8] sm:$0xff]   ;;  %v3592_v31 = vld [vmem:[%s6351_s0 + $0x1] ss:$0 sm:$0xff]  ;;  %vm579_vm0 = vcmp.lt.s32.totalorder %v5101_v17, %v3591_v30  ;;  %vm580_vm1 = vcmp.lt.s32.totalorder %v562_v26, %v3591_v30 }
  0x76   :  { %v142_v33 = vpack.c.bf16 %v129_v27, %v128_v24  ;;  %v3593_v34 = vld [vmem:[%s6351_s0 + $0x2] ss:$0 sm:$0xff]  ;;  %v3594_v35 = vld [vmem:[%s6351_s0 + $0x3] ss:$0 sm:$0xff]  ;;  %v4613_v36 = vld [vmem:[#allocation8 + $0x8] sm:$0xff]   ;;  %v3595_v39 = vsel %vm579_vm0, 1.0, %v6363_v38  ;;  %vm581_vm2 = vcmp.lt.s32.totalorder %v5101_v17, %v3592_v31  ;;  %vm582_vm3 = vcmp.lt.s32.totalorder %v562_v26, %v3592_v31 }
  0x77   :  { %3948 = vmatprep.mubr.bf16.mxu0 %v5104_v28  ;;  %v4622_v37 = vld [vmem:[#allocation10 + $0x38] sm:$0xff]   ;;  %v3596_v40 = vsel %vm580_vm1, 1.0, %v6363_v38  ;;  %v134_v41 = vld [vmem:[#allocation5 + $0x10] sm:$0xff]  ;;  %vm583_vm4 = vcmp.lt.s32.totalorder %v5101_v17, %v3593_v34  ;;  %vm584_vm5 = vcmp.lt.s32.totalorder %v562_v26, %v3593_v34  ;;  %vm585_vm6 = vcmp.lt.s32.totalorder %v5101_v17, %v3594_v35  ;;  %v136_v52 = vld [vmem:[#allocation5 + $0x20] sm:$0xff] }
  0x78   :  { %3889 = vmatpush3.bf16.msra.mxu1 %v4603_v3  ;;  %3937 = vmatpush3.bf16.msra.mxu0 %v4612_v11  ;;  %v135_v42 = vld [vmem:[#allocation5 + $0x18] sm:$0xff]  ;;  %v130_v43 = vld [vmem:[#allocation2 + $0x30] sm:$0xff]  ;;  %v4412_v45 = vpack.i.bf16 %v3596_v40, %v3595_v39  ;;  %v3599_v46 = vsel %vm583_vm4, 1.0, %v6363_v38  ;;  %v3600_v47 = vsel %vm584_vm5, 1.0, %v6363_v38  ;;  %v3597_v49 = vsel %vm581_vm2, 1.0, %v6363_v38  ;;  %v137_v53 = vld [vmem:[#allocation5 + $0x28] sm:$0xff] }
  0x79   :  { %3890 = vmatprep.subr.bf16.mxu1 %v4604_v5  ;;  %3938 = vmatprep.subr.bf16.mxu0 %v4614_v12  ;;  %v131_v44 = vld [vmem:[#allocation2 + $0x38] sm:$0xff]  ;;  %v4615_v48 = vld [vmem:[#allocation8 + $0x10] sm:$0xff]   ;;  %v3598_v50 = vsel %vm582_vm3, 1.0, %v6363_v38  ;;  %v4423_v51 = vpack.i.bf16 %v3600_v47, %v3599_v46  ;;  %vm586_vm7 = vcmp.lt.s32.totalorder %v562_v26, %v3594_v35  ;;  %v3601_v54 = vsel %vm585_vm6, 1.0, %v6363_v38  ;;  %v4619_v62 = vld [vmem:[#allocation8 + $0x20] sm:$0xff]  }
  0x7a   :  { %v3602_v55 = vsel %vm586_vm7, 1.0, %v6363_v38  ;;  %v145_v56 = vpack.c.bf16 %v135_v42, %v134_v41  ;;  %4413 = vperm.xlu0 %4411, %v4412_v45   ;;  %v4417_v57 = vpack.i.bf16 %v3598_v50, %v3597_v49  ;;  %v143_v58 = vpack.c.bf16 %v131_v44, %v130_v43  ;;  %v4617_v59 = vld [vmem:[#allocation8 + $0x18] sm:$0xff]   ;;  %v138_v63 = vld [vmem:[#allocation5 + $0x30] sm:$0xff]  ;;  %v4621_v3 = vld [vmem:[#allocation8 + $0x28] sm:$0xff]  }
  0x7b   :  { %4424 = vperm.xlu1 %4422, %v4423_v51   ;;  %v146_v60 = vpack.c.bf16 %v137_v53, %v136_v52  ;;  %v4428_v61 = vpack.i.bf16 %v3602_v55, %v3601_v54  ;;  %v139_v1 = vld [vmem:[#allocation5 + $0x38] sm:$0xff]  ;;  %v4623_v4 = vld [vmem:[#allocation8 + $0x30] sm:$0xff]   ;;  %vm1036_vm9 = vcmp.lt.s32.totalorder %v844_v6, 32  ;;  %vm2284_vm10 = vcmp.ge.s32.totalorder %v844_v6, 64 }
  0x7c   :  { %3891 = vmatpush3.bf16.msra.mxu1 %v4604_v5  ;;  %3939 = vmatpush3.bf16.msra.mxu0 %v4614_v12  ;;  %v147_v2 = vpack.c.bf16 %v139_v1, %v138_v63  ;;  %v4624_v5 = vld [vmem:[#allocation8 + $0x38] sm:$0xff]   ;;  %vm2285_vm11 = vcmp.lt.s32.totalorder %v844_v6, 96  ;;  %vm1040_vm12 = vmpackc.low %vm1036_vm9, %vm1036_vm9  ;;  %vm2916_vm13 = vcmp.ge.s32.totalorder %v844_v6, 96  ;;  %vm1484_vm1 = vcmp.ge.s32.totalorder %v844_v6, 32 }
  0x7d   :  { %3892 = vmatprep.subr.bf16.mxu1 %v4605_v10  ;;  %3940 = vmatprep.subr.bf16.mxu0 %v4616_v15  ;;  %v5146_v8 = vsel %vm1040_vm12, 65537, %v4943_v0  ;;  %vm2286_vm14 = vmand %vm2284_vm10, %vm2285_vm11  ;;  %vm1485_vm2 = vcmp.lt.s32.totalorder %v844_v6, 64  ;;  %vm4946_vm10 = vmmov 1  }
  0x7e   :  { %4418 = vperm.xlu0 %4411, %v4417_v57   ;;  %v1045_v9 = vrot.slane %v5146_v8, %v5143_v7  ;;  %vm2289_vm15 = vmpackc.low %vm2286_vm14, %vm2286_vm14  ;;  %v6411_v8 = vmov 0 }
  0x7f   :  { %4429 = vperm.xlu1 %4422, %v4428_v61   ;;  %vm2921_vm0 = vmpackc.low %vm2916_vm13, %vm2916_vm13 }
  0x80   :  { %3893 = vmatpush3.bf16.msra.mxu1 %v4605_v10  ;;  %3941 = vmatpush3.bf16.msra.mxu0 %v4616_v15  ;;  %v5151_v10 = vsel %vm2289_vm15, 65537, %v4943_v0  ;;  %v5156_v12 = vsel %vm2921_vm0, 65537, %v4943_v0  ;;  %vm5163_vm3 = vmand %vm1484_vm1, %vm1485_vm2  ;;  %vm5213_vm6 = vcmp.ne.s16.totalorder %v1045_v9, 0  ;;  %vm1215_vm15 = vcmask 130048  }
  0x81   :  { %3894 = vmatprep.subr.bf16.mxu1 %v4606_v13  ;;  %3942 = vmatprep.subr.bf16.mxu0 %v4618_v18  ;;  %v2294_v11 = vrot.slane %v5151_v10, %v5143_v7  ;;  %vm1489_vm4 = vmpackc.low %vm5163_vm3, %vm5163_vm3 }
  0x82   :  { %v1490_v34 = vsel %vm1489_vm4, 65537, %v4943_v0  ;;  %vm939_vm11 = vmpackc.low %vm4946_vm10, %vm4946_vm10 }
  0x83   :  { %v1494_v44 = vrot.slane %v1490_v34, %v5143_v7  ;;  %vm5225_vm7 = vcmp.ne.s16.totalorder %v2294_v11, 0  ;;  %vm943_vm12 = vmpackc.low %vm4945_vm8, %vm4945_vm8 }
  0x84   :  { %3895 = vmatpush3.bf16.msra.mxu1 %v4606_v13  ;;  %3943 = vmatpush3.bf16.msra.mxu0 %v4618_v18  ;;  %v2926_v13 = vrot.slane %v5156_v12, %v5143_v7 }
  0x85   :  { %3896 = vmatprep.subr.bf16.mxu1 %v4607_v16  ;;  %3944 = vmatprep.subr.bf16.mxu0 %v4620_v23  ;;  %vm5204_vm5 = vcmp.ne.s16.totalorder %v1494_v44, 0 }
  0x86   :  { %vm5232_vm9 = vcmp.ne.s16.totalorder %v2926_v13, 0 }
  0x87   :  { %v6412_v8 = vsel %vm5232_vm9, 4294967295, %v6411_v8 }
  0x88   :  { %3897 = vmatpush3.bf16.msra.mxu1 %v4607_v16  ;;  %3945 = vmatpush3.bf16.msra.mxu0 %v4620_v23  ;;  %v3564_v16 = vld [vmem:[%s6355_s4] ss:$0 sm:$0xff]  ;;  %6413 = vst [vmem:[#allocation20_spill] sm:$0xff] %v6412_v8 }
  0x89   :  { %3898 = vmatprep.subr.bf16.mxu1 %v4609_v19  ;;  %3946 = vmatprep.subr.bf16.mxu0 %v4622_v37 }
  0x8c   :  { %3899 = vmatpush3.bf16.msra.mxu1 %v4609_v19  ;;  %3947 = vmatpush3.bf16.msra.mxu0 %v4622_v37  ;;  %v3582_v37 = vld [vmem:[%s6359_s8] ss:$0 sm:$0xff] }
  0x8d   :  { %3908 = vmatprep.subr.bf16.mxu1 %v4611_v29  ;;  %3976 = vmatprep.subr.bf16.mxu0 %v6363_v38 }
  0x8f   :  { %3901 = vmatmul.mubr.bf16.vlgmr.msra.gmra.mrb[0].mxu1 %v141_v32  ;;  %3949 = vmatmul.mubr.bf16.vlgmr.msra.gmra.mrb[0].mxu0 %v145_v56 }
  0x90   :  { %3909 = vmatpush3.bf16.msra.mxu1 %v4611_v29  ;;  %3904 = vmatprep.mubr.bf16.mxu1 %v142_v33 }
  0x91   :  { %3910 = vmatprep.subr.bf16.mxu1 %v4613_v36  ;;  %3952 = vmatprep.mubr.bf16.mxu0 %v146_v60 }
  0x94   :  { %3911 = vmatpush3.bf16.msra.mxu1 %v4613_v36 }
  0x95   :  { %3912 = vmatprep.subr.bf16.mxu1 %v4615_v48 }
  0x97   :  { %3905 = vmatmul.mubr.bf16.gmra.mrb[4].mxu1 %v143_v58  ;;  %3953 = vmatmul.mubr.bf16.gmra.mrb[4].mxu0 %v147_v2 }
  0x98   :  { %3913 = vmatpush3.bf16.msra.mxu1 %v4615_v48  ;;  %3924 = vmatprep.mubr.bf16.mxu1 %v5104_v28 }
  0x99   :  { %3914 = vmatprep.subr.bf16.mxu1 %v4617_v59  ;;  %3992 = vmatprep.mubr.msk.bf16.mxu0 %vm4945_vm8, %v6363_v38 }
  0x9c   :  { %3915 = vmatpush3.bf16.msra.mxu1 %v4617_v59 }
  0x9d   :  { %3916 = vmatprep.subr.bf16.mxu1 %v4619_v62 }
  0xa0   :  { %3917 = vmatpush3.bf16.msra.mxu1 %v4619_v62 }
  0xa1   :  { %3918 = vmatprep.subr.bf16.mxu1 %v4621_v3 }
  0xa4   :  { %3919 = vmatpush3.bf16.msra.mxu1 %v4621_v3 }
  0xa5   :  { %3920 = vmatprep.subr.bf16.mxu1 %v4623_v4 }
  0xa8   :  { %3921 = vmatpush3.bf16.msra.mxu1 %v4623_v4 }
  0xa9   :  { %3922 = vmatprep.subr.bf16.mxu1 %v4624_v5 }
  0xac   :  { %3923 = vmatpush3.bf16.msra.mxu1 %v4624_v5 }
  0xad   :  { %3956 = vmatprep.subr.bf16.mxu1 %v6363_v38 }
  0xaf   :  { %3925 = vmatmul.mubr.bf16.vlgmr.msra.gmra.mrb[8].mxu1 %v145_v56 }
  0xb0   :  { %3928 = vmatprep.mubr.bf16.mxu1 %v146_v60 }
  0xb7   :  { %3929 = vmatmul.mubr.bf16.gmra.mrb[12].mxu1 %v147_v2 }
  0xb8   :  { %3972 = vmatprep.mubr.msk.bf16.mxu1 %vm4945_vm8, %v6363_v38 }
  0xf9   :  { %v4414_v14 = vpop.permute.xlu0 %4413 }
  0xfa   :  { %v4425_v17 = vpop.permute.xlu1 %4424  ;;  %v5169_v20 = vunpack.i.l.bf16 %v4414_v14  ;;  %v5176_v25 = vunpack.i.h.bf16 %v4414_v14 }
  0xfb   :  { %v5186_v41 = vunpack.i.h.bf16 %v4425_v17  ;;  %v5191_v47 = vunpack.i.l.bf16 %v4425_v17 }
  0xfd   :  { %v4419_v15 = vpop.permute.xlu0 %4418 }
  0xfe   :  { %v5167_v19 = vunpack.i.l.bf16 %v4419_v15  ;;  %v5171_v23 = vunpack.i.h.bf16 %v4419_v15  ;;  %v4430_v33 = vpop.permute.xlu1 %4429 }
  0xff   :  { %v5188_v42 = vunpack.i.l.bf16 %v4430_v33  ;;  %v5195_v54 = vunpack.i.h.bf16 %v4430_v33 }
 0x162   :  { %v3902_v21 = vpop.f32.mrb[0].mxu1  ;;  %v3950_v43 = vpop.f32.mrb[0].mxu0 }
 0x163   :  { %v262_v22 = vadd.f32 %v3902_v21, %v3564_v16  ;;  %v253_v24 = vpop.f32.mrb[1].mxu1  ;;  %v534_v49 = vadd.f32 %v3950_v43, %v3582_v37  ;;  %v525_v50 = vpop.f32.mrb[1].mxu0 }
 0x164   :  { %v254_v26 = vadd.f32 %v3564_v16, %v253_v24  ;;  %v3903_v27 = vpop.f32.mrb[2].mxu1  ;;  %v526_v55 = vadd.f32 %v3582_v37, %v525_v50  ;;  %v3951_v56 = vpop.f32.mrb[2].mxu0 }
 0x165   :  { %v265_v28 = vadd.f32 %v3903_v27, %v3564_v16  ;;  %v645_v29 = vmul.f32 %v5167_v19, %v262_v22  ;;  %v256_v30 = vpop.f32.mrb[3].mxu1  ;;  %v661_v60 = vmul.f32 %v5167_v19, %v534_v49  ;;  %v537_v61 = vadd.f32 %v3951_v56, %v3582_v37  ;;  %v528_v62 = vpop.f32.mrb[3].mxu0 }
 0x166   :  { %v643_v31 = vmul.f32 %v5169_v20, %v254_v26  ;;  %v257_v32 = vadd.f32 %v3564_v16, %v256_v30  ;;  %v659_v3 = vmul.f32 %v5169_v20, %v526_v55  ;;  %v529_v4 = vadd.f32 %v3582_v37, %v528_v62 }
 0x167   :  { %v646_v35 = vmul.f32 %v5171_v23, %v265_v28  ;;  %v669_v36 = vmul.f32 0.088388346, %v645_v29  ;;  %v662_v14 = vmul.f32 %v5171_v23, %v537_v61  ;;  %v6408_v30 = vmov 0 }
 0x168   :  { %v644_v39 = vmul.f32 %v5176_v25, %v257_v32  ;;  %v667_v45 = vmul.f32 0.088388346, %v643_v31  ;;  %v660_v21 = vmul.f32 %v5176_v25, %v529_v4  ;;  %v6409_v30 = vsel %vm5225_vm7, 4294967295, %v6408_v30 }
 0x169   :  { %v670_v40 = vmul.f32 0.088388346, %v646_v35  ;;  %v5218_v26 = vpack.c.bf16 %v662_v14, %v661_v60  ;;  %6410 = vst [vmem:[#allocation19_spill] sm:$0xff] %v6409_v30 }
 0x16a   :  { %v668_v46 = vmul.f32 0.088388346, %v644_v39  ;;  %v3906_v48 = vpop.f32.mrb[4].mxu1  ;;  %v5220_v28 = vpack.c.bf16 %v660_v21, %v659_v3  ;;  %v3954_v29 = vpop.f32.mrb[4].mxu0 }
 0x16b   :  { %v5193_v51 = vpack.c.bf16 %v670_v40, %v669_v36  ;;  %v278_v52 = vadd.f32 %v3906_v48, %v3564_v16  ;;  %v269_v53 = vpop.f32.mrb[5].mxu1  ;;  %v550_v31 = vadd.f32 %v3954_v29, %v3582_v37  ;;  %v541_v32 = vpop.f32.mrb[5].mxu0 }
 0x16c   :  { %v5197_v57 = vpack.c.bf16 %v668_v46, %v667_v45  ;;  %v270_v58 = vadd.f32 %v3564_v16, %v269_v53  ;;  %v3907_v59 = vpop.f32.mrb[6].mxu1  ;;  %v542_v11 = vadd.f32 %v3582_v37, %v541_v32  ;;  %v3955_v34 = vpop.f32.mrb[6].mxu0 }
 0x16d   :  { %v281_v63 = vadd.f32 %v3907_v59, %v3564_v16  ;;  %v649_v1 = vmul.f32 %v5188_v42, %v278_v52  ;;  %v272_v2 = vpop.f32.mrb[7].mxu1  ;;  %v665_v36 = vmul.f32 %v5188_v42, %v550_v31  ;;  %v553_v39 = vadd.f32 %v3955_v34, %v3582_v37  ;;  %v544_v40 = vpop.f32.mrb[7].mxu0 }
 0x16e   :  { %v647_v5 = vmul.f32 %v5191_v47, %v270_v58  ;;  %v273_v6 = vadd.f32 %v3564_v16, %v272_v2  ;;  %v663_v44 = vmul.f32 %v5191_v47, %v542_v11  ;;  %v545_v45 = vadd.f32 %v3582_v37, %v544_v40 }
 0x16f   :  { %v650_v17 = vmul.f32 %v5195_v54, %v281_v63  ;;  %v673_v18 = vmul.f32 0.088388346, %v649_v1  ;;  %v666_v49 = vmul.f32 %v5195_v54, %v553_v39  ;;  %v3573_v1 = vld [vmem:[%s6357_s6] ss:$0 sm:$0xff] }
 0x170   :  { %v671_v24 = vmul.f32 0.088388346, %v647_v5  ;;  %v648_v16 = vmul.f32 %v5186_v41, %v273_v6  ;;  %v664_v52 = vmul.f32 %v5186_v41, %v545_v45 }
 0x171   :  { %v674_v27 = vmul.f32 0.088388346, %v650_v17  ;;  %v5268_v53 = vpack.c.bf16 %v666_v49, %v665_v36 }
 0x172   :  { %v672_v9 = vmul.f32 0.088388346, %v648_v16  ;;  %v5270_v55 = vpack.c.bf16 %v664_v52, %v663_v44 }
 0x173   :  { %v5242_v35 = vpack.c.bf16 %v674_v27, %v673_v18 }
 0x174   :  { %v5250_v13 = vpack.c.bf16 %v672_v9, %v671_v24 }
 0x175   :  { %6414 = vst [vmem:[#allocation21_spill] sm:$0xff] %v5242_v35 }
 0x176   :  { %6415 = vst [vmem:[#allocation22_spill] sm:$0xff] %v5250_v13 }
 0x182   :  { %v3926_v2 = vpop.f32.mrb[8].mxu1 }
 0x183   :  { %v398_v3 = vadd.f32 %v3926_v2, %v3573_v1  ;;  %v389_v4 = vpop.f32.mrb[9].mxu1  ;;  %v959_v2 = vsel %vm943_vm12, 65537, %v4943_v0 }
 0x184   :  { %v390_v5 = vadd.f32 %v3573_v1, %v389_v4  ;;  %v3927_v6 = vpop.f32.mrb[10].mxu1 }
 0x185   :  { %v653_v14 = vmul.f32 %v5167_v19, %v398_v3  ;;  %v401_v17 = vadd.f32 %v3927_v6, %v3573_v1  ;;  %v392_v18 = vpop.f32.mrb[11].mxu1  ;;  %v6516_v6 = vsel %vm5232_vm9, %v5218_v26, 0 }
 0x186   :  { %v651_v21 = vmul.f32 %v5169_v20, %v390_v5  ;;  %v393_v24 = vadd.f32 %v3573_v1, %v392_v18 }
 0x187   :  { %v654_v16 = vmul.f32 %v5171_v23, %v401_v17 }
 0x188   :  { %v652_v27 = vmul.f32 %v5176_v25, %v393_v24  ;;  %v4433_v29 = vpack.i.bf16 %v653_v14, %v651_v21 }
 0x18a   :  { %v4435_v9 = vpack.i.bf16 %v654_v16, %v652_v27  ;;  %4434 = vxpose.xlu0.b32.start [1/2] (short) %v4433_v29, 128  ;;  %v3930_v31 = vpop.f32.mrb[12].mxu1 }
 0x18b   :  { %v414_v32 = vadd.f32 %v3930_v31, %v3573_v1  ;;  %v405_v11 = vpop.f32.mrb[13].mxu1 }
 0x18c   :  { %v406_v34 = vadd.f32 %v3573_v1, %v405_v11  ;;  %v3931_v36 = vpop.f32.mrb[14].mxu1 }
 0x18d   :  { %v657_v39 = vmul.f32 %v5188_v42, %v414_v32  ;;  %v417_v19 = vadd.f32 %v3931_v36, %v3573_v1  ;;  %v408_v40 = vpop.f32.mrb[15].mxu1  ;;  %v955_v42 = vsel %vm939_vm11, 65537, %v4943_v0 }
 0x18e   :  { %4436 = vxpose.xlu0.b32.end [2/2] (short) %v4435_v9, 128  ;;  %v655_v20 = vmul.f32 %v5191_v47, %v406_v34  ;;  %v409_v44 = vadd.f32 %v3573_v1, %v408_v40  ;;  %v3603_v47 = vcombine.low %v955_v42, %v955_v42  ;;  %v3605_v1 = vcombine.low %v959_v2, %v959_v2 }
 0x18f   :  { %v658_v23 = vmul.f32 %v5195_v54, %v417_v19 }
 0x190   :  { %v656_v25 = vmul.f32 %v5186_v41, %v409_v44  ;;  %v4517_v45 = vpack.i.bf16 %v657_v39, %v655_v20  ;;  %vm5311_vm13 = vcmp.ne.s16.totalorder %v3603_v47, 0  ;;  %vm5315_vm14 = vcmp.ne.s16.totalorder %v3605_v1, 0 }
 0x192   :  { %v4519_v49 = vpack.i.bf16 %v658_v23, %v656_v25  ;;  %4518 = vxpose.xlu1.b32.start [1/2] (short) %v4517_v45, 128 }
 0x196   :  { %4520 = vxpose.xlu1.b32.end [2/2] (short) %v4519_v49, 128 }
 0x20a   :  { %v4437_v52 = vpop.trf.xlu0 }
 0x20b   :  { %v4441_v3 = vunpack.i.h.bf16 %v4437_v52  ;;  %v4438_v54 = vunpack.i.l.bf16 %v4437_v52 }
 0x20e   :  { %v4442_v4 = vpop.trf.xlu0 }
 0x20f   :  { %v4446_v41 = vunpack.i.h.bf16 %v4442_v4  ;;  %v4443_v5 = vunpack.i.l.bf16 %v4442_v4 }
 0x211   :  { %v811_v14 = vpack.c.bf16 %v4443_v5, %v4438_v54  ;;  %v819_v17 = vpack.c.bf16 %v4446_v41, %v4441_v3 }
 0x212   :  { %v4447_v21 = vpop.trf.xlu0  ;;  %v4521_v24 = vpop.trf.xlu1 }
 0x213   :  { %v1003_v0 = vsel %vm5311_vm13, %v811_v14, 0  ;;  %v1011_v16 = vsel %vm5311_vm13, %v819_v17, 0  ;;  %v5325_v27 = vsel %vm5315_vm14, %v811_v14, 0  ;;  %v5329_v29 = vsel %vm5315_vm14, %v819_v17, 0 }
 0x214   :  { %3957 = vmatpush3.bf16.msra.mxu1 %v1003_v0  ;;  %3977 = vmatpush3.bf16.msra.mxu0 %v1011_v16  ;;  %v4451_v9 = vunpack.i.h.bf16 %v4447_v21  ;;  %v4448_v31 = vunpack.i.l.bf16 %v4447_v21  ;;  %v4525_v11 = vunpack.i.h.bf16 %v4521_v24  ;;  %v4522_v34 = vunpack.i.l.bf16 %v4521_v24 }
 0x215   :  { %3958 = vmatprep.subr.bf16.mxu1 %v6363_v38  ;;  %3978 = vmatprep.subr.bf16.mxu0 %v6363_v38 }
 0x216   :  { %v4452_v32 = vpop.trf.xlu0  ;;  %v4526_v36 = vpop.trf.xlu1 }
 0x217   :  { %v4456_v39 = vunpack.i.h.bf16 %v4452_v32  ;;  %v4453_v19 = vunpack.i.l.bf16 %v4452_v32  ;;  %v4530_v40 = vunpack.i.h.bf16 %v4526_v36  ;;  %v4527_v20 = vunpack.i.l.bf16 %v4526_v36 }
 0x219   :  { %v812_v44 = vpack.c.bf16 %v4453_v19, %v4448_v31  ;;  %v820_v23 = vpack.c.bf16 %v4456_v39, %v4451_v9  ;;  %v5333_v49 = vpack.c.bf16 %v4527_v20, %v4522_v34  ;;  %v5335_v42 = vpack.c.bf16 %v4530_v40, %v4525_v11 }
 0x21a   :  { %v4457_v25 = vpop.trf.xlu0  ;;  %v4531_v45 = vpop.trf.xlu1 }
 0x21b   :  { %v4461_v52 = vunpack.i.h.bf16 %v4457_v25  ;;  %v1004_v2 = vsel %vm5311_vm13, %v812_v44, 0  ;;  %v1012_v47 = vsel %vm5311_vm13, %v820_v23, 0  ;;  %v4458_v1 = vunpack.i.l.bf16 %v4457_v25 }
 0x21c   :  { %3959 = vmatpush3.bf16.msra.mxu1 %v1004_v2  ;;  %3979 = vmatpush3.bf16.msra.mxu0 %v1012_v47  ;;  %v4535_v3 = vunpack.i.h.bf16 %v4531_v45  ;;  %v4532_v54 = vunpack.i.l.bf16 %v4531_v45  ;;  %v5345_v5 = vsel %vm5315_vm14, %v812_v44, 0  ;;  %v5349_v14 = vsel %vm5315_vm14, %v820_v23, 0 }
 0x21d   :  { %3960 = vmatprep.subr.bf16.mxu1 %v6363_v38  ;;  %3980 = vmatprep.subr.bf16.mxu0 %v6363_v38  ;;  %v5354_v17 = vsel %vm5315_vm14, %v5333_v49, 0  ;;  %v5359_v21 = vsel %vm5315_vm14, %v5335_v42, 0 }
 0x21e   :  { %v4462_v4 = vpop.trf.xlu0  ;;  %v4536_v41 = vpop.trf.xlu1 }
 0x21f   :  { %v4466_v24 = vunpack.i.h.bf16 %v4462_v4  ;;  %v4463_v0 = vunpack.i.l.bf16 %v4462_v4  ;;  %v4540_v16 = vunpack.i.h.bf16 %v4536_v41  ;;  %v4537_v9 = vunpack.i.l.bf16 %v4536_v41 }
 0x221   :  { %v5361_v31 = vpack.c.bf16 %v4463_v0, %v4458_v1  ;;  %v5363_v32 = vpack.c.bf16 %v4466_v24, %v4461_v52  ;;  %v5365_v36 = vpack.c.bf16 %v4537_v9, %v4532_v54  ;;  %v5367_v39 = vpack.c.bf16 %v4540_v16, %v4535_v3 }
 0x222   :  { %v4467_v11 = vpop.trf.xlu0  ;;  %v4541_v34 = vpop.trf.xlu1 }
 0x223   :  { %v4471_v19 = vunpack.i.h.bf16 %v4467_v11  ;;  %v5372_v40 = vsel %vm5315_vm14, %v5361_v31, 0  ;;  %v5377_v20 = vsel %vm5315_vm14, %v5363_v32, 0  ;;  %v4468_v44 = vunpack.i.l.bf16 %v4467_v11 }
 0x224   :  { %6420 = vst [vmem:[#allocation23_spill] sm:$0xff] %v5377_v20  ;;  %3961 = vmatpush3.bf16.msra.mxu1 %v5372_v40  ;;  %3981 = vmatpush3.bf16.msra.mxu0 %v5377_v20  ;;  %v4545_v23 = vunpack.i.h.bf16 %v4541_v34  ;;  %v4542_v25 = vunpack.i.l.bf16 %v4541_v34  ;;  %v5392_v1 = vsel %vm5315_vm14, %v5365_v36, 0  ;;  %v5397_v3 = vsel %vm5315_vm14, %v5367_v39, 0 }
 0x225   :  { %3962 = vmatprep.subr.bf16.mxu1 %v6363_v38  ;;  %3982 = vmatprep.subr.bf16.mxu0 %v6363_v38  ;;  %v6448_v18 = vsel %vm5311_vm13, %v5361_v31, 0 }
 0x226   :  { %v4472_v45 = vpop.trf.xlu0  ;;  %v4546_v52 = vpop.trf.xlu1 }
 0x227   :  { %v4476_v54 = vunpack.i.h.bf16 %v4472_v45  ;;  %v4473_v4 = vunpack.i.l.bf16 %v4472_v45  ;;  %v4550_v41 = vunpack.i.h.bf16 %v4546_v52  ;;  %v4547_v24 = vunpack.i.l.bf16 %v4546_v52 }
 0x229   :  { %v5399_v0 = vpack.c.bf16 %v4473_v4, %v4468_v44  ;;  %v5401_v16 = vpack.c.bf16 %v4476_v54, %v4471_v19  ;;  %v5403_v34 = vpack.c.bf16 %v4547_v24, %v4542_v25  ;;  %v5405_v59 = vpack.c.bf16 %v4550_v41, %v4545_v23 }
 0x22a   :  { %v4477_v9 = vpop.trf.xlu0  ;;  %v4551_v11 = vpop.trf.xlu1 }
 0x22b   :  { %v4481_v63 = vunpack.i.h.bf16 %v4477_v9  ;;  %v5410_v50 = vsel %vm5315_vm14, %v5399_v0, 0  ;;  %v5415_v45 = vsel %vm5315_vm14, %v5401_v16, 0  ;;  %v4478_v44 = vunpack.i.l.bf16 %v4477_v9  ;;  %v6464_v22 = vld [vmem:[#allocation23_spill] sm:$0xff] }
 0x22c   :  { %6421 = vst [vmem:[#allocation24_spill] sm:$0xff] %v5415_v45  ;;  %3963 = vmatpush3.bf16.msra.mxu1 %v5410_v50  ;;  %3983 = vmatpush3.bf16.msra.mxu0 %v5415_v45  ;;  %v4555_v19 = vunpack.i.h.bf16 %v4551_v11  ;;  %v4552_v25 = vunpack.i.l.bf16 %v4551_v11  ;;  %v6452_v31 = vsel %vm5311_vm13, %v5403_v34, 0 }
 0x22d   :  { %3964 = vmatprep.subr.bf16.mxu1 %v6363_v38  ;;  %3984 = vmatprep.subr.bf16.mxu0 %v6363_v38 }
 0x22e   :  { %v4482_v23 = vpop.trf.xlu0  ;;  %v4556_v52 = vpop.trf.xlu1 }
 0x22f   :  { %v4486_v9 = vunpack.i.h.bf16 %v4482_v23  ;;  %v4483_v11 = vunpack.i.l.bf16 %v4482_v23  ;;  %v4560_v48 = vunpack.i.h.bf16 %v4556_v52  ;;  %v4557_v58 = vunpack.i.l.bf16 %v4556_v52 }
 0x231   :  { %v5433_v62 = vpack.c.bf16 %v4483_v11, %v4478_v44  ;;  %v5435_v46 = vpack.c.bf16 %v4486_v9, %v4481_v63  ;;  %v5437_v61 = vpack.c.bf16 %v4557_v58, %v4552_v25  ;;  %v5439_v10 = vpack.c.bf16 %v4560_v48, %v4555_v19 }
 0x232   :  { %v4487_v43 = vpop.trf.xlu0  ;;  %v4561_v56 = vpop.trf.xlu1 }
 0x233   :  { %6422 = vst [vmem:[#allocation25_spill] sm:$0xff] %v5433_v62  ;;  %6423 = vst [vmem:[#allocation26_spill] sm:$0xff] %v5435_v46  ;;  %v4491_v12 = vunpack.i.h.bf16 %v4487_v43  ;;  %v5444_v37 = vsel %vm5315_vm14, %v5433_v62, 0  ;;  %v5449_v23 = vsel %vm5315_vm14, %v5435_v46, 0  ;;  %v4488_v44 = vunpack.i.l.bf16 %v4487_v43 }
 0x234   :  { %6424 = vst [vmem:[#allocation27_spill] sm:$0xff] %v5444_v37  ;;  %6425 = vst [vmem:[#allocation28_spill] sm:$0xff] %v5449_v23  ;;  %3965 = vmatpush3.bf16.msra.mxu1 %v5444_v37  ;;  %3985 = vmatpush3.bf16.msra.mxu0 %v5449_v23  ;;  %v4565_v58 = vunpack.i.h.bf16 %v4561_v56  ;;  %v4562_v63 = vunpack.i.l.bf16 %v4561_v56 }
 0x235   :  { %3966 = vmatprep.subr.bf16.mxu1 %v6363_v38  ;;  %3986 = vmatprep.subr.bf16.mxu0 %v6363_v38 }
 0x236   :  { %v4492_v48 = vpop.trf.xlu0  ;;  %v4566_v19 = vpop.trf.xlu1 }
 0x237   :  { %v4496_v9 = vunpack.i.h.bf16 %v4492_v48  ;;  %v4493_v11 = vunpack.i.l.bf16 %v4492_v48  ;;  %v4570_v60 = vunpack.i.h.bf16 %v4566_v19  ;;  %v4567_v33 = vunpack.i.l.bf16 %v4566_v19 }
 0x239   :  { %v5467_v7 = vpack.c.bf16 %v4493_v11, %v4488_v44  ;;  %v5469_v24 = vpack.c.bf16 %v4496_v9, %v4491_v12  ;;  %v5471_v4 = vpack.c.bf16 %v4567_v33, %v4562_v63  ;;  %v5473_v43 = vpack.c.bf16 %v4570_v60, %v4565_v58 }
 0x23a   :  { %v4497_v25 = vpop.trf.xlu0  ;;  %v4571_v41 = vpop.trf.xlu1 }
 0x23b   :  { %6426 = vst [vmem:[#allocation29_spill] sm:$0xff] %v5467_v7  ;;  %6427 = vst [vmem:[#allocation30_spill] sm:$0xff] %v5469_v24  ;;  %v4501_v54 = vunpack.i.h.bf16 %v4497_v25  ;;  %v5478_v52 = vsel %vm5315_vm14, %v5467_v7, 0  ;;  %v5483_v48 = vsel %vm5315_vm14, %v5469_v24, 0  ;;  %v4498_v44 = vunpack.i.l.bf16 %v4497_v25 }
 0x23c   :  { %6428 = vst [vmem:[#allocation31_spill] sm:$0xff] %v5478_v52  ;;  %6429 = vst [vmem:[#allocation32_spill] sm:$0xff] %v5483_v48  ;;  %3967 = vmatpush3.bf16.msra.mxu1 %v5478_v52  ;;  %3987 = vmatpush3.bf16.msra.mxu0 %v5483_v48  ;;  %v4575_v33 = vunpack.i.h.bf16 %v4571_v41  ;;  %v4572_v12 = vunpack.i.l.bf16 %v4571_v41 }
 0x23d   :  { %3968 = vmatprep.subr.bf16.mxu1 %v6363_v38  ;;  %3988 = vmatprep.subr.bf16.mxu0 %v6363_v38 }
 0x23e   :  { %v4502_v60 = vpop.trf.xlu0  ;;  %v4576_v58 = vpop.trf.xlu1 }
 0x23f   :  { %v4506_v9 = vunpack.i.h.bf16 %v4502_v60  ;;  %v4503_v11 = vunpack.i.l.bf16 %v4502_v60  ;;  %v4580_v56 = vunpack.i.h.bf16 %v4576_v58  ;;  %v4577_v47 = vunpack.i.l.bf16 %v4576_v58 }
 0x241   :  { %v5501_v2 = vpack.c.bf16 %v4503_v11, %v4498_v44  ;;  %v5503_v38 = vpack.c.bf16 %v4506_v9, %v4501_v54  ;;  %v5505_v30 = vpack.c.bf16 %v4577_v47, %v4572_v12  ;;  %v5507_v19 = vpack.c.bf16 %v4580_v56, %v4575_v33 }
 0x242   :  { %v4507_v63 = vpop.trf.xlu0  ;;  %v4581_v8 = vpop.trf.xlu1  ;;  %v6433_v33 = vmov 0.0  }
 0x243   :  { %6430 = vst [vmem:[#allocation33_spill] sm:$0xff] %v5501_v2  ;;  %6431 = vst [vmem:[#allocation34_spill] sm:$0xff] %v5503_v38  ;;  %v4511_v24 = vunpack.i.h.bf16 %v4507_v63  ;;  %v5512_v25 = vsel %vm5315_vm14, %v5501_v2, 0  ;;  %v5517_v60 = vsel %vm5315_vm14, %v5503_v38, 0  ;;  %v4508_v44 = vunpack.i.l.bf16 %v4507_v63 }
 0x244   :  { %6432 = vst [vmem:[#allocation35_spill] sm:$0xff] %v5507_v19  ;;  %3969 = vmatpush3.bf16.msra.mxu1 %v5512_v25  ;;  %3989 = vmatpush3.bf16.msra.mxu0 %v5517_v60  ;;  %v4585_v47 = vunpack.i.h.bf16 %v4581_v8  ;;  %v4582_v54 = vunpack.i.l.bf16 %v4581_v8 }
 0x245   :  { %3970 = vmatprep.subr.bf16.mxu1 %v6433_v33  ;;  %3990 = vmatprep.subr.bf16.mxu0 %v6433_v33 }
 0x246   :  { %v4512_v56 = vpop.trf.xlu0  ;;  %v4586_v12 = vpop.trf.xlu1 }
 0x247   :  { %v4516_v11 = vunpack.i.h.bf16 %v4512_v56  ;;  %v4513_v41 = vunpack.i.l.bf16 %v4512_v56  ;;  %v4590_v46 = vunpack.i.h.bf16 %v4586_v12  ;;  %v4587_v7 = vunpack.i.l.bf16 %v4586_v12 }
 0x248   :  { %v1027_v12 = vsel %vm5311_vm13, %v5335_v42, 0  ;;  %v1020_v42 = vsel %vm5311_vm13, %v5365_v36, 0  ;;  %v5604_v36 = vsel %vm5315_vm14, %v5403_v34, 0 }
 0x249   :  { %v5535_v45 = vpack.c.bf16 %v4513_v41, %v4508_v44  ;;  %v5537_v62 = vpack.c.bf16 %v4516_v11, %v4511_v24  ;;  %v5539_v20 = vpack.c.bf16 %v4587_v7, %v4582_v54  ;;  %v5541_v63 = vpack.c.bf16 %v4590_v46, %v4585_v47 }
 0x24a   :  { %v4591_v58 = vpop.trf.xlu1  ;;  %v1019_v54 = vsel %vm5311_vm13, %v5333_v49, 0  ;;  %v6449_v7 = vsel %vm5311_vm13, %v5363_v32, 0  ;;  %v6453_v32 = vsel %vm5311_vm13, %v5405_v59, 0 }
 0x24b   :  { %6434 = vst [vmem:[#allocation36_spill] sm:$0xff] %v5535_v45  ;;  %6435 = vst [vmem:[#allocation37_spill] sm:$0xff] %v5537_v62  ;;  %v5546_v9 = vsel %vm5315_vm14, %v5535_v45, 0  ;;  %v5551_v56 = vsel %vm5315_vm14, %v5537_v62, 0  ;;  %v4595_v24 = vunpack.i.h.bf16 %v4591_v58  ;;  %v4592_v41 = vunpack.i.l.bf16 %v4591_v58 }
 0x24c   :  { %6436 = vst [vmem:[#allocation38_spill] sm:$0xff] %v5539_v20  ;;  %6437 = vst [vmem:[#allocation39_spill] sm:$0xff] %v5541_v63  ;;  %3971 = vmatpush3.bf16.msra.mxu1 %v5546_v9  ;;  %3991 = vmatpush3.bf16.msra.mxu0 %v5551_v56 }
 0x24d   :  { %3996 = vmatprep.subr.bf16.mxu1 %v6433_v33  ;;  %4016 = vmatprep.subr.bf16.mxu0 %v6433_v33 }
 0x24e   :  { %v4596_v58 = vpop.trf.xlu1 }
 0x24f   :  { %3973 = vmatmul.mubr.bf16.vlgmr.msra.gmra.mrb[16].mxu1 %v5197_v57  ;;  %3993 = vmatmul.mubr.bf16.vlgmr.msra.gmra.mrb[8].mxu0 %v5193_v51  ;;  %v4600_v11 = vunpack.i.h.bf16 %v4596_v58  ;;  %v4597_v46 = vunpack.i.l.bf16 %v4596_v58  ;;  %v5632_v58 = vsel %vm5315_vm14, %v5471_v4, 0 }
 0x250   :  { %3997 = vmatpush3.bf16.msra.mxu1 %v1019_v54  ;;  %4017 = vmatpush3.bf16.msra.mxu0 %v1027_v12  ;;  %v1028_v54 = vsel %vm5311_vm13, %v5367_v39, 0  ;;  %v5609_v39 = vsel %vm5315_vm14, %v5405_v59, 0  ;;  %v5623_v12 = vsel %vm5315_vm14, %v5439_v10, 0  ;;  %6440 = vst [vmem:[#allocation42_spill] sm:$0xff] %v5632_v58  ;;  %v6457_v59 = vsel %vm5204_vm5, %v5218_v26, 0 }
 0x251   :  { %3998 = vmatprep.subr.bf16.mxu1 %v6433_v33  ;;  %4018 = vmatprep.subr.bf16.mxu0 %v6433_v33  ;;  %v5579_v47 = vpack.c.bf16 %v4597_v46, %v4592_v41  ;;  %v5581_v49 = vpack.c.bf16 %v4600_v11, %v4595_v24  ;;  %v5618_v46 = vsel %vm5315_vm14, %v5437_v61, 0  ;;  %v5637_v11 = vsel %vm5315_vm14, %v5473_v43, 0 }
 0x252   :  { %4012 = vmatprep.mubr.msk.bf16.mxu1 %vm4945_vm8, %v6433_v33  ;;  %4032 = vmatprep.mubr.msk.bf16.mxu0 %vm4945_vm8, %v6433_v33  ;;  %6441 = vst [vmem:[#allocation43_spill] sm:$0xff] %v5637_v11  ;;  %v5660_v24 = vsel %vm5315_vm14, %v5539_v20, 0  ;;  %v5665_v41 = vsel %vm5315_vm14, %v5541_v63, 0  ;;  %v6451_v63 = vsel %vm5311_vm13, %v5401_v16, 0  ;;  %v6455_v16 = vsel %vm5311_vm13, %v5439_v10, 0 }
 0x253   :  { %6438 = vst [vmem:[#allocation40_spill] sm:$0xff] %v5579_v47  ;;  %6439 = vst [vmem:[#allocation41_spill] sm:$0xff] %v5581_v49  ;;  %v5674_v44 = vsel %vm5315_vm14, %v5579_v47, 0  ;;  %v5679_v8 = vsel %vm5315_vm14, %v5581_v49, 0  ;;  %v6450_v49 = vsel %vm5311_vm13, %v5399_v0, 0  ;;  %v6454_v0 = vsel %vm5311_vm13, %v5437_v61, 0 }
 0x254   :  { %3999 = vmatpush3.bf16.msra.mxu1 %v1020_v42  ;;  %4019 = vmatpush3.bf16.msra.mxu0 %v1028_v54  ;;  %v5646_v42 = vsel %vm5315_vm14, %v5505_v30, 0  ;;  %v5651_v54 = vsel %vm5315_vm14, %v5507_v19, 0  ;;  %6444 = vst [vmem:[#allocation46_spill] sm:$0xff] %v5660_v24  ;;  %6445 = vst [vmem:[#allocation47_spill] sm:$0xff] %v5665_v41  ;;  %v6456_v10 = vsel %vm5204_vm5, %v5220_v28, 0 }
 0x255   :  { %4000 = vmatprep.subr.bf16.mxu1 %v6433_v33  ;;  %4020 = vmatprep.subr.bf16.mxu0 %v6433_v33  ;;  %6442 = vst [vmem:[#allocation44_spill] sm:$0xff] %v5646_v42  ;;  %6443 = vst [vmem:[#allocation45_spill] sm:$0xff] %v5651_v54 }
 0x256   :  { %6446 = vst [vmem:[#allocation48_spill] sm:$0xff] %v5674_v44  ;;  %6447 = vst [vmem:[#allocation49_spill] sm:$0xff] %v5679_v8 }
 0x258   :  { %4001 = vmatpush3.bf16.msra.mxu1 %v5604_v36  ;;  %4021 = vmatpush3.bf16.msra.mxu0 %v5609_v39 }
 0x259   :  { %4002 = vmatprep.subr.bf16.mxu1 %v6433_v33  ;;  %4022 = vmatprep.subr.bf16.mxu0 %v6433_v33 }
 0x25c   :  { %4003 = vmatpush3.bf16.msra.mxu1 %v5618_v46  ;;  %4023 = vmatpush3.bf16.msra.mxu0 %v5623_v12 }
 0x25d   :  { %4004 = vmatprep.subr.bf16.mxu1 %v6433_v33  ;;  %4024 = vmatprep.subr.bf16.mxu0 %v6433_v33 }
 0x260   :  { %4005 = vmatpush3.bf16.msra.mxu1 %v5632_v58  ;;  %4025 = vmatpush3.bf16.msra.mxu0 %v5637_v11 }
 0x261   :  { %4006 = vmatprep.subr.bf16.mxu1 %v6433_v33  ;;  %4026 = vmatprep.subr.bf16.mxu0 %v6433_v33 }
 0x264   :  { %4007 = vmatpush3.bf16.msra.mxu1 %v5646_v42  ;;  %4027 = vmatpush3.bf16.msra.mxu0 %v5651_v54 }
 0x265   :  { %4008 = vmatprep.subr.bf16.mxu1 %v6433_v33  ;;  %4028 = vmatprep.subr.bf16.mxu0 %v6433_v33 }
 0x268   :  { %4009 = vmatpush3.bf16.msra.mxu1 %v5660_v24  ;;  %4029 = vmatpush3.bf16.msra.mxu0 %v5665_v41 }
 0x269   :  { %4010 = vmatprep.subr.bf16.mxu1 %v6433_v33  ;;  %4030 = vmatprep.subr.bf16.mxu0 %v6433_v33 }
 0x26c   :  { %4011 = vmatpush3.bf16.msra.mxu1 %v5674_v44  ;;  %4031 = vmatpush3.bf16.msra.mxu0 %v5679_v8 }
 0x26d   :  { %4036 = vmatprep.subr.bf16.mxu1 %v6433_v33  ;;  %4056 = vmatprep.subr.bf16.mxu0 %v6433_v33 }
 0x26f   :  { %4013 = vmatmul.mubr.bf16.vlgmr.msra.gmra.mrb[20].mxu1 %v5250_v13  ;;  %4033 = vmatmul.mubr.bf16.vlgmr.msra.gmra.mrb[12].mxu0 %v5242_v35 }
 0x270   :  { %4037 = vmatpush3.bf16.msra.mxu1 %v5325_v27  ;;  %4057 = vmatpush3.bf16.msra.mxu0 %v5329_v29 }
 0x271   :  { %4038 = vmatprep.subr.bf16.mxu1 %v6433_v33  ;;  %4058 = vmatprep.subr.bf16.mxu0 %v6433_v33 }
 0x272   :  { %4052 = vmatprep.mubr.msk.bf16.mxu1 %vm4945_vm8, %v6433_v33  ;;  %4072 = vmatprep.mubr.msk.bf16.mxu0 %vm4945_vm8, %v6433_v33 }
 0x274   :  { %4039 = vmatpush3.bf16.msra.mxu1 %v5345_v5  ;;  %4059 = vmatpush3.bf16.msra.mxu0 %v5349_v14 }
 0x275   :  { %4040 = vmatprep.subr.bf16.mxu1 %v6433_v33  ;;  %4060 = vmatprep.subr.bf16.mxu0 %v6433_v33 }
 0x278   :  { %4041 = vmatpush3.bf16.msra.mxu1 %v6448_v18  ;;  %4061 = vmatpush3.bf16.msra.mxu0 %v6449_v7 }
 0x279   :  { %4042 = vmatprep.subr.bf16.mxu1 %v6433_v33  ;;  %4062 = vmatprep.subr.bf16.mxu0 %v6433_v33 }
 0x27c   :  { %4043 = vmatpush3.bf16.msra.mxu1 %v6450_v49  ;;  %4063 = vmatpush3.bf16.msra.mxu0 %v6451_v63 }
 0x27d   :  { %4044 = vmatprep.subr.bf16.mxu1 %v6433_v33  ;;  %4064 = vmatprep.subr.bf16.mxu0 %v6433_v33 }
 0x280   :  { %4045 = vmatpush3.bf16.msra.mxu1 %v5444_v37  ;;  %4065 = vmatpush3.bf16.msra.mxu0 %v5449_v23 }
 0x281   :  { %4046 = vmatprep.subr.bf16.mxu1 %v6433_v33  ;;  %4066 = vmatprep.subr.bf16.mxu0 %v6433_v33 }
 0x284   :  { %4047 = vmatpush3.bf16.msra.mxu1 %v5478_v52  ;;  %4067 = vmatpush3.bf16.msra.mxu0 %v5483_v48 }
 0x285   :  { %4048 = vmatprep.subr.bf16.mxu1 %v6433_v33  ;;  %4068 = vmatprep.subr.bf16.mxu0 %v6433_v33 }
 0x288   :  { %4049 = vmatpush3.bf16.msra.mxu1 %v5512_v25  ;;  %4069 = vmatpush3.bf16.msra.mxu0 %v5517_v60 }
 0x289   :  { %4050 = vmatprep.subr.bf16.mxu1 %v6433_v33  ;;  %4070 = vmatprep.subr.bf16.mxu0 %v6433_v33 }
 0x28c   :  { %4051 = vmatpush3.bf16.msra.mxu1 %v5546_v9  ;;  %4071 = vmatpush3.bf16.msra.mxu0 %v5551_v56 }
 0x28d   :  { %4076 = vmatprep.subr.bf16.mxu1 %v6433_v33  ;;  %4096 = vmatprep.subr.bf16.mxu0 %v6433_v33 }
 0x28f   :  { %4053 = vmatmul.mubr.bf16.vlgmr.msra.gmra.mrb[24].mxu1 %v5197_v57  ;;  %4073 = vmatmul.mubr.bf16.vlgmr.msra.gmra.mrb[16].mxu0 %v5193_v51 }
 0x290   :  { %4077 = vmatpush3.bf16.msra.mxu1 %v5354_v17  ;;  %4097 = vmatpush3.bf16.msra.mxu0 %v5359_v21 }
 0x291   :  { %4078 = vmatprep.subr.bf16.mxu1 %v6433_v33  ;;  %4098 = vmatprep.subr.bf16.mxu0 %v6433_v33 }
 0x292   :  { %4092 = vmatprep.mubr.msk.bf16.mxu1 %vm4945_vm8, %v6433_v33  ;;  %4112 = vmatprep.mubr.msk.bf16.mxu0 %vm4945_vm8, %v6433_v33 }
 0x294   :  { %4079 = vmatpush3.bf16.msra.mxu1 %v5392_v1  ;;  %4099 = vmatpush3.bf16.msra.mxu0 %v5397_v3 }
 0x295   :  { %4080 = vmatprep.subr.bf16.mxu1 %v6433_v33  ;;  %4100 = vmatprep.subr.bf16.mxu0 %v6433_v33 }
 0x298   :  { %4081 = vmatpush3.bf16.msra.mxu1 %v6452_v31  ;;  %4101 = vmatpush3.bf16.msra.mxu0 %v6453_v32 }
 0x299   :  { %4082 = vmatprep.subr.bf16.mxu1 %v6433_v33  ;;  %4102 = vmatprep.subr.bf16.mxu0 %v6433_v33 }
 0x29c   :  { %4083 = vmatpush3.bf16.msra.mxu1 %v6454_v0  ;;  %4103 = vmatpush3.bf16.msra.mxu0 %v6455_v16 }
 0x29d   :  { %4084 = vmatprep.subr.bf16.mxu1 %v6433_v33  ;;  %4104 = vmatprep.subr.bf16.mxu0 %v6433_v33 }
 0x2a0   :  { %4085 = vmatpush3.bf16.msra.mxu1 %v5632_v58  ;;  %4105 = vmatpush3.bf16.msra.mxu0 %v5637_v11 }
 0x2a1   :  { %4086 = vmatprep.subr.bf16.mxu1 %v6433_v33  ;;  %4106 = vmatprep.subr.bf16.mxu0 %v6433_v33 }
 0x2a4   :  { %4087 = vmatpush3.bf16.msra.mxu1 %v5646_v42  ;;  %4107 = vmatpush3.bf16.msra.mxu0 %v5651_v54 }
 0x2a5   :  { %4088 = vmatprep.subr.bf16.mxu1 %v6433_v33  ;;  %4108 = vmatprep.subr.bf16.mxu0 %v6433_v33 }
 0x2a8   :  { %4089 = vmatpush3.bf16.msra.mxu1 %v5660_v24  ;;  %4109 = vmatpush3.bf16.msra.mxu0 %v5665_v41 }
 0x2a9   :  { %4090 = vmatprep.subr.bf16.mxu1 %v6433_v33  ;;  %4110 = vmatprep.subr.bf16.mxu0 %v6433_v33 }
 0x2ac   :  { %4091 = vmatpush3.bf16.msra.mxu1 %v5674_v44  ;;  %4111 = vmatpush3.bf16.msra.mxu0 %v5679_v8 }
 0x2ad   :  { %4116 = vmatprep.subr.bf16.mxu0 %v6433_v33  ;;  %4122 = vmatprep.subr.bf16.mxu1 %v6433_v33 }
 0x2af   :  { %4093 = vmatmul.mubr.bf16.vlgmr.msra.gmra.mrb[28].mxu1 %v5250_v13  ;;  %4113 = vmatmul.mubr.bf16.vlgmr.msra.gmra.mrb[20].mxu0 %v5242_v35 }
 0x2b0   :  { %4117 = vmatpush3.bf16.msra.mxu0 %v6456_v10  ;;  %4123 = vmatpush3.bf16.msra.mxu1 %v6457_v59 }
 0x2b1   :  { %4124 = vmatprep.mubr.msk.bf16.mxu1 %vm4945_vm8, %v6433_v33  ;;  %4128 = vmatprep.subr.bf16.mxu1 %v6433_v33 }
 0x2b2   :  { %4118 = vmatprep.mubr.msk.bf16.mxu0 %vm4945_vm8, %v6433_v33  ;;  %4140 = vmatprep.subr.bf16.mxu0 %v6433_v33 }
 0x322   :  { %v5801_v61 = vpop.f32.mrb[16].mxu1  ;;  %v5803_v34 = vpop.f32.mrb[8].mxu0 }
 0x323   :  { %v3974_v63 = vpop.f32.mrb[17].mxu1  ;;  %v3994_v7 = vpop.f32.mrb[9].mxu0 }
 0x324   :  { %v5805_v49 = vpop.f32.mrb[18].mxu1  ;;  %v5807_v18 = vpop.f32.mrb[10].mxu0 }
 0x325   :  { %v3975_v31 = vpop.f32.mrb[19].mxu1  ;;  %v3995_v32 = vpop.f32.mrb[11].mxu0 }
 0x342   :  { %v5809_v0 = vpop.f32.mrb[20].mxu1  ;;  %v5811_v16 = vpop.f32.mrb[12].mxu0 }
 0x343   :  { %v4014_v10 = vpop.f32.mrb[21].mxu1  ;;  %v4034_v59 = vpop.f32.mrb[13].mxu0 }
 0x344   :  { %v5813_v47 = vpop.f32.mrb[22].mxu1  ;;  %v5815_v54 = vpop.f32.mrb[14].mxu0 }
 0x345   :  { %v4015_v20 = vpop.f32.mrb[23].mxu1  ;;  %v4035_v11 = vpop.f32.mrb[15].mxu0 }
 0x362   :  { %v5817_v63 = vpop.f32.mrb[24].mxu1  ;;  %v1575_v7 = vpop.f32.mrb[16].mxu0 }
 0x363   :  { %v4054_v42 = vpop.f32.mrb[25].mxu1  ;;  %v4074_v58 = vpop.f32.mrb[17].mxu0  ;;  %v1670_v31 = vsel %vm1215_vm15, %v1575_v7, -inf  ;;  %v1664_v20 = vsel %vm1215_vm15, %v5817_v63, -inf }
 0x364   :  { %1671 = vmax.xlane.f32.xlu0 %v1670_v31  ;;  %v5820_v32 = vpop.f32.mrb[26].mxu1  ;;  %v1578_v62 = vpop.f32.mrb[18].mxu0 }
 0x365   :  { %v4055_v10 = vpop.f32.mrb[27].mxu1  ;;  %v4075_v59 = vpop.f32.mrb[19].mxu0  ;;  %v1673_v38 = vsel %vm1215_vm15, %v1578_v62, -inf }
 0x366   :  { %1674 = vmax.xlane.f32.xlu1 %v1673_v38  ;;  %v1216_v38 = vsel %vm1215_vm15, %v5801_v61, -inf }
 0x36a   :  { %1665 = vmax.xlane.f32.xlu1 %v1664_v20 }
 0x382   :  { %v1616_v11 = vpop.f32.mrb[28].mxu1  ;;  %v1657_v45 = vpop.f32.mrb[20].mxu0 }
 0x383   :  { %v4094_v48 = vpop.f32.mrb[29].mxu1  ;;  %v4114_v42 = vpop.f32.mrb[21].mxu0  ;;  %v1682_v58 = vsel %vm1215_vm15, %v1657_v45, -inf  ;;  %v1676_v31 = vsel %vm1215_vm15, %v1616_v11, -inf }
 0x384   :  { %v5827_v2 = vpop.f32.mrb[22].mxu0  ;;  %1683 = vmax.xlane.f32.xlu1 %v1682_v58  ;;  %1677 = vmax.xlane.f32.xlu0 %v1676_v31  ;;  %v1619_v10 = vpop.f32.mrb[30].mxu1  ;;  %v1222_v48 = vsel %vm1215_vm15, %v5803_v34, -inf  ;;  %v1667_v42 = vsel %vm1215_vm15, %v5820_v32, -inf  ;;  %v1228_v58 = vsel %vm1215_vm15, %v5809_v0, -inf  ;;  %v1234_v31 = vsel %vm1215_vm15, %v5811_v16, -inf }
 0x385   :  { %v4095_v59 = vpop.f32.mrb[31].mxu1  ;;  %v4115_v23 = vpop.f32.mrb[23].mxu0  ;;  %v1679_v20 = vsel %vm1215_vm15, %v1619_v10, -inf }
 0x386   :  { %v1685_v23 = vsel %vm1215_vm15, %v5827_v2, -inf  ;;  %v1219_v59 = vsel %vm1215_vm15, %v5805_v49, -inf }
 0x388   :  { %1217 = vmax.xlane.f32.xlu1 %v1216_v38  ;;  %1680 = vmax.xlane.f32.xlu0 %v1679_v20  ;;  %v1225_v38 = vsel %vm1215_vm15, %v5807_v18, -inf  ;;  %v1231_v20 = vsel %vm1215_vm15, %v5813_v47, -inf }
 0x38c   :  { %1223 = vmax.xlane.f32.xlu1 %v1222_v48  ;;  %1668 = vmax.xlane.f32.xlu0 %v1667_v42  ;;  %v1237_v48 = vsel %vm1215_vm15, %v5815_v54, -inf }
 0x390   :  { %1229 = vmax.xlane.f32.xlu1 %v1228_v58  ;;  %1686 = vmax.xlane.f32.xlu0 %v1685_v23 }
 0x394   :  { %1235 = vmax.xlane.f32.xlu1 %v1234_v31  ;;  %1220 = vmax.xlane.f32.xlu0 %v1219_v59 }
 0x398   :  { %1226 = vmax.xlane.f32.xlu0 %v1225_v38 }
 0x39c   :  { %1232 = vmax.xlane.f32.xlu0 %v1231_v20 }
 0x3a0   :  { %1238 = vmax.xlane.f32.xlu0 %v1237_v48 }
 0x3f1   :  { %v1672_v42 = vpop.xlane.xlu0 %1671 }
 0x3f2   :  { %v1690_v58 = vsub.f32 %v1575_v7, %v1672_v42 }
 0x3f3   :  { %v1675_v23 = vpop.xlane.xlu1 %1674 }
 0x3f4   :  { %v1700_v52 = vmul.f32 1.442695, %v1690_v58  ;;  %v1691_v37 = vsub.f32 %v1578_v62, %v1675_v23 }
 0x3f6   :  { %4633 = vpow2.f32 %v1700_v52  ;;  %v1702_v31 = vmul.f32 1.442695, %v1691_v37 }
 0x3f7   :  { %v1666_v48 = vpop.xlane.xlu1 %1665 }
 0x3f8   :  { %4635 = vpow2.f32 %v1702_v31  ;;  %v1688_v7 = vsub.f32 %v5817_v63, %v1666_v48 }
 0x3fa   :  { %v1696_v58 = vmul.f32 1.442695, %v1688_v7 }
 0x400   :  { %v5850_v59 = vpop.eup %4633 }
 0x401   :  { %v1718_v38 = vsel %vm1215_vm15, %v5850_v59, 0.0 }
 0x402   :  { %v5854_v35 = vpop.eup %4635  ;;  %1719 = vadd.xlane.f32.xlu1 %v1718_v38 }
 0x403   :  { %v1721_v20 = vsel %vm1215_vm15, %v5854_v35, 0.0 }
 0x404   :  { %1722 = vadd.xlane.f32.xlu0 %v1721_v20 }
 0x411   :  { %v1684_v42 = vpop.xlane.xlu1 %1683  ;;  %v1678_v62 = vpop.xlane.xlu0 %1677 }
 0x412   :  { %v1692_v52 = vsub.f32 %v1616_v11, %v1678_v62  ;;  %v1694_v23 = vsub.f32 %v1657_v45, %v1684_v42 }
 0x414   :  { %v1704_v37 = vmul.f32 1.442695, %v1692_v52  ;;  %v1708_v38 = vmul.f32 1.442695, %v1694_v23 }
 0x415   :  { %v1218_v31 = vpop.xlane.xlu1 %1217  ;;  %v1681_v8 = vpop.xlane.xlu0 %1680 }
 0x416   :  { %v1693_v13 = vsub.f32 %v1619_v10, %v1681_v8  ;;  %4637 = vpow2.f32 %v1704_v37  ;;  %v1240_v44 = vsub.f32 %v5801_v61, %v1218_v31 }
 0x417   :  { %4639 = vpow2.f32 %v1696_v58 }
 0x418   :  { %v1706_v41 = vmul.f32 1.442695, %v1693_v13  ;;  %v1248_v11 = vmul.f32 1.442695, %v1240_v44 }
 0x419   :  { %v1224_v19 = vpop.xlane.xlu1 %1223  ;;  %v1669_v20 = vpop.xlane.xlu0 %1668 }
 0x41a   :  { %v1689_v24 = vsub.f32 %v5820_v32, %v1669_v20  ;;  %4641 = vpow2.f32 %v1706_v41  ;;  %v1242_v48 = vsub.f32 %v5803_v34, %v1224_v19 }
 0x41b   :  { %4643 = vpow2.f32 %v1708_v38 }
 0x41c   :  { %v1698_v63 = vmul.f32 1.442695, %v1689_v24  ;;  %v1252_v61 = vmul.f32 1.442695, %v1242_v48 }
 0x41d   :  { %v1230_v45 = vpop.xlane.xlu1 %1229  ;;  %v1687_v7 = vpop.xlane.xlu0 %1686 }
 0x41e   :  { %v1695_v8 = vsub.f32 %v5827_v2, %v1687_v7  ;;  %4645 = vpow2.f32 %v1698_v63  ;;  %v1244_v42 = vsub.f32 %v5809_v0, %v1230_v45 }
 0x41f   :  { %4647 = vpow2.f32 %v1248_v11 }
 0x420   :  { %v1710_v13 = vmul.f32 1.442695, %v1695_v8  ;;  %v5863_v10 = vpop.eup %4637  ;;  %v1256_v34 = vmul.f32 1.442695, %v1244_v42 }
 0x421   :  { %v1221_v62 = vpop.xlane.xlu0 %1220  ;;  %v1236_v32 = vpop.xlane.xlu1 %1235  ;;  %v1724_v44 = vsel %vm1215_vm15, %v5863_v10, 0.0 }
 0x422   :  { %v1241_v41 = vsub.f32 %v5805_v49, %v1221_v62  ;;  %v5869_v19 = vpop.eup %4639  ;;  %4649 = vpow2.f32 %v1710_v13  ;;  %1725 = vadd.xlane.f32.xlu1 %v1724_v44  ;;  %v1246_v52 = vsub.f32 %v5811_v16, %v1236_v32 }
 0x423   :  { %4651 = vpow2.f32 %v1252_v61  ;;  %v1712_v49 = vsel %vm1215_vm15, %v5869_v19, 0.0 }
 0x424   :  { %v1250_v2 = vmul.f32 1.442695, %v1241_v41  ;;  %v5871_v24 = vpop.eup %4641  ;;  %v1260_v20 = vmul.f32 1.442695, %v1246_v52 }
 0x425   :  { %v1227_v37 = vpop.xlane.xlu0 %1226  ;;  %v1727_v58 = vsel %vm1215_vm15, %v5871_v24, 0.0  ;;  %v5879_v23 = vpop.eup %4643 }
 0x426   :  { %v1243_v0 = vsub.f32 %v5807_v18, %v1227_v37  ;;  %4653 = vpow2.f32 %v1250_v2  ;;  %1713 = vadd.xlane.f32.xlu1 %v1712_v49  ;;  %1728 = vadd.xlane.f32.xlu0 %v1727_v58  ;;  %v1730_v63 = vsel %vm1215_vm15, %v5879_v23, 0.0 }
 0x427   :  { %4655 = vpow2.f32 %v1256_v34 }
 0x428   :  { %v1254_v31 = vmul.f32 1.442695, %v1243_v0  ;;  %v5881_v38 = vpop.eup %4645 }
 0x429   :  { %v1233_v16 = vpop.xlane.xlu0 %1232  ;;  %v1715_v11 = vsel %vm1215_vm15, %v5881_v38, 0.0  ;;  %v5888_v48 = vpop.eup %4647 }
 0x42a   :  { %4657 = vpow2.f32 %v1254_v31  ;;  %v1245_v18 = vsub.f32 %v5813_v47, %v1233_v16  ;;  %1731 = vadd.xlane.f32.xlu1 %v1730_v63  ;;  %1716 = vadd.xlane.f32.xlu0 %v1715_v11  ;;  %v1264_v47 = vsel %vm1215_vm15, %v5888_v48, 0.0 }
 0x42b   :  { %4659 = vpow2.f32 %v1260_v20 }
 0x42c   :  { %v1258_v45 = vmul.f32 1.442695, %v1245_v18  ;;  %v5890_v7 = vpop.eup %4649 }
 0x42d   :  { %v1239_v8 = vpop.xlane.xlu0 %1238  ;;  %v1733_v61 = vsel %vm1215_vm15, %v5890_v7, 0.0  ;;  %v5897_v42 = vpop.eup %4651 }
 0x42e   :  { %4661 = vpow2.f32 %v1258_v45  ;;  %v1247_v13 = vsub.f32 %v5815_v54, %v1239_v8  ;;  %1265 = vadd.xlane.f32.xlu1 %v1264_v47  ;;  %1734 = vadd.xlane.f32.xlu0 %v1733_v61  ;;  %v1270_v41 = vsel %vm1215_vm15, %v5897_v42, 0.0  ;;  %v6458_v47 = vsel %vm5204_vm5, %v5270_v55, 0 }
 0x430   :  { %v1262_v62 = vmul.f32 1.442695, %v1247_v13  ;;  %v5899_v32 = vpop.eup %4653 }
 0x431   :  { %v1267_v54 = vsel %vm1215_vm15, %v5899_v32, 0.0  ;;  %v5905_v44 = vpop.eup %4655 }
 0x432   :  { %4663 = vpow2.f32 %v1262_v62  ;;  %1271 = vadd.xlane.f32.xlu1 %v1270_v41  ;;  %1268 = vadd.xlane.f32.xlu0 %v1267_v54  ;;  %v1276_v52 = vsel %vm1215_vm15, %v5905_v44, 0.0 }
 0x434   :  { %v5907_v2 = vpop.eup %4657 }
 0x435   :  { %v1273_v34 = vsel %vm1215_vm15, %v5907_v2, 0.0  ;;  %v5913_v37 = vpop.eup %4659 }
 0x436   :  { %1277 = vadd.xlane.f32.xlu1 %v1276_v52  ;;  %1274 = vadd.xlane.f32.xlu0 %v1273_v34  ;;  %v1282_v58 = vsel %vm1215_vm15, %v5913_v37, 0.0 }
 0x438   :  { %v5915_v0 = vpop.eup %4661 }
 0x439   :  { %v1279_v49 = vsel %vm1215_vm15, %v5915_v0, 0.0 }
 0x43a   :  { %1283 = vadd.xlane.f32.xlu1 %v1282_v58  ;;  %1280 = vadd.xlane.f32.xlu0 %v1279_v49 }
 0x43c   :  { %v5921_v31 = vpop.eup %4663 }
 0x43d   :  { %v1285_v20 = vsel %vm1215_vm15, %v5921_v31, 0.0 }
 0x43e   :  { %1286 = vadd.xlane.f32.xlu0 %v1285_v20 }
 0x48f   :  { %v1720_v16 = vpop.xlane.xlu1 %1719 }
 0x490   :  { %4665 = vrcp.f32 %v1720_v16 }
 0x491   :  { %v1723_v18 = vpop.xlane.xlu0 %1722 }
 0x492   :  { %4667 = vrcp.f32 %v1723_v18 }
 0x49a   :  { %v4666_v63 = vpop.eup %4665 }
 0x49b   :  { %v1746_v45 = vmul.f32 %v4666_v63, %v5850_v59 }
 0x49c   :  { %v4668_v11 = vpop.eup %4667 }
 0x49d   :  { %v1747_v8 = vmul.f32 %v4668_v11, %v5854_v35 }
 0x49f   :  { %v1753_v13 = vpack.c.bf16 %v1747_v8, %v1746_v45 }
 0x4a1   :  { %4125 = vmatmul.mubr.msk.bf16.vlgmr.msra.gmra.mrb[32].mxu1 %vm1215_vm15, %v1753_v13 }
 0x4a2   :  { %4129 = vmatpush3.bf16.msra.mxu1 %v6458_v47  ;;  %4130 = vmatprep.mubr.msk.bf16.mxu1 %vm4945_vm8, %v6433_v33 }
 0x4a3   :  { %4134 = vmatprep.subr.bf16.mxu1 %v6433_v33 }
 0x4af   :  { %v1726_v61 = vpop.xlane.xlu1 %1725 }
 0x4b0   :  { %4669 = vrcp.f32 %v1726_v61 }
 0x4b3   :  { %v1714_v62 = vpop.xlane.xlu1 %1713  ;;  %v1729_v41 = vpop.xlane.xlu0 %1728 }
 0x4b4   :  { %4671 = vrcp.f32 %v1729_v41 }
 0x4b5   :  { %4673 = vrcp.f32 %v1714_v62 }
 0x4b7   :  { %v1732_v35 = vpop.xlane.xlu1 %1731  ;;  %v1717_v59 = vpop.xlane.xlu0 %1716 }
 0x4b8   :  { %4675 = vrcp.f32 %v1717_v59 }
 0x4b9   :  { %4677 = vrcp.f32 %v1732_v35 }
 0x4ba   :  { %v4670_v52 = vpop.eup %4669 }
 0x4bb   :  { %v1266_v54 = vpop.xlane.xlu1 %1265  ;;  %v1735_v34 = vpop.xlane.xlu0 %1734  ;;  %v1748_v16 = vmul.f32 %v4670_v52, %v5863_v10  ;;  %v6459_v10 = vsel %vm5204_vm5, %v5268_v53, 0 }
 0x4bc   :  { %4679 = vrcp.f32 %v1735_v34 }
 0x4bd   :  { %4681 = vrcp.f32 %v1266_v54  ;;  %v6460_v54 = vsel %vm5213_vm6, %v5220_v28, 0 }
 0x4be   :  { %v4672_v49 = vpop.eup %4671 }
 0x4bf   :  { %v1272_v58 = vpop.xlane.xlu1 %1271  ;;  %v1269_v20 = vpop.xlane.xlu0 %1268  ;;  %v1749_v18 = vmul.f32 %v4672_v49, %v5871_v24 }
 0x4c0   :  { %v4674_v63 = vpop.eup %4673  ;;  %4683 = vrcp.f32 %v1269_v20  ;;  %v6461_v20 = vsel %vm5213_vm6, %v5218_v26, 0 }
 0x4c1   :  { %v1754_v11 = vpack.c.bf16 %v1749_v18, %v1748_v16  ;;  %4685 = vrcp.f32 %v1272_v58  ;;  %v1744_v47 = vmul.f32 %v4674_v63, %v5869_v19 }
 0x4c2   :  { %v4676_v45 = vpop.eup %4675 }
 0x4c3   :  { %v1278_v8 = vpop.xlane.xlu1 %1277  ;;  %v1275_v13 = vpop.xlane.xlu0 %1274  ;;  %v1745_v61 = vmul.f32 %v4676_v45, %v5881_v38  ;;  %4131 = vmatmul.mubr.msk.bf16.vlgmr.msra.gmra.mrb[36].mxu1 %vm1215_vm15, %v1754_v11  ;;  %v6462_v11 = vsel %vm5213_vm6, %v5270_v55, 0 }
 0x4c4   :  { %v4678_v62 = vpop.eup %4677  ;;  %4135 = vmatpush3.bf16.msra.mxu1 %v6459_v10  ;;  %4687 = vrcp.f32 %v1275_v13  ;;  %4136 = vmatprep.mubr.msk.bf16.mxu1 %vm4945_vm8, %v6433_v33 }
 0x4c5   :  { %v1752_v24 = vpack.c.bf16 %v1745_v61, %v1744_v47  ;;  %4146 = vmatprep.subr.bf16.mxu1 %v6433_v33  ;;  %4689 = vrcp.f32 %v1278_v8  ;;  %v1750_v38 = vmul.f32 %v4678_v62, %v5879_v23  ;;  %v6463_v47 = vsel %vm5213_vm6, %v5268_v53, 0 }
 0x4c6   :  { %v4680_v41 = vpop.eup %4679 }
 0x4c7   :  { %v1284_v19 = vpop.xlane.xlu1 %1283  ;;  %v1281_v35 = vpop.xlane.xlu0 %1280  ;;  %v1751_v59 = vmul.f32 %v4680_v41, %v5890_v7  ;;  %4119 = vmatmul.mubr.msk.bf16.vlgmr.msra.gmra.mrb[24].mxu0 %vm1215_vm15, %v1752_v24  ;;  %v6467_v24 = vld [vmem:[#allocation24_spill] sm:$0xff]  ;;  %v6468_v41 = vld [vmem:[#allocation29_spill] sm:$0xff] }
 0x4c8   :  { %v4682_v15 = vpop.eup %4681  ;;  %4141 = vmatpush3.bf16.msra.mxu0 %v6460_v54  ;;  %4691 = vrcp.f32 %v1281_v35  ;;  %4142 = vmatprep.mubr.msk.bf16.mxu0 %vm4945_vm8, %v6433_v33  ;;  %v6470_v35 = vld [vmem:[#allocation26_spill] sm:$0xff] }
 0x4c9   :  { %4693 = vrcp.f32 %v1284_v19  ;;  %v1755_v34 = vpack.c.bf16 %v1751_v59, %v1750_v38  ;;  %4152 = vmatprep.subr.bf16.mxu0 %v6433_v33  ;;  %v1296_v7 = vmul.f32 %v4682_v15, %v5888_v48  ;;  %v6469_v19 = vsel %vm5311_vm13, %v6468_v41, 0  ;;  %v6472_v59 = vld [vmem:[#allocation30_spill] sm:$0xff] }
 0x4ca   :  { %v4684_v52 = vpop.eup %4683  ;;  %v6471_v38 = vsel %vm5311_vm13, %v6470_v35, 0  ;;  %v6473_v15 = vsel %vm5311_vm13, %v6472_v59, 0 }
 0x4cb   :  { %v1287_v23 = vpop.xlane.xlu0 %1286  ;;  %v1297_v49 = vmul.f32 %v4684_v52, %v5899_v32  ;;  %4137 = vmatmul.mubr.msk.bf16.vlgmr.msra.gmra.mrb[40].mxu1 %vm1215_vm15, %v1755_v34  ;;  %v4686_v58 = vpop.eup %4685  ;;  %v6481_v34 = vld [vmem:[#allocation47_spill] sm:$0xff]  ;;  %v6483_v52 = vld [vmem:[#allocation49_spill] sm:$0xff] }
 0x4cc   :  { %4695 = vrcp.f32 %v1287_v23  ;;  %4147 = vmatpush3.bf16.msra.mxu1 %v6461_v20  ;;  %4148 = vmatprep.mubr.msk.bf16.mxu1 %vm4945_vm8, %v6433_v33  ;;  %v1298_v48 = vmul.f32 %v4686_v58, %v5897_v42  ;;  %v6487_v58 = vsel %vm5225_vm7, %v5218_v26, 0 }
 0x4cd   :  { %v1304_v16 = vpack.c.bf16 %v1297_v49, %v1296_v7  ;;  %4158 = vmatprep.subr.bf16.mxu1 %v6433_v33  ;;  %v6485_v7 = vsel %vm5225_vm7, %v5220_v28, 0  ;;  %v6486_v49 = vld [vmem:[#allocation21_spill] sm:$0xff] }
 0x4ce   :  { %v4688_v18 = vpop.eup %4687 }
 0x4cf   :  { %v1299_v32 = vmul.f32 %v4688_v18, %v5907_v2  ;;  %4143 = vmatmul.mubr.msk.bf16.vlgmr.msra.gmra.mrb[28].mxu0 %vm1215_vm15, %v1304_v16  ;;  %v4690_v63 = vpop.eup %4689 }
 0x4d0   :  { %4153 = vmatpush3.bf16.msra.mxu0 %v6462_v11  ;;  %4154 = vmatprep.mubr.msk.bf16.mxu0 %vm4945_vm8, %v6433_v33  ;;  %v1300_v42 = vmul.f32 %v4690_v63, %v5905_v44 }
 0x4d1   :  { %v1305_v45 = vpack.c.bf16 %v1299_v32, %v1298_v48  ;;  %4164 = vmatprep.subr.bf16.mxu0 %v6433_v33 }
 0x4d2   :  { %v4692_v8 = vpop.eup %4691 }
 0x4d3   :  { %v4694_v13 = vpop.eup %4693  ;;  %v1301_v2 = vmul.f32 %v4692_v8, %v5915_v0  ;;  %4149 = vmatmul.mubr.msk.bf16.vlgmr.msra.gmra.mrb[44].mxu1 %vm1215_vm15, %v1305_v45 }
 0x4d4   :  { %4159 = vmatpush3.bf16.msra.mxu1 %v6463_v47  ;;  %4160 = vmatprep.mubr.msk.bf16.mxu1 %vm4945_vm8, %v6433_v33  ;;  %v1302_v10 = vmul.f32 %v4694_v13, %v5913_v37  ;;  %v6465_v37 = vld [vmem:[#allocation25_spill] sm:$0xff] }
 0x4d5   :  { %v1306_v62 = vpack.c.bf16 %v1301_v2, %v1300_v42  ;;  %4184 = vmatprep.subr.bf16.mxu1 %v6433_v33 }
 0x4d6   :  { %v4696_v61 = vpop.eup %4695 }
 0x4d7   :  { %v1303_v44 = vmul.f32 %v4696_v61, %v5921_v31  ;;  %4155 = vmatmul.mubr.msk.bf16.vlgmr.msra.gmra.mrb[32].mxu0 %vm1215_vm15, %v1306_v62  ;;  %v6466_v31 = vsel %vm5311_vm13, %v6465_v37, 0 }
 0x4d8   :  { %4165 = vmatpush3.bf16.msra.mxu0 %v5325_v27  ;;  %4180 = vmatprep.mubr.msk.bf16.mxu0 %vm4945_vm8, %v6433_v33 }
 0x4d9   :  { %v1307_v0 = vpack.c.bf16 %v1303_v44, %v1302_v10  ;;  %4166 = vmatprep.subr.bf16.mxu0 %v6433_v33 }
 0x4db   :  { %4161 = vmatmul.mubr.msk.bf16.vlgmr.msra.gmra.mrb[48].mxu1 %vm1215_vm15, %v1307_v0 }
 0x4dc   :  { %4167 = vmatpush3.bf16.msra.mxu0 %v5345_v5  ;;  %4185 = vmatpush3.bf16.msra.mxu1 %v5329_v29 }
 0x4dd   :  { %4168 = vmatprep.subr.bf16.mxu0 %v6433_v33  ;;  %4186 = vmatprep.subr.bf16.mxu1 %v6433_v33 }
 0x4de   :  { %4200 = vmatprep.mubr.msk.bf16.mxu1 %vm4945_vm8, %v6433_v33 }
 0x4e0   :  { %4169 = vmatpush3.bf16.msra.mxu0 %v5372_v40  ;;  %4187 = vmatpush3.bf16.msra.mxu1 %v5349_v14 }
 0x4e1   :  { %4170 = vmatprep.subr.bf16.mxu0 %v6433_v33  ;;  %4188 = vmatprep.subr.bf16.mxu1 %v6433_v33 }
 0x4e4   :  { %4171 = vmatpush3.bf16.msra.mxu0 %v5410_v50  ;;  %4189 = vmatpush3.bf16.msra.mxu1 %v6464_v22 }
 0x4e5   :  { %4172 = vmatprep.subr.bf16.mxu0 %v6433_v33  ;;  %4190 = vmatprep.subr.bf16.mxu1 %v6433_v33 }
 0x4e8   :  { %4173 = vmatpush3.bf16.msra.mxu0 %v6466_v31  ;;  %4191 = vmatpush3.bf16.msra.mxu1 %v6467_v24 }
 0x4e9   :  { %4174 = vmatprep.subr.bf16.mxu0 %v6433_v33  ;;  %4192 = vmatprep.subr.bf16.mxu1 %v6433_v33 }
 0x4ec   :  { %4175 = vmatpush3.bf16.msra.mxu0 %v6469_v19  ;;  %4193 = vmatpush3.bf16.msra.mxu1 %v6471_v38 }
 0x4ed   :  { %4176 = vmatprep.subr.bf16.mxu0 %v6433_v33  ;;  %4194 = vmatprep.subr.bf16.mxu1 %v6433_v33 }
 0x4f0   :  { %4177 = vmatpush3.bf16.msra.mxu0 %v5512_v25  ;;  %4195 = vmatpush3.bf16.msra.mxu1 %v6473_v15  ;;  %v6474_v25 = vsel %vm5311_vm13, %v5471_v4, 0  ;;  %v6477_v4 = vld [vmem:[#allocation46_spill] sm:$0xff] }
 0x4f1   :  { %4178 = vmatprep.subr.bf16.mxu0 %v6433_v33  ;;  %4196 = vmatprep.subr.bf16.mxu1 %v6433_v33 }
 0x4f4   :  { %4179 = vmatpush3.bf16.msra.mxu0 %v5546_v9  ;;  %4197 = vmatpush3.bf16.msra.mxu1 %v5517_v60  ;;  %v6475_v60 = vsel %vm5311_vm13, %v5505_v30, 0  ;;  %v6476_v9 = vsel %vm5311_vm13, %v5473_v43, 0  ;;  %v6480_v30 = vld [vmem:[#allocation48_spill] sm:$0xff]  ;;  %v6482_v43 = vld [vmem:[#allocation22_spill] sm:$0xff] }
 0x4f5   :  { %4198 = vmatprep.subr.bf16.mxu1 %v6433_v33  ;;  %4204 = vmatprep.subr.bf16.mxu0 %v6433_v33 }
 0x4f7   :  { %4181 = vmatmul.mubr.bf16.vlgmr.msra.gmra.mrb[36].mxu0 %v5197_v57 }
 0x4f8   :  { %4199 = vmatpush3.bf16.msra.mxu1 %v5551_v56  ;;  %4205 = vmatpush3.bf16.msra.mxu0 %v5354_v17  ;;  %v6478_v56 = vld [vmem:[#allocation35_spill] sm:$0xff] }
 0x4f9   :  { %4206 = vmatprep.subr.bf16.mxu0 %v6433_v33  ;;  %4224 = vmatprep.subr.bf16.mxu1 %v6433_v33  ;;  %v6479_v54 = vsel %vm5311_vm13, %v6478_v56, 0 }
 0x4fa   :  { %4220 = vmatprep.mubr.msk.bf16.mxu0 %vm4945_vm8, %v6433_v33 }
 0x4fb   :  { %4201 = vmatmul.mubr.bf16.vlgmr.msra.gmra.mrb[52].mxu1 %v5193_v51 }
 0x4fc   :  { %4207 = vmatpush3.bf16.msra.mxu0 %v5392_v1  ;;  %4225 = vmatpush3.bf16.msra.mxu1 %v5359_v21 }
 0x4fd   :  { %4208 = vmatprep.subr.bf16.mxu0 %v6433_v33  ;;  %4226 = vmatprep.subr.bf16.mxu1 %v6433_v33 }
 0x4fe   :  { %4240 = vmatprep.mubr.msk.bf16.mxu1 %vm4945_vm8, %v6433_v33 }
 0x500   :  { %4209 = vmatpush3.bf16.msra.mxu0 %v5604_v36  ;;  %4227 = vmatpush3.bf16.msra.mxu1 %v5397_v3 }
 0x501   :  { %4210 = vmatprep.subr.bf16.mxu0 %v6433_v33  ;;  %4228 = vmatprep.subr.bf16.mxu1 %v6433_v33 }
 0x504   :  { %4211 = vmatpush3.bf16.msra.mxu0 %v5618_v46  ;;  %4229 = vmatpush3.bf16.msra.mxu1 %v5609_v39 }
 0x505   :  { %4212 = vmatprep.subr.bf16.mxu0 %v6433_v33  ;;  %4230 = vmatprep.subr.bf16.mxu1 %v6433_v33 }
 0x508   :  { %4213 = vmatpush3.bf16.msra.mxu0 %v6474_v25  ;;  %4231 = vmatpush3.bf16.msra.mxu1 %v5623_v12 }
 0x509   :  { %4214 = vmatprep.subr.bf16.mxu0 %v6433_v33  ;;  %4232 = vmatprep.subr.bf16.mxu1 %v6433_v33 }
 0x50c   :  { %4215 = vmatpush3.bf16.msra.mxu0 %v6475_v60  ;;  %4233 = vmatpush3.bf16.msra.mxu1 %v6476_v9 }
 0x50d   :  { %4216 = vmatprep.subr.bf16.mxu0 %v6433_v33  ;;  %4234 = vmatprep.subr.bf16.mxu1 %v6433_v33 }
 0x510   :  { %4217 = vmatpush3.bf16.msra.mxu0 %v6477_v4  ;;  %4235 = vmatpush3.bf16.msra.mxu1 %v6479_v54 }
 0x511   :  { %4218 = vmatprep.subr.bf16.mxu0 %v6433_v33  ;;  %4236 = vmatprep.subr.bf16.mxu1 %v6433_v33 }
 0x514   :  { %4219 = vmatpush3.bf16.msra.mxu0 %v6480_v30  ;;  %4237 = vmatpush3.bf16.msra.mxu1 %v6481_v34 }
 0x515   :  { %4238 = vmatprep.subr.bf16.mxu1 %v6433_v33  ;;  %4244 = vmatprep.subr.bf16.mxu0 %v6433_v33 }
 0x517   :  { %4221 = vmatmul.mubr.bf16.vlgmr.msra.gmra.mrb[40].mxu0 %v6482_v43 }
 0x518   :  { %4239 = vmatpush3.bf16.msra.mxu1 %v6483_v52  ;;  %4245 = vmatpush3.bf16.msra.mxu0 %v6485_v7 }
 0x519   :  { %4250 = vmatprep.subr.bf16.mxu1 %v6433_v33  ;;  %4246 = vmatprep.mubr.msk.bf16.mxu0 %vm4945_vm8, %v6433_v33 }
 0x51a   :  { %4256 = vmatprep.subr.bf16.mxu0 %v6433_v33 }
 0x51b   :  { %4241 = vmatmul.mubr.bf16.vlgmr.msra.gmra.mrb[56].mxu1 %v6486_v49 }
 0x51c   :  { %4251 = vmatpush3.bf16.msra.mxu1 %v6487_v58  ;;  %4252 = vmatprep.mubr.msk.bf16.mxu1 %vm4945_vm8, %v6433_v33 }
 0x51d   :  { %4262 = vmatprep.subr.bf16.mxu1 %v6433_v33 }
 0x574   :  { %v1837_v20 = vpop.f32.mrb[32].mxu1 }
 0x575   :  { %v4126_v16 = vpop.f32.mrb[33].mxu1 }
 0x576   :  { %v1840_v18 = vpop.f32.mrb[34].mxu1 }
 0x577   :  { %v4127_v48 = vpop.f32.mrb[35].mxu1 }
 0x596   :  { %v1881_v32 = vpop.f32.mrb[36].mxu1 }
 0x597   :  { %v4132_v63 = vpop.f32.mrb[37].mxu1 }
 0x598   :  { %v1884_v11 = vpop.f32.mrb[38].mxu1 }
 0x599   :  { %v4133_v45 = vpop.f32.mrb[39].mxu1 }
 0x59a   :  { %v1793_v8 = vpop.f32.mrb[24].mxu0 }
 0x59b   :  { %v4120_v13 = vpop.f32.mrb[25].mxu0 }
 0x59c   :  { %v1796_v42 = vpop.f32.mrb[26].mxu0 }
 0x59d   :  { %v4121_v2 = vpop.f32.mrb[27].mxu0 }
 0x59e   :  { %v1925_v47 = vpop.f32.mrb[40].mxu1 }
 0x59f   :  { %v4138_v61 = vpop.f32.mrb[41].mxu1 }
 0x5a0   :  { %v1928_v62 = vpop.f32.mrb[42].mxu1 }
 0x5a1   :  { %v4139_v10 = vpop.f32.mrb[43].mxu1 }
 0x5a2   :  { %v1969_v44 = vpop.f32.mrb[28].mxu0 }
 0x5a3   :  { %v6105_v0 = vadd.f32 %v1969_v44, %v1793_v8  ;;  %v4144_v37 = vpop.f32.mrb[29].mxu0 }
 0x5a4   :  { %v1972_v31 = vpop.f32.mrb[30].mxu0 }
 0x5a5   :  { %v6107_v41 = vadd.f32 %v1972_v31, %v1796_v42  ;;  %v4145_v19 = vpop.f32.mrb[31].mxu0 }
 0x5a6   :  { %v2013_v35 = vpop.f32.mrb[44].mxu1 }
 0x5a7   :  { %v6109_v38 = vadd.f32 %v2013_v35, %v1837_v20  ;;  %v4150_v59 = vpop.f32.mrb[45].mxu1 }
 0x5a8   :  { %v2016_v15 = vpop.f32.mrb[46].mxu1 }
 0x5a9   :  { %v6111_v25 = vadd.f32 %v2016_v15, %v1840_v18  ;;  %v4151_v60 = vpop.f32.mrb[47].mxu1 }
 0x5aa   :  { %v2057_v9 = vpop.f32.mrb[32].mxu0 }
 0x5ab   :  { %v6113_v4 = vadd.f32 %v2057_v9, %v1881_v32  ;;  %v4156_v56 = vpop.f32.mrb[33].mxu0 }
 0x5ac   :  { %v2060_v54 = vpop.f32.mrb[34].mxu0 }
 0x5ad   :  { %v6115_v30 = vadd.f32 %v2060_v54, %v1884_v11  ;;  %v4157_v34 = vpop.f32.mrb[35].mxu0 }
 0x5ae   :  { %v2101_v52 = vpop.f32.mrb[48].mxu1 }
 0x5af   :  { %v6117_v7 = vadd.f32 %v2101_v52, %v1925_v47  ;;  %v4162_v58 = vpop.f32.mrb[49].mxu1 }
 0x5b0   :  { %v2104_v16 = vpop.f32.mrb[50].mxu1 }
 0x5b1   :  { %v6119_v20 = vadd.f32 %v2104_v16, %v1928_v62  ;;  %v4163_v48 = vpop.f32.mrb[51].mxu1 }
 0x5ca   :  { %v2334_v63 = vpop.f32.mrb[36].mxu0 }
 0x5cb   :  { %v4182_v18 = vpop.f32.mrb[37].mxu0  ;;  %v2464_v45 = vsel %vm1215_vm15, %v2334_v63, -inf }
 0x5cc   :  { %2465 = vmax.xlane.f32.xlu1 %v2464_v45  ;;  %v2337_v32 = vpop.f32.mrb[38].mxu0 }
 0x5cd   :  { %v4183_v8 = vpop.f32.mrb[39].mxu0  ;;  %v2467_v13 = vsel %vm1215_vm15, %v2337_v32, -inf }
 0x5ce   :  { %2468 = vmax.xlane.f32.xlu0 %v2467_v13  ;;  %v2375_v11 = vpop.f32.mrb[52].mxu1 }
 0x5cf   :  { %v4202_v42 = vpop.f32.mrb[53].mxu1  ;;  %v2470_v2 = vsel %vm1215_vm15, %v2375_v11, -inf }
 0x5d0   :  { %2471 = vmax.xlane.f32.xlu1 %v2470_v2  ;;  %v2378_v47 = vpop.f32.mrb[54].mxu1 }
 0x5d1   :  { %v4203_v61 = vpop.f32.mrb[55].mxu1  ;;  %v2473_v62 = vsel %vm1215_vm15, %v2378_v47, -inf }
 0x5d2   :  { %2474 = vmax.xlane.f32.xlu0 %v2473_v62 }
 0x5ea   :  { %v2416_v10 = vpop.f32.mrb[40].mxu0 }
 0x5eb   :  { %v4222_v44 = vpop.f32.mrb[41].mxu0  ;;  %v2476_v37 = vsel %vm1215_vm15, %v2416_v10, -inf }
 0x5ec   :  { %v2419_v31 = vpop.f32.mrb[42].mxu0  ;;  %2477 = vmax.xlane.f32.xlu1 %v2476_v37 }
 0x5ed   :  { %v4223_v19 = vpop.f32.mrb[43].mxu0  ;;  %v2479_v35 = vsel %vm1215_vm15, %v2419_v31, -inf }
 0x5ee   :  { %2480 = vmax.xlane.f32.xlu0 %v2479_v35  ;;  %v2457_v59 = vpop.f32.mrb[56].mxu1 }
 0x5ef   :  { %v4242_v15 = vpop.f32.mrb[57].mxu1  ;;  %v2482_v60 = vsel %vm1215_vm15, %v2457_v59, -inf }
 0x5f0   :  { %2483 = vmax.xlane.f32.xlu1 %v2482_v60  ;;  %v2460_v9 = vpop.f32.mrb[58].mxu1 }
 0x5f1   :  { %v4243_v56 = vpop.f32.mrb[59].mxu1  ;;  %v2485_v54 = vsel %vm1215_vm15, %v2460_v9, -inf }
 0x5f2   :  { %2486 = vmax.xlane.f32.xlu0 %v2485_v54 }
 0x659   :  { %v2466_v34 = vpop.xlane.xlu1 %2465 }
 0x65a   :  { %v2488_v52 = vsub.f32 %v2334_v63, %v2466_v34 }
 0x65b   :  { %v2469_v58 = vpop.xlane.xlu0 %2468 }
 0x65c   :  { %v2496_v16 = vmul.f32 1.442695, %v2488_v52  ;;  %v2489_v48 = vsub.f32 %v2337_v32, %v2469_v58 }
 0x65d   :  { %v2472_v18 = vpop.xlane.xlu1 %2471 }
 0x65e   :  { %4697 = vpow2.f32 %v2496_v16  ;;  %v2498_v45 = vmul.f32 1.442695, %v2489_v48  ;;  %v2490_v8 = vsub.f32 %v2375_v11, %v2472_v18 }
 0x65f   :  { %v2475_v13 = vpop.xlane.xlu0 %2474 }
 0x660   :  { %4699 = vpow2.f32 %v2498_v45  ;;  %v2500_v42 = vmul.f32 1.442695, %v2490_v8  ;;  %v2491_v2 = vsub.f32 %v2378_v47, %v2475_v13 }
 0x662   :  { %4701 = vpow2.f32 %v2500_v42  ;;  %v2502_v61 = vmul.f32 1.442695, %v2491_v2 }
 0x664   :  { %4703 = vpow2.f32 %v2502_v61 }
 0x668   :  { %v4698_v62 = vpop.eup %4697 }
 0x669   :  { %v2512_v44 = vsel %vm1215_vm15, %v4698_v62, 0.0 }
 0x66a   :  { %v4700_v37 = vpop.eup %4699  ;;  %2513 = vadd.xlane.f32.xlu1 %v2512_v44 }
 0x66b   :  { %v2515_v63 = vsel %vm1215_vm15, %v4700_v37, 0.0 }
 0x66c   :  { %v4702_v19 = vpop.eup %4701  ;;  %2516 = vadd.xlane.f32.xlu0 %v2515_v63 }
 0x66d   :  { %v2518_v32 = vsel %vm1215_vm15, %v4702_v19, 0.0 }
 0x66e   :  { %v4704_v35 = vpop.eup %4703  ;;  %2519 = vadd.xlane.f32.xlu1 %v2518_v32 }
 0x66f   :  { %v2521_v11 = vsel %vm1215_vm15, %v4704_v35, 0.0 }
 0x670   :  { %2522 = vadd.xlane.f32.xlu0 %v2521_v11 }
 0x679   :  { %v2478_v47 = vpop.xlane.xlu1 %2477 }
 0x67a   :  { %v2492_v15 = vsub.f32 %v2416_v10, %v2478_v47 }
 0x67b   :  { %v2481_v60 = vpop.xlane.xlu0 %2480 }
 0x67c   :  { %v2504_v56 = vmul.f32 1.442695, %v2492_v15  ;;  %v2493_v54 = vsub.f32 %v2419_v31, %v2481_v60 }
 0x67d   :  { %v2484_v34 = vpop.xlane.xlu1 %2483 }
 0x67e   :  { %4705 = vpow2.f32 %v2504_v56  ;;  %v2506_v52 = vmul.f32 1.442695, %v2493_v54  ;;  %v2494_v58 = vsub.f32 %v2457_v59, %v2484_v34 }
 0x67f   :  { %v2487_v16 = vpop.xlane.xlu0 %2486 }
 0x680   :  { %4707 = vpow2.f32 %v2506_v52  ;;  %v2508_v48 = vmul.f32 1.442695, %v2494_v58  ;;  %v2495_v18 = vsub.f32 %v2460_v9, %v2487_v16  ;;  %v6488_v16 = vsel %vm5225_vm7, %v5270_v55, 0 }
 0x682   :  { %4709 = vpow2.f32 %v2508_v48  ;;  %v2510_v45 = vmul.f32 1.442695, %v2495_v18 }
 0x684   :  { %4711 = vpow2.f32 %v2510_v45 }
 0x688   :  { %v4706_v8 = vpop.eup %4705 }
 0x689   :  { %v2524_v13 = vsel %vm1215_vm15, %v4706_v8, 0.0 }
 0x68a   :  { %v4708_v42 = vpop.eup %4707  ;;  %2525 = vadd.xlane.f32.xlu1 %v2524_v13 }
 0x68b   :  { %v2527_v10 = vsel %vm1215_vm15, %v4708_v42, 0.0 }
 0x68c   :  { %v4710_v2 = vpop.eup %4709  ;;  %2528 = vadd.xlane.f32.xlu0 %v2527_v10 }
 0x68d   :  { %v2530_v31 = vsel %vm1215_vm15, %v4710_v2, 0.0 }
 0x68e   :  { %v4712_v61 = vpop.eup %4711  ;;  %2531 = vadd.xlane.f32.xlu1 %v2530_v31 }
 0x68f   :  { %v2533_v59 = vsel %vm1215_vm15, %v4712_v61, 0.0 }
 0x690   :  { %2534 = vadd.xlane.f32.xlu0 %v2533_v59 }
 0x6f7   :  { %v2514_v9 = vpop.xlane.xlu1 %2513 }
 0x6f8   :  { %4713 = vrcp.f32 %v2514_v9 }
 0x6f9   :  { %v2517_v44 = vpop.xlane.xlu0 %2516 }
 0x6fa   :  { %4715 = vrcp.f32 %v2517_v44 }
 0x6fb   :  { %v2520_v63 = vpop.xlane.xlu1 %2519 }
 0x6fc   :  { %4717 = vrcp.f32 %v2520_v63 }
 0x6fd   :  { %v2523_v32 = vpop.xlane.xlu0 %2522 }
 0x6fe   :  { %4719 = vrcp.f32 %v2523_v32 }
 0x702   :  { %v4714_v11 = vpop.eup %4713 }
 0x703   :  { %v2544_v15 = vmul.f32 %v4714_v11, %v4698_v62  ;;  %v6489_v62 = vsel %vm5225_vm7, %v5268_v53, 0  ;;  %v6512_v11 = vld [vmem:[#allocation41_spill] sm:$0xff] }
 0x704   :  { %v4716_v47 = vpop.eup %4715 }
 0x705   :  { %v2545_v60 = vmul.f32 %v4716_v47, %v4700_v37  ;;  %v6513_v47 = vsel %vm5311_vm13, %v6512_v11, 0 }
 0x706   :  { %v4718_v56 = vpop.eup %4717 }
 0x707   :  { %v2552_v54 = vpack.c.bf16 %v2545_v60, %v2544_v15  ;;  %v2546_v52 = vmul.f32 %v4718_v56, %v4702_v19  ;;  %v6515_v60 = vsel %vm5232_vm9, %v5220_v28, 0 }
 0x708   :  { %v4720_v34 = vpop.eup %4719 }
 0x709   :  { %v2547_v58 = vmul.f32 %v4720_v34, %v4704_v35  ;;  %4247 = vmatmul.mubr.msk.bf16.vlgmr.msra.gmra.mrb[44].mxu0 %vm1215_vm15, %v2552_v54 }
 0x70a   :  { %4257 = vmatpush3.bf16.msra.mxu0 %v6488_v16  ;;  %4258 = vmatprep.mubr.msk.bf16.mxu0 %vm4945_vm8, %v6433_v33 }
 0x70b   :  { %v2553_v48 = vpack.c.bf16 %v2547_v58, %v2546_v52  ;;  %4268 = vmatprep.subr.bf16.mxu0 %v6433_v33 }
 0x70d   :  { %4253 = vmatmul.mubr.msk.bf16.vlgmr.msra.gmra.mrb[60].mxu1 %vm1215_vm15, %v2553_v48 }
 0x70e   :  { %4263 = vmatpush3.bf16.msra.mxu1 %v6489_v62  ;;  %4264 = vmatprep.mubr.msk.bf16.mxu1 %vm4945_vm8, %v6433_v33 }
 0x70f   :  { %4288 = vmatprep.subr.bf16.mxu1 %v6433_v33 }
 0x717   :  { %v2526_v37 = vpop.xlane.xlu1 %2525 }
 0x718   :  { %4721 = vrcp.f32 %v2526_v37 }
 0x719   :  { %v2529_v19 = vpop.xlane.xlu0 %2528 }
 0x71a   :  { %4723 = vrcp.f32 %v2529_v19 }
 0x71b   :  { %v2532_v35 = vpop.xlane.xlu1 %2531 }
 0x71c   :  { %4725 = vrcp.f32 %v2532_v35 }
 0x71d   :  { %v2535_v18 = vpop.xlane.xlu0 %2534 }
 0x71e   :  { %4727 = vrcp.f32 %v2535_v18 }
 0x722   :  { %v4722_v45 = vpop.eup %4721 }
 0x723   :  { %v2548_v10 = vmul.f32 %v4722_v45, %v4706_v8  ;;  %v6498_v8 = vld [vmem:[#allocation34_spill] sm:$0xff] }
 0x724   :  { %v4724_v13 = vpop.eup %4723 }
 0x725   :  { %v2549_v23 = vmul.f32 %v4724_v13, %v4708_v42  ;;  %v6499_v42 = vsel %vm5311_vm13, %v6498_v8, 0 }
 0x726   :  { %v4726_v31 = vpop.eup %4725 }
 0x727   :  { %v2554_v59 = vpack.c.bf16 %v2549_v23, %v2548_v10  ;;  %v2550_v44 = vmul.f32 %v4726_v31, %v4710_v2  ;;  %v6500_v2 = vld [vmem:[#allocation37_spill] sm:$0xff] }
 0x728   :  { %v4728_v9 = vpop.eup %4727 }
 0x729   :  { %v2551_v63 = vmul.f32 %v4728_v9, %v4712_v61  ;;  %4259 = vmatmul.mubr.msk.bf16.vlgmr.msra.gmra.mrb[48].mxu0 %vm1215_vm15, %v2554_v59  ;;  %v6501_v61 = vsel %vm5311_vm13, %v6500_v2, 0 }
 0x72a   :  { %4269 = vmatpush3.bf16.msra.mxu0 %v5325_v27  ;;  %4284 = vmatprep.mubr.msk.bf16.mxu0 %vm4945_vm8, %v6433_v33  ;;  %v6490_v27 = vld [vmem:[#allocation27_spill] sm:$0xff] }
 0x72b   :  { %4270 = vmatprep.subr.bf16.mxu0 %v6433_v33  ;;  %v2555_v32 = vpack.c.bf16 %v2551_v63, %v2550_v44 }
 0x72d   :  { %4265 = vmatmul.mubr.msk.bf16.vlgmr.msra.gmra.mrb[64].mxu1 %vm1215_vm15, %v2555_v32 }
 0x72e   :  { %4271 = vmatpush3.bf16.msra.mxu0 %v5345_v5  ;;  %4289 = vmatpush3.bf16.msra.mxu1 %v5329_v29  ;;  %v6491_v29 = vld [vmem:[#allocation31_spill] sm:$0xff]  ;;  %v6492_v5 = vld [vmem:[#allocation28_spill] sm:$0xff] }
 0x72f   :  { %4272 = vmatprep.subr.bf16.mxu0 %v6433_v33  ;;  %4290 = vmatprep.subr.bf16.mxu1 %v6433_v33 }
 0x730   :  { %4304 = vmatprep.mubr.msk.bf16.mxu1 %vm4945_vm8, %v6433_v33 }
 0x732   :  { %4273 = vmatpush3.bf16.msra.mxu0 %v5372_v40  ;;  %4291 = vmatpush3.bf16.msra.mxu1 %v5349_v14  ;;  %v6495_v40 = vld [vmem:[#allocation32_spill] sm:$0xff] }
 0x733   :  { %4274 = vmatprep.subr.bf16.mxu0 %v6433_v33  ;;  %4292 = vmatprep.subr.bf16.mxu1 %v6433_v33 }
 0x736   :  { %4275 = vmatpush3.bf16.msra.mxu0 %v5410_v50  ;;  %4293 = vmatpush3.bf16.msra.mxu1 %v6464_v22  ;;  %v6493_v50 = vld [vmem:[#allocation33_spill] sm:$0xff]  ;;  %v6496_v22 = vld [vmem:[#allocation36_spill] sm:$0xff] }
 0x737   :  { %4276 = vmatprep.subr.bf16.mxu0 %v6433_v33  ;;  %4294 = vmatprep.subr.bf16.mxu1 %v6433_v33  ;;  %v6494_v14 = vsel %vm5311_vm13, %v6493_v50, 0 }
 0x73a   :  { %4277 = vmatpush3.bf16.msra.mxu0 %v6490_v27  ;;  %4295 = vmatpush3.bf16.msra.mxu1 %v6467_v24  ;;  %v6497_v24 = vsel %vm5311_vm13, %v6496_v22, 0 }
 0x73b   :  { %4278 = vmatprep.subr.bf16.mxu0 %v6433_v33  ;;  %4296 = vmatprep.subr.bf16.mxu1 %v6433_v33 }
 0x73e   :  { %4279 = vmatpush3.bf16.msra.mxu0 %v6491_v29  ;;  %4297 = vmatpush3.bf16.msra.mxu1 %v6492_v5 }
 0x73f   :  { %4280 = vmatprep.subr.bf16.mxu0 %v6433_v33  ;;  %4298 = vmatprep.subr.bf16.mxu1 %v6433_v33 }
 0x742   :  { %4281 = vmatpush3.bf16.msra.mxu0 %v6494_v14  ;;  %4299 = vmatpush3.bf16.msra.mxu1 %v6495_v40 }
 0x743   :  { %4282 = vmatprep.subr.bf16.mxu0 %v6433_v33  ;;  %4300 = vmatprep.subr.bf16.mxu1 %v6433_v33 }
 0x746   :  { %4283 = vmatpush3.bf16.msra.mxu0 %v6497_v24  ;;  %4301 = vmatpush3.bf16.msra.mxu1 %v6499_v42 }
 0x747   :  { %4302 = vmatprep.subr.bf16.mxu1 %v6433_v33  ;;  %4308 = vmatprep.subr.bf16.mxu0 %v6433_v33 }
 0x749   :  { %4285 = vmatmul.mubr.bf16.vlgmr.msra.gmra.mrb[52].mxu0 %v5197_v57  ;;  %v6503_v57 = vld [vmem:[#allocation44_spill] sm:$0xff] }
 0x74a   :  { %4303 = vmatpush3.bf16.msra.mxu1 %v6501_v61  ;;  %4309 = vmatpush3.bf16.msra.mxu0 %v5354_v17  ;;  %v6504_v17 = vld [vmem:[#allocation43_spill] sm:$0xff] }
 0x74b   :  { %4310 = vmatprep.subr.bf16.mxu0 %v6433_v33  ;;  %4328 = vmatprep.subr.bf16.mxu1 %v6433_v33 }
 0x74c   :  { %4324 = vmatprep.mubr.msk.bf16.mxu0 %vm4945_vm8, %v6433_v33 }
 0x74d   :  { %4305 = vmatmul.mubr.bf16.vlgmr.msra.gmra.mrb[68].mxu1 %v5193_v51  ;;  %v6502_v51 = vld [vmem:[#allocation42_spill] sm:$0xff] }
 0x74e   :  { %4311 = vmatpush3.bf16.msra.mxu0 %v5392_v1  ;;  %4329 = vmatpush3.bf16.msra.mxu1 %v5359_v21  ;;  %v6505_v21 = vld [vmem:[#allocation38_spill] sm:$0xff] }
 0x74f   :  { %4312 = vmatprep.subr.bf16.mxu0 %v6433_v33  ;;  %4330 = vmatprep.subr.bf16.mxu1 %v6433_v33  ;;  %v6506_v1 = vsel %vm5311_vm13, %v6505_v21, 0 }
 0x750   :  { %4344 = vmatprep.mubr.msk.bf16.mxu1 %vm4945_vm8, %v6433_v33 }
 0x752   :  { %4313 = vmatpush3.bf16.msra.mxu0 %v5604_v36  ;;  %4331 = vmatpush3.bf16.msra.mxu1 %v5397_v3  ;;  %v6507_v3 = vld [vmem:[#allocation45_spill] sm:$0xff]  ;;  %v6508_v36 = vld [vmem:[#allocation40_spill] sm:$0xff] }
 0x753   :  { %4314 = vmatprep.subr.bf16.mxu0 %v6433_v33  ;;  %4332 = vmatprep.subr.bf16.mxu1 %v6433_v33 }
 0x756   :  { %4315 = vmatpush3.bf16.msra.mxu0 %v5618_v46  ;;  %4333 = vmatpush3.bf16.msra.mxu1 %v5609_v39  ;;  %v6509_v39 = vsel %vm5311_vm13, %v6508_v36, 0  ;;  %v6510_v46 = vld [vmem:[#allocation39_spill] sm:$0xff] }
 0x757   :  { %4316 = vmatprep.subr.bf16.mxu0 %v6433_v33  ;;  %4334 = vmatprep.subr.bf16.mxu1 %v6433_v33 }
 0x75a   :  { %4317 = vmatpush3.bf16.msra.mxu0 %v6502_v51  ;;  %4335 = vmatpush3.bf16.msra.mxu1 %v5623_v12  ;;  %v6511_v12 = vsel %vm5311_vm13, %v6510_v46, 0 }
 0x75b   :  { %4318 = vmatprep.subr.bf16.mxu0 %v6433_v33  ;;  %4336 = vmatprep.subr.bf16.mxu1 %v6433_v33 }
 0x75e   :  { %4319 = vmatpush3.bf16.msra.mxu0 %v6503_v57  ;;  %4337 = vmatpush3.bf16.msra.mxu1 %v6504_v17 }
 0x75f   :  { %4320 = vmatprep.subr.bf16.mxu0 %v6433_v33  ;;  %4338 = vmatprep.subr.bf16.mxu1 %v6433_v33 }
 0x762   :  { %4321 = vmatpush3.bf16.msra.mxu0 %v6506_v1  ;;  %4339 = vmatpush3.bf16.msra.mxu1 %v6507_v3 }
 0x763   :  { %4322 = vmatprep.subr.bf16.mxu0 %v6433_v33  ;;  %4340 = vmatprep.subr.bf16.mxu1 %v6433_v33 }
 0x766   :  { %4323 = vmatpush3.bf16.msra.mxu0 %v6509_v39  ;;  %4341 = vmatpush3.bf16.msra.mxu1 %v6511_v12 }
 0x767   :  { %4342 = vmatprep.subr.bf16.mxu1 %v6433_v33  ;;  %4348 = vmatprep.subr.bf16.mxu0 %v6433_v33 }
 0x769   :  { %4325 = vmatmul.mubr.bf16.vlgmr.msra.gmra.mrb[56].mxu0 %v6482_v43 }
 0x76a   :  { %4343 = vmatpush3.bf16.msra.mxu1 %v6513_v47  ;;  %4349 = vmatpush3.bf16.msra.mxu0 %v6515_v60 }
 0x76b   :  { %4354 = vmatprep.subr.bf16.mxu1 %v6433_v33  ;;  %4350 = vmatprep.mubr.msk.bf16.mxu0 %vm4945_vm8, %v6433_v33 }
 0x76c   :  { %4360 = vmatprep.subr.bf16.mxu0 %v6433_v33 }
 0x76d   :  { %4345 = vmatmul.mubr.bf16.vlgmr.msra.gmra.mrb[72].mxu1 %v6486_v49 }
 0x76e   :  { %4355 = vmatpush3.bf16.msra.mxu1 %v6516_v6  ;;  %4356 = vmatprep.mubr.msk.bf16.mxu1 %vm4945_vm8, %v6433_v33 }
 0x76f   :  { %4366 = vmatprep.subr.bf16.mxu1 %v6433_v33 }
 0x7dc   :  { %v2593_v28 = vpop.f32.mrb[44].mxu0 }
 0x7dd   :  { %v6270_v43 = vadd.f32 %v2593_v28, %v6105_v0  ;;  %v4248_v56 = vpop.f32.mrb[45].mxu0 }
 0x7de   :  { %v2596_v54 = vpop.f32.mrb[46].mxu0 }
 0x7df   :  { %v6273_v34 = vadd.f32 %v2596_v54, %v6107_v41  ;;  %v4249_v49 = vpop.f32.mrb[47].mxu0 }
 0x7e0   :  { %v2637_v52 = vpop.f32.mrb[60].mxu1 }
 0x7e1   :  { %v6276_v58 = vadd.f32 %v2637_v52, %v6109_v38  ;;  %v4254_v26 = vpop.f32.mrb[61].mxu1 }
 0x7e2   :  { %v2640_v16 = vpop.f32.mrb[62].mxu1 }
 0x7e3   :  { %v6279_v48 = vadd.f32 %v2640_v16, %v6111_v25  ;;  %v4255_v62 = vpop.f32.mrb[63].mxu1 }
 0x7fc   :  { %v2681_v37 = vpop.f32.mrb[48].mxu0 }
 0x7fd   :  { %v6282_v0 = vadd.f32 %v2681_v37, %v6113_v4  ;;  %v4260_v19 = vpop.f32.mrb[49].mxu0 }
 0x7fe   :  { %v2684_v35 = vpop.f32.mrb[50].mxu0 }
 0x7ff   :  { %v6285_v41 = vadd.f32 %v2684_v35, %v6115_v30  ;;  %v4261_v18 = vpop.f32.mrb[51].mxu0 }
 0x800   :  { %v2725_v45 = vpop.f32.mrb[64].mxu1 }
 0x801   :  { %v6288_v38 = vadd.f32 %v2725_v45, %v6117_v7  ;;  %v4266_v13 = vpop.f32.mrb[65].mxu1 }
 0x802   :  { %v2728_v10 = vpop.f32.mrb[66].mxu1 }
 0x803   :  { %v6291_v25 = vadd.f32 %v2728_v10, %v6119_v20  ;;  %v4267_v23 = vpop.f32.mrb[67].mxu1 }
 0x81c   :  { %v2966_v31 = vpop.f32.mrb[52].mxu0 }
 0x81d   :  { %v4286_v59 = vpop.f32.mrb[53].mxu0  ;;  %v3096_v4 = vsel %vm1215_vm15, %v2966_v31, -inf }
 0x81e   :  { %3097 = vmax.xlane.f32.xlu1 %v3096_v4  ;;  %v2969_v9 = vpop.f32.mrb[54].mxu0 }
 0x81f   :  { %v4287_v44 = vpop.f32.mrb[55].mxu0  ;;  %v3099_v30 = vsel %vm1215_vm15, %v2969_v9, -inf }
 0x820   :  { %3100 = vmax.xlane.f32.xlu0 %v3099_v30  ;;  %v3007_v63 = vpop.f32.mrb[68].mxu1 }
 0x821   :  { %v4306_v32 = vpop.f32.mrb[69].mxu1  ;;  %v3102_v7 = vsel %vm1215_vm15, %v3007_v63, -inf }
 0x822   :  { %3103 = vmax.xlane.f32.xlu1 %v3102_v7  ;;  %v3010_v27 = vpop.f32.mrb[70].mxu1 }
 0x823   :  { %v4307_v29 = vpop.f32.mrb[71].mxu1  ;;  %v3105_v20 = vsel %vm1215_vm15, %v3010_v27, -inf }
 0x824   :  { %3106 = vmax.xlane.f32.xlu0 %v3105_v20 }
 0x83c   :  { %v3048_v5 = vpop.f32.mrb[56].mxu0 }
 0x83d   :  { %v4326_v50 = vpop.f32.mrb[57].mxu0  ;;  %v3108_v14 = vsel %vm1215_vm15, %v3048_v5, -inf }
 0x83e   :  { %v3051_v40 = vpop.f32.mrb[58].mxu0  ;;  %3109 = vmax.xlane.f32.xlu1 %v3108_v14 }
 0x83f   :  { %v4327_v22 = vpop.f32.mrb[59].mxu0  ;;  %v3111_v24 = vsel %vm1215_vm15, %v3051_v40, -inf }
 0x840   :  { %3112 = vmax.xlane.f32.xlu0 %v3111_v24  ;;  %v3089_v8 = vpop.f32.mrb[72].mxu1 }
 0x841   :  { %v4346_v42 = vpop.f32.mrb[73].mxu1  ;;  %v3114_v2 = vsel %vm1215_vm15, %v3089_v8, -inf }
 0x842   :  { %3115 = vmax.xlane.f32.xlu1 %v3114_v2  ;;  %v3092_v61 = vpop.f32.mrb[74].mxu1 }
 0x843   :  { %v4347_v51 = vpop.f32.mrb[75].mxu1  ;;  %v3117_v57 = vsel %vm1215_vm15, %v3092_v61, -inf }
 0x844   :  { %3118 = vmax.xlane.f32.xlu0 %v3117_v57  ;;  %v4625_v51 = vld [vmem:[#allocation11] sm:$0xff]  }
 0x8ab   :  { %v3098_v17 = vpop.xlane.xlu1 %3097 }
 0x8ac   :  { %v3120_v21 = vsub.f32 %v2966_v31, %v3098_v17 }
 0x8ad   :  { %v3101_v1 = vpop.xlane.xlu0 %3100 }
 0x8ae   :  { %v3128_v3 = vmul.f32 1.442695, %v3120_v21  ;;  %v3121_v36 = vsub.f32 %v2969_v9, %v3101_v1  ;;  %v6517_v1 = vsel %vm5232_vm9, %v5270_v55, 0 }
 0x8af   :  { %v3104_v39 = vpop.xlane.xlu1 %3103 }
 0x8b0   :  { %4729 = vpow2.f32 %v3128_v3  ;;  %v3130_v46 = vmul.f32 1.442695, %v3121_v36  ;;  %v3122_v12 = vsub.f32 %v3007_v63, %v3104_v39  ;;  %v6518_v36 = vsel %vm5232_vm9, %v5268_v53, 0 }
 0x8b1   :  { %v3107_v11 = vpop.xlane.xlu0 %3106 }
 0x8b2   :  { %4731 = vpow2.f32 %v3130_v46  ;;  %v3132_v47 = vmul.f32 1.442695, %v3122_v12  ;;  %v3123_v60 = vsub.f32 %v3010_v27, %v3107_v11 }
 0x8b4   :  { %4733 = vpow2.f32 %v3132_v47  ;;  %v3134_v6 = vmul.f32 1.442695, %v3123_v60 }
 0x8b6   :  { %4735 = vpow2.f32 %v3134_v6 }
 0x8ba   :  { %v4730_v28 = vpop.eup %4729 }
 0x8bb   :  { %v3144_v56 = vsel %vm1215_vm15, %v4730_v28, 0.0 }
 0x8bc   :  { %v4732_v54 = vpop.eup %4731  ;;  %3145 = vadd.xlane.f32.xlu1 %v3144_v56  ;;  %v4626_v56 = vld [vmem:[#allocation11 + $0x8] sm:$0xff]  }
 0x8bd   :  { %v3147_v49 = vsel %vm1215_vm15, %v4732_v54, 0.0 }
 0x8be   :  { %v4734_v52 = vpop.eup %4733  ;;  %3148 = vadd.xlane.f32.xlu0 %v3147_v49 }
 0x8bf   :  { %v3150_v26 = vsel %vm1215_vm15, %v4734_v52, 0.0 }
 0x8c0   :  { %v4736_v16 = vpop.eup %4735  ;;  %3151 = vadd.xlane.f32.xlu1 %v3150_v26  ;;  %v4628_v26 = vld [vmem:[#allocation11 + $0x18] sm:$0xff]  }
 0x8c1   :  { %v3153_v62 = vsel %vm1215_vm15, %v4736_v16, 0.0 }
 0x8c2   :  { %3154 = vadd.xlane.f32.xlu0 %v3153_v62  ;;  %v4630_v62 = vld [vmem:[#allocation11 + $0x28] sm:$0xff]  }
 0x8cb   :  { %v3110_v37 = vpop.xlane.xlu1 %3109 }
 0x8cc   :  { %v3124_v19 = vsub.f32 %v3048_v5, %v3110_v37  ;;  %v4631_v37 = vld [vmem:[#allocation11 + $0x30] sm:$0xff]  }
 0x8cd   :  { %v3113_v35 = vpop.xlane.xlu0 %3112 }
 0x8ce   :  { %v3136_v18 = vmul.f32 1.442695, %v3124_v19  ;;  %v3125_v45 = vsub.f32 %v3051_v40, %v3113_v35  ;;  %v4632_v19 = vld [vmem:[#allocation11 + $0x38] sm:$0xff]  }
 0x8cf   :  { %v3116_v13 = vpop.xlane.xlu1 %3115 }
 0x8d0   :  { %4737 = vpow2.f32 %v3136_v18  ;;  %v3138_v10 = vmul.f32 1.442695, %v3125_v45  ;;  %v3126_v23 = vsub.f32 %v3089_v8, %v3116_v13 }
 0x8d1   :  { %v3119_v31 = vpop.xlane.xlu0 %3118 }
 0x8d2   :  { %4739 = vpow2.f32 %v3138_v10  ;;  %v3140_v59 = vmul.f32 1.442695, %v3126_v23  ;;  %v3127_v4 = vsub.f32 %v3092_v61, %v3119_v31 }
 0x8d4   :  { %4741 = vpow2.f32 %v3140_v59  ;;  %v3142_v9 = vmul.f32 1.442695, %v3127_v4  ;;  %v4761_v59 = vld [vmem:[#allocation2] sm:$0xff] }
 0x8d6   :  { %4743 = vpow2.f32 %v3142_v9  ;;  %v4762_v9 = vld [vmem:[#allocation2 + $0x8] sm:$0xff] }
 0x8da   :  { %v4738_v44 = vpop.eup %4737 }
 0x8db   :  { %v3156_v30 = vsel %vm1215_vm15, %v4738_v44, 0.0 }
 0x8dc   :  { %v4740_v63 = vpop.eup %4739  ;;  %3157 = vadd.xlane.f32.xlu1 %v3156_v30 }
 0x8dd   :  { %v3159_v32 = vsel %vm1215_vm15, %v4740_v63, 0.0 }
 0x8de   :  { %v4742_v7 = vpop.eup %4741  ;;  %3160 = vadd.xlane.f32.xlu0 %v3159_v32 }
 0x8df   :  { %v3162_v27 = vsel %vm1215_vm15, %v4742_v7, 0.0 }
 0x8e0   :  { %v4744_v29 = vpop.eup %4743  ;;  %3163 = vadd.xlane.f32.xlu1 %v3162_v27 }
 0x8e1   :  { %v3165_v20 = vsel %vm1215_vm15, %v4744_v29, 0.0 }
 0x8e2   :  { %3166 = vadd.xlane.f32.xlu0 %v3165_v20  ;;  %v4763_v20 = vld [vmem:[#allocation2 + $0x10] sm:$0xff] }
 0x949   :  { %v3146_v5 = vpop.xlane.xlu1 %3145 }
 0x94a   :  { %4745 = vrcp.f32 %v3146_v5  ;;  %v4764_v5 = vld [vmem:[#allocation2 + $0x18] sm:$0xff] }
 0x94b   :  { %v3149_v50 = vpop.xlane.xlu0 %3148 }
 0x94c   :  { %4747 = vrcp.f32 %v3149_v50 }
 0x94d   :  { %v3152_v14 = vpop.xlane.xlu1 %3151 }
 0x94e   :  { %4749 = vrcp.f32 %v3152_v14 }
 0x94f   :  { %v3155_v40 = vpop.xlane.xlu0 %3154 }
 0x950   :  { %4751 = vrcp.f32 %v3155_v40 }
 0x954   :  { %v4746_v22 = vpop.eup %4745 }
 0x955   :  { %v3176_v8 = vmul.f32 %v4746_v22, %v4730_v28 }
 0x956   :  { %v4748_v24 = vpop.eup %4747 }
 0x957   :  { %v3177_v42 = vmul.f32 %v4748_v24, %v4732_v54 }
 0x958   :  { %v4750_v2 = vpop.eup %4749 }
 0x959   :  { %v3184_v61 = vpack.c.bf16 %v3177_v42, %v3176_v8  ;;  %v3178_v17 = vmul.f32 %v4750_v2, %v4734_v52  ;;  %v4627_v52 = vld [vmem:[#allocation11 + $0x10] sm:$0xff]   ;;  %v4765_v2 = vld [vmem:[#allocation2 + $0x20] sm:$0xff] }
 0x95a   :  { %v4752_v57 = vpop.eup %4751 }
 0x95b   :  { %v3179_v21 = vmul.f32 %v4752_v57, %v4736_v16  ;;  %4351 = vmatmul.mubr.msk.bf16.vlgmr.msra.gmra.mrb[60].mxu0 %vm1215_vm15, %v3184_v61  ;;  %v4629_v16 = vld [vmem:[#allocation11 + $0x20] sm:$0xff]   ;;  %v4766_v61 = vld [vmem:[#allocation2 + $0x28] sm:$0xff] }
 0x95c   :  { %4361 = vmatpush3.bf16.msra.mxu0 %v6517_v1  ;;  %4362 = vmatprep.mubr.msk.bf16.mxu0 %vm4945_vm8, %v6433_v33 }
 0x95d   :  { %v3185_v3 = vpack.c.bf16 %v3179_v21, %v3178_v17  ;;  %4372 = vmatprep.subr.bf16.mxu0 %v4625_v51 }
 0x95f   :  { %4357 = vmatmul.mubr.msk.bf16.vlgmr.msra.gmra.mrb[76].mxu1 %vm1215_vm15, %v3185_v3 }
 0x960   :  { %4367 = vmatpush3.bf16.msra.mxu1 %v6518_v36  ;;  %4368 = vmatprep.mubr.msk.bf16.mxu1 %vm4945_vm8, %v6433_v33 }
 0x969   :  { %v3158_v39 = vpop.xlane.xlu1 %3157 }
 0x96a   :  { %4753 = vrcp.f32 %v3158_v39  ;;  %v4767_v39 = vld [vmem:[#allocation2 + $0x30] sm:$0xff] }
 0x96b   :  { %v3161_v46 = vpop.xlane.xlu0 %3160 }
 0x96c   :  { %4755 = vrcp.f32 %v3161_v46  ;;  %v4768_v46 = vld [vmem:[#allocation2 + $0x38] sm:$0xff] }
 0x96d   :  { %v3164_v55 = vpop.xlane.xlu1 %3163 }
 0x96e   :  { %4757 = vrcp.f32 %v3164_v55 }
 0x96f   :  { %v3167_v12 = vpop.xlane.xlu0 %3166 }
 0x970   :  { %4759 = vrcp.f32 %v3167_v12  ;;  %v3651_v12 = vld [vmem:[%s6361_s10] ss:$0 sm:$0xff]  ;;  %s4947_s10 = smov [#allocation13]  }
 0x971   :  { %s3549_s30 = sshll.u32 %s4947_s10, 4  ;;  %s3550_s30 = int_to_ptr.vmem [resolvable:$true] %s3549_s30 }
 0x972   :  { %s4901_s12 = scalar_lea.vmem %s3550_s30, 1024  ;;  %p4906_p7 = scmp.lt.s32.totalorder %s3550_s30, %s3550_s30 }
 0x973   :  { %p4902_p6 = scmp.ne.s32.totalorder %s3550_s30, %s4901_s12  ;;  %p4907_p8 = scmp.lt.s32.totalorder %s4901_s12, %s4901_s12 }
 0x974   :  { %v4754_v11 = vpop.eup %4753 }
 0x975   :  { %v3180_v60 = vmul.f32 %v4754_v11, %v4738_v44  ;;  %p4908_p9 = por %p4907_p8, %p4906_p7 }
 0x976   :  { %v4756_v47 = vpop.eup %4755 }
 0x977   :  { %v3181_v6 = vmul.f32 %v4756_v47, %v4740_v63  ;;  %p4909_p10 = pnand %p4908_p9, %p4902_p6 }
 0x978   :  { %v4758_v28 = vpop.eup %4757 }
 0x979   :  { %v3186_v15 = vpack.c.bf16 %v3181_v6, %v3180_v60  ;;  %v3182_v54 = vmul.f32 %v4758_v28, %v4742_v7 }
 0x97a   :  { %v4760_v53 = vpop.eup %4759 }
 0x97b   :  { %v3183_v49 = vmul.f32 %v4760_v53, %v4744_v29  ;;  %4363 = vmatmul.mubr.msk.bf16.vlgmr.msra.gmra.mrb[64].mxu0 %vm1215_vm15, %v3186_v15 }
 0x97c   :  { %4373 = vmatpush3.bf16.msra.mxu0 %v4625_v51 }
 0x97d   :  { %v3187_v33 = vpack.c.bf16 %v3183_v49, %v3182_v54  ;;  %4374 = vmatprep.subr.bf16.mxu0 %v4626_v56 }
 0x97f   :  { %4369 = vmatmul.mubr.msk.bf16.vlgmr.msra.gmra.mrb[80].mxu1 %vm1215_vm15, %v3187_v33 }
 0x980   :  { %4375 = vmatpush3.bf16.msra.mxu0 %v4626_v56 }
 0x981   :  { %4376 = vmatprep.subr.bf16.mxu0 %v4627_v52 }
 0x984   :  { %4377 = vmatpush3.bf16.msra.mxu0 %v4627_v52 }
 0x985   :  { %4378 = vmatprep.subr.bf16.mxu0 %v4628_v26 }
 0x988   :  { %4379 = vmatpush3.bf16.msra.mxu0 %v4628_v26 }
 0x989   :  { %4380 = vmatprep.subr.bf16.mxu0 %v4629_v16 }
 0x98c   :  { %4381 = vmatpush3.bf16.msra.mxu0 %v4629_v16 }
 0x98d   :  { %4382 = vmatprep.subr.bf16.mxu0 %v4630_v62 }
 0x990   :  { %4383 = vmatpush3.bf16.msra.mxu0 %v4630_v62 }
 0x991   :  { %4384 = vmatprep.subr.bf16.mxu0 %v4631_v37 }
 0x994   :  { %4385 = vmatpush3.bf16.msra.mxu0 %v4631_v37 }
 0x995   :  { %4386 = vmatprep.subr.bf16.mxu0 %v4632_v19 }
 0x998   :  { %4387 = vmatpush3.bf16.msra.mxu0 %v4632_v19 }
 0xa2e   :  { %v3225_v35 = vpop.f32.mrb[60].mxu0 }
 0xa2f   :  { %v3364_v18 = vadd.f32 %v3225_v35, %v6270_v43  ;;  %v4352_v45 = vpop.f32.mrb[61].mxu0 }
 0xa30   :  { %v3228_v13 = vpop.f32.mrb[62].mxu0 }
 0xa31   :  { %v3365_v10 = vadd.f32 %v3228_v13, %v6273_v34  ;;  %v4353_v23 = vpop.f32.mrb[63].mxu0  ;;  %v3372_v4 = vadd.f32 %v4761_v59, %v3364_v18 }
 0xa32   :  { %v3269_v31 = vpop.f32.mrb[76].mxu1 }
 0xa33   :  { %v3373_v44 = vadd.f32 %v4762_v9, %v3365_v10  ;;  %v3366_v30 = vadd.f32 %v3269_v31, %v6276_v58  ;;  %v4358_v63 = vpop.f32.mrb[77].mxu1 }
 0xa34   :  { %v3272_v32 = vpop.f32.mrb[78].mxu1 }
 0xa35   :  { %v3367_v7 = vadd.f32 %v3272_v32, %v6279_v48  ;;  %v4359_v27 = vpop.f32.mrb[79].mxu1  ;;  %v3380_v29 = vpack.c.bf16 %v3373_v44, %v3372_v4  ;;  %v3374_v43 = vadd.f32 %v4763_v20, %v3366_v30 }
 0xa37   :  { %v3375_v50 = vadd.f32 %v4764_v5, %v3367_v7  ;;  %4388 = vmatprep.mubr.bf16.mxu0 %v3380_v29 }
 0xa39   :  { %v3381_v34 = vpack.c.bf16 %v3375_v50, %v3374_v43 }
 0xa3b   :  { %4389 = vmatmul.mubr.bf16.vlgmr.msra.gmra.mrb[68].mxu0 %v3381_v34 }
 0xa4e   :  { %v3313_v14 = vpop.f32.mrb[64].mxu0 }
 0xa4f   :  { %v3368_v40 = vadd.f32 %v3313_v14, %v6282_v0  ;;  %v4364_v22 = vpop.f32.mrb[65].mxu0 }
 0xa50   :  { %v3316_v24 = vpop.f32.mrb[66].mxu0 }
 0xa51   :  { %v3369_v58 = vadd.f32 %v3316_v24, %v6285_v41  ;;  %v4365_v8 = vpop.f32.mrb[67].mxu0  ;;  %v3376_v48 = vadd.f32 %v4765_v2, %v3368_v40 }
 0xa52   :  { %v3357_v42 = vpop.f32.mrb[80].mxu1 }
 0xa53   :  { %v3377_v51 = vadd.f32 %v4766_v61, %v3369_v58  ;;  %v3370_v57 = vadd.f32 %v3357_v42, %v6288_v38  ;;  %v4370_v17 = vpop.f32.mrb[81].mxu1 }
 0xa54   :  { %v3360_v21 = vpop.f32.mrb[82].mxu1 }
 0xa55   :  { %v3371_v1 = vadd.f32 %v3360_v21, %v6291_v25  ;;  %v4371_v3 = vpop.f32.mrb[83].mxu1  ;;  %v3382_v36 = vpack.c.bf16 %v3377_v51, %v3376_v48  ;;  %v3378_v0 = vadd.f32 %v4767_v39, %v3370_v57 }
 0xa57   :  { %v3379_v55 = vadd.f32 %v4768_v46, %v3371_v1  ;;  %4392 = vmatprep.mubr.bf16.mxu0 %v3382_v36 }
 0xa59   :  { %v3383_v41 = vpack.c.bf16 %v3379_v55, %v3378_v0 }
 0xa5b   :  { %4393 = vmatmul.mubr.bf16.gmra.mrb[72].mxu0 %v3383_v41 }
 0xb0e   :  { %v4390_v11 = vpop.f32.mrb[68].mxu0 }
 0xb0f   :  { %v3498_v47 = vadd.f32 %v4390_v11, %v3651_v12  ;;  %v3489_v38 = vpop.f32.mrb[69].mxu0 }
 0xb10   :  { %v3490_v60 = vadd.f32 %v3651_v12, %v3489_v38  ;;  %v4391_v6 = vpop.f32.mrb[70].mxu0 }
 0xb11   :  { %v3522_v28 = vmax.f32 %v3498_v47, 0.0  ;;  %v3501_v25 = vadd.f32 %v4391_v6, %v3651_v12  ;;  %v3492_v15 = vpop.f32.mrb[71].mxu0 }
 0xb12   :  { %v3520_v56 = vmax.f32 %v3490_v60, 0.0  ;;  %v3493_v53 = vadd.f32 %v3651_v12, %v3492_v15 }
 0xb13   :  { %v3530_v54 = vadd.f32 %v3522_v28, %v3374_v43  ;;  %v3523_v49 = vmax.f32 %v3501_v25, 0.0 }
 0xb14   :  { %v3528_v33 = vadd.f32 %v3520_v56, %v3372_v4  ;;  %v3521_v52 = vmax.f32 %v3493_v53, 0.0 }
 0xb15   :  { %3538 = vst [vmem:[#allocation13 + $0x10] sm:$0xff] %v3530_v54  ;;  %v3531_v26 = vadd.f32 %v3523_v49, %v3375_v50 }
 0xb16   :  { %3536 = vst [vmem:[#allocation13] sm:$0xff] %v3528_v33  ;;  %v3529_v16 = vadd.f32 %v3521_v52, %v3373_v44 }
 0xb17   :  { %3539 = vst [vmem:[#allocation13 + $0x18] sm:$0xff] %v3531_v26 }
 0xb18   :  { %3537 = vst [vmem:[#allocation13 + $0x8] sm:$0xff] %v3529_v16 }
 0xb2e   :  { %v4394_v62 = vpop.f32.mrb[72].mxu0 }
 0xb2f   :  { %v3514_v37 = vadd.f32 %v4394_v62, %v3651_v12  ;;  %v3505_v19 = vpop.f32.mrb[73].mxu0 }
 0xb30   :  { %v3506_v35 = vadd.f32 %v3651_v12, %v3505_v19  ;;  %v4395_v18 = vpop.f32.mrb[74].mxu0 }
 0xb31   :  { %v3526_v45 = vmax.f32 %v3514_v37, 0.0  ;;  %v3517_v13 = vadd.f32 %v4395_v18, %v3651_v12  ;;  %v3508_v10 = vpop.f32.mrb[75].mxu0 }
 0xb32   :  { %v3524_v23 = vmax.f32 %v3506_v35, 0.0  ;;  %v3509_v31 = vadd.f32 %v3651_v12, %v3508_v10 }
 0xb33   :  { %v3534_v59 = vadd.f32 %v3526_v45, %v3378_v0  ;;  %v3527_v9 = vmax.f32 %v3517_v13, 0.0 }
 0xb34   :  { %v3532_v4 = vadd.f32 %v3524_v23, %v3376_v48  ;;  %v3525_v30 = vmax.f32 %v3509_v31, 0.0 }
 0xb35   :  { %3542 = vst [vmem:[#allocation13 + $0x30] sm:$0xff] %v3534_v59  ;;  %v3535_v44 = vadd.f32 %v3527_v9, %v3379_v55 }
 0xb36   :  { %3540 = vst [vmem:[#allocation13 + $0x20] sm:$0xff] %v3532_v4  ;;  %v3533_v63 = vadd.f32 %v3525_v30, %v3377_v51 }
 0xb37   :  { %3543 = vst [vmem:[#allocation13 + $0x38] sm:$0xff] %v3535_v44 }
 0xb38   :  { %3541 = vst [vmem:[#allocation13 + $0x28] sm:$0xff] %v3533_v63 }
 0xb39   :  { %4912 = shalt.err (!%p4909_p10)
}
 0xb3a   :  { %s4913_s1 = scalar_lea.hbm %s6362_s11, 1024 }
 0xb3b   :  { %p4914_p11 = scmp.ne.s32.totalorder %s6362_s11, %s4913_s1  ;;  %p4917_p12 = scmp.lt.u32.totalorder %s4913_s1, %s6362_s11 }
 0xb3d   :  { %p4919_p13 = pnand %p4917_p12, %p4914_p11 }
 0xb3f   :  { %4922 = shalt.err (!%p4919_p13)
}
 0xb40   :  { %3555 = dma.vmem_to_hbm [thread:$0]  %s3550_s30, 1024, %s6362_s11, [#allocation4], %s4934_s27, %s4934_s27, %s4935_s28  }
 0xb41   :  { %4931 = dma.done.wait [#allocation4], 1024  }
 0xb42   :  { %4932 = vsyncadd [#allocation4], 4294966272 }
 0xb43   :  { %3559 = vsyncpa [#allocation3], 1 }
 0xb44   :  { %3560 = vsyncpa [#allocation6], 1 }
 0xb45   :  { %3561 = vsyncpa [#allocation9], 1 }
 0xb46   :  { %3562 = vsyncpa [#allocation12], 1 }
 0xb47   :  { %3563 = vsyncpa [#allocation4], 1 }

// kernel: tpu_custom_call.1
= control target key start
LH: loop header
LB: loop body
LE: loop exit
PB: predicated region body
PF: predicated region fallthrough
CT: control target
= control target key end

     0   :  { %16 = vsyncpa [#allocation3], 0  ;;  %s6351_s0 = inlined_call_operand.vmem [shape: s32[4,1,1], index: 0, kind: input, shape index: {}]   ;;  %s6352_s1 = inlined_call_operand.hbm [shape: f32[4,16,128], index: 1, kind: input, shape index: {}]   ;;  %s6353_s2 = inlined_call_operand.hbm [shape: f32[4,16,128], index: 2, kind: input, shape index: {}]   ;;  %s6354_s3 = inlined_call_operand.hbm [shape: bf16[128,128], index: 3, kind: input, shape index: {}]   ;;  %s6355_s4 = inlined_call_operand.vmem [shape: f32[1,128], index: 4, kind: input, shape index: {}]   ;;  %s6356_s5 = inlined_call_operand.hbm [shape: bf16[128,128], index: 5, kind: input, shape index: {}]   ;;  %s6357_s6 = inlined_call_operand.vmem [shape: f32[1,128], index: 6, kind: input, shape index: {}]   ;;  %s6358_s7 = inlined_call_operand.hbm [shape: bf16[128,128], index: 7, kind: input, shape index: {}]   ;;  %s6359_s8 = inlined_call_operand.vmem [shape: f32[1,128], index: 8, kind: input, shape index: {}]   ;;  %s6360_s9 = inlined_call_operand.hbm [shape: bf16[128,128], index: 9, kind: input, shape index: {}]   ;;  %s6361_s10 = inlined_call_operand.vmem [shape: f32[1,128], index: 10, kind: input, shape index: {}]   ;;  %s6362_s11 = inlined_call_operand.hbm [shape: f32[4,16,128], index: 11, kind: output, shape index: {}]  }
   0x1   :  { %17 = vsyncpa [#allocation6], 0 }
   0x2   :  { %18 = vsyncpa [#allocation9], 0 }
   0x3   :  { %19 = vsyncpa [#allocation12], 0 }
   0x4   :  { %20 = vsyncpa [#allocation4], 0  ;;  %s4933_s17 = smov [#allocation5]   ;;  %s4769_s21 = scalar_lea.hbm %s6353_s2, 1024 }
   0x5   :  { %s40_s18 = sshll.u32 %s4933_s17, 4  ;;  %p4770_p0 = scmp.ne.s32.totalorder %s6353_s2, %s4769_s21  ;;  %s41_s18 = int_to_ptr.vmem [resolvable:$true] %s40_s18 }
   0x6   :  { %p4773_p1 = scmp.lt.u32.totalorder %s4769_s21, %s6353_s2 }
   0x8   :  { %p4775_p2 = pnand %p4773_p1, %p4770_p0 }
   0xa   :  { %4778 = shalt.err (!%p4775_p2)
}
   0xb   :  { %s4779_s26 = scalar_lea.vmem %s41_s18, 1024  ;;  %p4784_p4 = scmp.lt.s32.totalorder %s41_s18, %s41_s18 }
   0xc   :  { %p4780_p3 = scmp.ne.s32.totalorder %s41_s18, %s4779_s26  ;;  %p4785_p5 = scmp.lt.s32.totalorder %s4779_s26, %s4779_s26 }
   0xe   :  { %p4786_p6 = por %p4785_p5, %p4784_p4 }
  0x10   :  { %p4787_p7 = pnand %p4786_p6, %p4780_p3 }
  0x12   :  { %4790 = shalt.err (!%p4787_p7)
}
  0x13   :  { %s4934_s27 = smov 128   ;;  %s4935_s28 = smov 8  }
  0x14   :  { %46 = dma.hbm_to_vmem [thread:$0]  %s6353_s2, 1024, %s41_s18, [#allocation6], %s4934_s27, %s4934_s27, %s4935_s28  }
  0x15   :  { %s4936_s12 = smov [#allocation8]   ;;  %s4937_s14 = smov [#allocation2]  }
  0x16   :  { %s66_s13 = sshll.u32 %s4936_s12, 4  ;;  %s28_s15 = sshll.u32 %s4937_s14, 4  ;;  %s67_s13 = int_to_ptr.vmem [resolvable:$true] %s66_s13  ;;  %s29_s15 = int_to_ptr.vmem [resolvable:$true] %s28_s15 }
  0x17   :  { %s4791_s19 = scalar_lea.hbm %s6356_s5, 1024 }
  0x18   :  { %p4792_p8 = scmp.ne.s32.totalorder %s6356_s5, %s4791_s19  ;;  %p4795_p9 = scmp.lt.u32.totalorder %s4791_s19, %s6356_s5 }
  0x1a   :  { %p4797_p10 = pnand %p4795_p9, %p4792_p8 }
  0x1c   :  { %4800 = shalt.err (!%p4797_p10)
}
  0x1d   :  { %s4801_s2 = scalar_lea.vmem %s67_s13, 1024  ;;  %p4806_p12 = scmp.lt.s32.totalorder %s67_s13, %s67_s13 }
  0x1e   :  { %p4802_p11 = scmp.ne.s32.totalorder %s67_s13, %s4801_s2  ;;  %p4807_p13 = scmp.lt.s32.totalorder %s4801_s2, %s4801_s2 }
  0x20   :  { %p4808_p0 = por %p4807_p13, %p4806_p12 }
  0x22   :  { %p4809_p1 = pnand %p4808_p0, %p4802_p11 }
  0x24   :  { %4812 = shalt.err (!%p4809_p1)
}
  0x25   :  { %s4938_s18 = smov 64   ;;  %s4939_s24 = smov 4  }
  0x26   :  { %72 = dma.hbm_to_vmem [thread:$0]  %s6356_s5, 1024, %s67_s13, [#allocation9], %s4938_s18, %s4938_s18, %s4939_s24  }
  0x27   :  { %s4813_s12 = scalar_lea.hbm %s6352_s1, 1024 }
  0x28   :  { %p4814_p2 = scmp.ne.s32.totalorder %s6352_s1, %s4813_s12  ;;  %p4817_p3 = scmp.lt.u32.totalorder %s4813_s12, %s6352_s1 }
  0x2a   :  { %p4819_p4 = pnand %p4817_p3, %p4814_p2 }
  0x2c   :  { %4822 = shalt.err (!%p4819_p4)
}
  0x2d   :  { %s4823_s20 = scalar_lea.vmem %s29_s15, 1024  ;;  %p4828_p6 = scmp.lt.s32.totalorder %s29_s15, %s29_s15 }
  0x2e   :  { %p4824_p5 = scmp.ne.s32.totalorder %s29_s15, %s4823_s20  ;;  %p4829_p7 = scmp.lt.s32.totalorder %s4823_s20, %s4823_s20 }
  0x30   :  { %p4830_p8 = por %p4829_p7, %p4828_p6 }
  0x32   :  { %p4831_p9 = pnand %p4830_p8, %p4824_p5 }
  0x34   :  { %4834 = shalt.err (!%p4831_p9)
}
  0x35   :  { %34 = dma.hbm_to_vmem [thread:$0]  %s6352_s1, 1024, %s29_s15, [#allocation3], %s4934_s27, %s4934_s27, %s4935_s28  }
  0x36   :  { %s4940_s21 = smov [#allocation7]   ;;  %s4941_s23 = smov [#allocation10]  }
  0x37   :  { %s52_s22 = sshll.u32 %s4940_s21, 4  ;;  %s80_s2 = sshll.u32 %s4941_s23, 4  ;;  %s53_s22 = int_to_ptr.vmem [resolvable:$true] %s52_s22  ;;  %s81_s2 = int_to_ptr.vmem [resolvable:$true] %s80_s2 }
  0x38   :  { %s4835_s29 = scalar_lea.hbm %s6354_s3, 1024 }
  0x39   :  { %p4836_p10 = scmp.ne.s32.totalorder %s6354_s3, %s4835_s29  ;;  %p4839_p11 = scmp.lt.u32.totalorder %s4835_s29, %s6354_s3 }
  0x3b   :  { %p4841_p12 = pnand %p4839_p11, %p4836_p10 }
  0x3d   :  { %4844 = shalt.err (!%p4841_p12)
}
  0x3e   :  { %s4845_s1 = scalar_lea.vmem %s53_s22, 1024  ;;  %p4850_p0 = scmp.lt.s32.totalorder %s53_s22, %s53_s22 }
  0x3f   :  { %p4846_p13 = scmp.ne.s32.totalorder %s53_s22, %s4845_s1  ;;  %p4851_p1 = scmp.lt.s32.totalorder %s4845_s1, %s4845_s1 }
  0x41   :  { %p4852_p2 = por %p4851_p1, %p4850_p0 }
  0x43   :  { %p4853_p3 = pnand %p4852_p2, %p4846_p13 }
  0x45   :  { %4856 = shalt.err (!%p4853_p3)
}
  0x46   :  { %58 = dma.hbm_to_vmem [thread:$0]  %s6354_s3, 1024, %s53_s22, [#allocation6], %s4938_s18, %s4938_s18, %s4939_s24  }
  0x47   :  { %s4857_s5 = scalar_lea.hbm %s6358_s7, 1024 }
  0x48   :  { %p4858_p4 = scmp.ne.s32.totalorder %s6358_s7, %s4857_s5  ;;  %p4861_p5 = scmp.lt.u32.totalorder %s4857_s5, %s6358_s7 }
  0x4a   :  { %p4863_p6 = pnand %p4861_p5, %p4858_p4 }
  0x4c   :  { %4866 = shalt.err (!%p4863_p6)
}
  0x4d   :  { %s4867_s26 = scalar_lea.vmem %s81_s2, 1024  ;;  %p4872_p8 = scmp.lt.s32.totalorder %s81_s2, %s81_s2 }
  0x4e   :  { %p4868_p7 = scmp.ne.s32.totalorder %s81_s2, %s4867_s26  ;;  %p4873_p9 = scmp.lt.s32.totalorder %s4867_s26, %s4867_s26 }
  0x50   :  { %p4874_p10 = por %p4873_p9, %p4872_p8 }
  0x52   :  { %p4875_p11 = pnand %p4874_p10, %p4868_p7 }
  0x54   :  { %4878 = shalt.err (!%p4875_p11)
}
  0x55   :  { %86 = dma.hbm_to_vmem [thread:$0]  %s6358_s7, 1024, %s81_s2, [#allocation9], %s4938_s18, %s4938_s18, %s4939_s24  }
  0x56   :  { %s4942_s29 = smov [#allocation11]   ;;  %s4879_s16 = scalar_lea.hbm %s6360_s9, 1024 }
  0x57   :  { %s94_s30 = sshll.u32 %s4942_s29, 4  ;;  %p4880_p12 = scmp.ne.s32.totalorder %s6360_s9, %s4879_s16  ;;  %s95_s30 = int_to_ptr.vmem [resolvable:$true] %s94_s30 }
  0x58   :  { %p4883_p13 = scmp.lt.u32.totalorder %s4879_s16, %s6360_s9 }
  0x5a   :  { %p4885_p0 = pnand %p4883_p13, %p4880_p12 }
  0x5c   :  { %4888 = shalt.err (!%p4885_p0)
}
  0x5d   :  { %s4889_s20 = scalar_lea.vmem %s95_s30, 1024  ;;  %p4894_p2 = scmp.lt.s32.totalorder %s95_s30, %s95_s30 }
  0x5e   :  { %p4890_p1 = scmp.ne.s32.totalorder %s95_s30, %s4889_s20  ;;  %p4895_p3 = scmp.lt.s32.totalorder %s4889_s20, %s4889_s20 }
  0x60   :  { %p4896_p4 = por %p4895_p3, %p4894_p2 }
  0x62   :  { %p4897_p5 = pnand %p4896_p4, %p4890_p1 }
  0x64   :  { %4900 = shalt.err (!%p4897_p5)
}
  0x65   :  { %100 = dma.hbm_to_vmem [thread:$0]  %s6360_s9, 1024, %s95_s30, [#allocation12], %s4938_s18, %s4938_s18, %s4939_s24  }
  0x66   :  { %4923 = dma.done.wait [#allocation3], 1024  }
  0x67   :  { %4924 = vsyncadd [#allocation3], 4294966272 }
  0x68   :  { %4925 = dma.done.wait [#allocation6], 2048  }
  0x69   :  { %4926 = vsyncadd [#allocation6], 4294965248 }
  0x6a   :  { %4927 = dma.done.wait [#allocation9], 2048  }
  0x6b   :  { %4928 = vsyncadd [#allocation9], 4294965248 }
  0x6c   :  { %4929 = dma.done.wait [#allocation12], 1024  }
  0x6d   :  { %4930 = vsyncadd [#allocation12], 4294966272  ;;  %v4943_v0 = vmov 0   ;;  %v4601_v1 = vld [vmem:[#allocation7] sm:$0xff]   ;;  %v4602_v2 = vld [vmem:[#allocation7 + $0x8] sm:$0xff]   ;;  %v560_v14 = vlaneseq  ;;  %v6363_v38 = vmov 0.0  }
  0x6e   :  { %4411 = vset.pattern.permute.xlu0 %v4943_v0  ;;  %4422 = vset.pattern.permute.xlu1 %v4943_v0  ;;  %v4603_v3 = vld [vmem:[#allocation7 + $0x10] sm:$0xff]   ;;  %v4608_v4 = vld [vmem:[#allocation10] sm:$0xff]   ;;  %v4604_v5 = vld [vmem:[#allocation7 + $0x18] sm:$0xff]   ;;  %vm4945_vm8 = vmmov 0  }
  0x6f   :  { %3884 = vmatprep.subr.bf16.mxu1 %v4601_v1  ;;  %3932 = vmatprep.subr.bf16.mxu0 %v4608_v4  ;;  %v4610_v6 = vld [vmem:[#allocation10 + $0x8] sm:$0xff]   ;;  %v124_v7 = vld [vmem:[#allocation2] sm:$0xff]  ;;  %v4612_v11 = vld [vmem:[#allocation10 + $0x10] sm:$0xff]   ;;  %v5101_v17 = vshrl.u32 %v560_v14, 7 }
  0x70   :  { %3885 = vmatpush3.bf16.msra.mxu1 %v4601_v1  ;;  %3933 = vmatpush3.bf16.msra.mxu0 %v4608_v4  ;;  %v125_v8 = vld [vmem:[#allocation2 + $0x8] sm:$0xff]  ;;  %v4605_v10 = vld [vmem:[#allocation7 + $0x20] sm:$0xff]   ;;  %v4614_v12 = vld [vmem:[#allocation10 + $0x18] sm:$0xff]  }
  0x71   :  { %3886 = vmatprep.subr.bf16.mxu1 %v4602_v2  ;;  %3934 = vmatprep.subr.bf16.mxu0 %v4610_v6  ;;  %v140_v9 = vpack.c.bf16 %v125_v8, %v124_v7  ;;  %v4606_v13 = vld [vmem:[#allocation7 + $0x28] sm:$0xff]   ;;  %v4616_v15 = vld [vmem:[#allocation10 + $0x20] sm:$0xff]   ;;  %v4607_v16 = vld [vmem:[#allocation7 + $0x30] sm:$0xff]   ;;  %v562_v26 = vadd.s32 8, %v5101_v17  ;;  %v5143_v7 = vsub.s32 0, %v5101_v17 }
  0x72   :  { %v4618_v18 = vld [vmem:[#allocation10 + $0x28] sm:$0xff]   ;;  %v4609_v19 = vld [vmem:[#allocation7 + $0x38] sm:$0xff]   ;;  %v126_v20 = vld [vmem:[#allocation2 + $0x10] sm:$0xff] }
  0x73   :  { %3900 = vmatprep.mubr.bf16.mxu1 %v140_v9  ;;  %v127_v21 = vld [vmem:[#allocation2 + $0x18] sm:$0xff]  ;;  %v132_v22 = vld [vmem:[#allocation5] sm:$0xff]  ;;  %v4620_v23 = vld [vmem:[#allocation10 + $0x30] sm:$0xff]  }
  0x74   :  { %3887 = vmatpush3.bf16.msra.mxu1 %v4602_v2  ;;  %3935 = vmatpush3.bf16.msra.mxu0 %v4610_v6  ;;  %v128_v24 = vld [vmem:[#allocation2 + $0x20] sm:$0xff]  ;;  %v133_v25 = vld [vmem:[#allocation5 + $0x8] sm:$0xff]  ;;  %v3591_v30 = vld [vmem:[%s6351_s0] ss:$0 sm:$0xff]  ;;  %v141_v32 = vpack.c.bf16 %v127_v21, %v126_v20  ;;  %v844_v6 = vand.u32 127, %v560_v14 }
  0x75   :  { %3888 = vmatprep.subr.bf16.mxu1 %v4603_v3  ;;  %3936 = vmatprep.subr.bf16.mxu0 %v4612_v11  ;;  %v129_v27 = vld [vmem:[#allocation2 + $0x28] sm:$0xff]  ;;  %v5104_v28 = vpack.c.bf16 %v133_v25, %v132_v22  ;;  %v4611_v29 = vld [vmem:[#allocation8] sm:$0xff]   ;;  %v3592_v31 = vld [vmem:[%s6351_s0 + $0x1] ss:$0 sm:$0xff]  ;;  %vm579_vm0 = vcmp.lt.s32.totalorder %v5101_v17, %v3591_v30  ;;  %vm580_vm1 = vcmp.lt.s32.totalorder %v562_v26, %v3591_v30 }
  0x76   :  { %v142_v33 = vpack.c.bf16 %v129_v27, %v128_v24  ;;  %v3593_v34 = vld [vmem:[%s6351_s0 + $0x2] ss:$0 sm:$0xff]  ;;  %v3594_v35 = vld [vmem:[%s6351_s0 + $0x3] ss:$0 sm:$0xff]  ;;  %v4613_v36 = vld [vmem:[#allocation8 + $0x8] sm:$0xff]   ;;  %v3595_v39 = vsel %vm579_vm0, 1.0, %v6363_v38  ;;  %vm581_vm2 = vcmp.lt.s32.totalorder %v5101_v17, %v3592_v31  ;;  %vm582_vm3 = vcmp.lt.s32.totalorder %v562_v26, %v3592_v31 }
  0x77   :  { %3948 = vmatprep.mubr.bf16.mxu0 %v5104_v28  ;;  %v4622_v37 = vld [vmem:[#allocation10 + $0x38] sm:$0xff]   ;;  %v3596_v40 = vsel %vm580_vm1, 1.0, %v6363_v38  ;;  %v134_v41 = vld [vmem:[#allocation5 + $0x10] sm:$0xff]  ;;  %vm583_vm4 = vcmp.lt.s32.totalorder %v5101_v17, %v3593_v34  ;;  %vm584_vm5 = vcmp.lt.s32.totalorder %v562_v26, %v3593_v34  ;;  %vm585_vm6 = vcmp.lt.s32.totalorder %v5101_v17, %v3594_v35  ;;  %v136_v52 = vld [vmem:[#allocation5 + $0x20] sm:$0xff] }
  0x78   :  { %3889 = vmatpush3.bf16.msra.mxu1 %v4603_v3  ;;  %3937 = vmatpush3.bf16.msra.mxu0 %v4612_v11  ;;  %v135_v42 = vld [vmem:[#allocation5 + $0x18] sm:$0xff]  ;;  %v130_v43 = vld [vmem:[#allocation2 + $0x30] sm:$0xff]  ;;  %v4412_v45 = vpack.i.bf16 %v3596_v40, %v3595_v39  ;;  %v3599_v46 = vsel %vm583_vm4, 1.0, %v6363_v38  ;;  %v3600_v47 = vsel %vm584_vm5, 1.0, %v6363_v38  ;;  %v3597_v49 = vsel %vm581_vm2, 1.0, %v6363_v38  ;;  %v137_v53 = vld [vmem:[#allocation5 + $0x28] sm:$0xff] }
  0x79   :  { %3890 = vmatprep.subr.bf16.mxu1 %v4604_v5  ;;  %3938 = vmatprep.subr.bf16.mxu0 %v4614_v12  ;;  %v131_v44 = vld [vmem:[#allocation2 + $0x38] sm:$0xff]  ;;  %v4615_v48 = vld [vmem:[#allocation8 + $0x10] sm:$0xff]   ;;  %v3598_v50 = vsel %vm582_vm3, 1.0, %v6363_v38  ;;  %v4423_v51 = vpack.i.bf16 %v3600_v47, %v3599_v46  ;;  %vm586_vm7 = vcmp.lt.s32.totalorder %v562_v26, %v3594_v35  ;;  %v3601_v54 = vsel %vm585_vm6, 1.0, %v6363_v38  ;;  %v4619_v62 = vld [vmem:[#allocation8 + $0x20] sm:$0xff]  }
  0x7a   :  { %v3602_v55 = vsel %vm586_vm7, 1.0, %v6363_v38  ;;  %v145_v56 = vpack.c.bf16 %v135_v42, %v134_v41  ;;  %4413 = vperm.xlu0 %4411, %v4412_v45   ;;  %v4417_v57 = vpack.i.bf16 %v3598_v50, %v3597_v49  ;;  %v143_v58 = vpack.c.bf16 %v131_v44, %v130_v43  ;;  %v4617_v59 = vld [vmem:[#allocation8 + $0x18] sm:$0xff]   ;;  %v138_v63 = vld [vmem:[#allocation5 + $0x30] sm:$0xff]  ;;  %v4621_v3 = vld [vmem:[#allocation8 + $0x28] sm:$0xff]  }
  0x7b   :  { %4424 = vperm.xlu1 %4422, %v4423_v51   ;;  %v146_v60 = vpack.c.bf16 %v137_v53, %v136_v52  ;;  %v4428_v61 = vpack.i.bf16 %v3602_v55, %v3601_v54  ;;  %v139_v1 = vld [vmem:[#allocation5 + $0x38] sm:$0xff]  ;;  %v4623_v4 = vld [vmem:[#allocation8 + $0x30] sm:$0xff]   ;;  %vm1036_vm9 = vcmp.lt.s32.totalorder %v844_v6, 32  ;;  %vm2284_vm10 = vcmp.ge.s32.totalorder %v844_v6, 64 }
  0x7c   :  { %3891 = vmatpush3.bf16.msra.mxu1 %v4604_v5  ;;  %3939 = vmatpush3.bf16.msra.mxu0 %v4614_v12  ;;  %v147_v2 = vpack.c.bf16 %v139_v1, %v138_v63  ;;  %v4624_v5 = vld [vmem:[#allocation8 + $0x38] sm:$0xff]   ;;  %vm2285_vm11 = vcmp.lt.s32.totalorder %v844_v6, 96  ;;  %vm1040_vm12 = vmpackc.low %vm1036_vm9, %vm1036_vm9  ;;  %vm2916_vm13 = vcmp.ge.s32.totalorder %v844_v6, 96  ;;  %vm1484_vm1 = vcmp.ge.s32.totalorder %v844_v6, 32 }
  0x7d   :  { %3892 = vmatprep.subr.bf16.mxu1 %v4605_v10  ;;  %3940 = vmatprep.subr.bf16.mxu0 %v4616_v15  ;;  %v5146_v8 = vsel %vm1040_vm12, 65537, %v4943_v0  ;;  %vm2286_vm14 = vmand %vm2284_vm10, %vm2285_vm11  ;;  %vm1485_vm2 = vcmp.lt.s32.totalorder %v844_v6, 64  ;;  %vm4946_vm10 = vmmov 1  }
  0x7e   :  { %4418 = vperm.xlu0 %4411, %v4417_v57   ;;  %v1045_v9 = vrot.slane %v5146_v8, %v5143_v7  ;;  %vm2289_vm15 = vmpackc.low %vm2286_vm14, %vm2286_vm14  ;;  %v6411_v8 = vmov 0 }
  0x7f   :  { %4429 = vperm.xlu1 %4422, %v4428_v61   ;;  %vm2921_vm0 = vmpackc.low %vm2916_vm13, %vm2916_vm13 }
  0x80   :  { %3893 = vmatpush3.bf16.msra.mxu1 %v4605_v10  ;;  %3941 = vmatpush3.bf16.msra.mxu0 %v4616_v15  ;;  %v5151_v10 = vsel %vm2289_vm15, 65537, %v4943_v0  ;;  %v5156_v12 = vsel %vm2921_vm0, 65537, %v4943_v0  ;;  %vm5163_vm3 = vmand %vm1484_vm1, %vm1485_vm2  ;;  %vm5213_vm6 = vcmp.ne.s16.totalorder %v1045_v9, 0  ;;  %vm1215_vm15 = vcmask 130048  }
  0x81   :  { %3894 = vmatprep.subr.bf16.mxu1 %v4606_v13  ;;  %3942 = vmatprep.subr.bf16.mxu0 %v4618_v18  ;;  %v2294_v11 = vrot.slane %v5151_v10, %v5143_v7  ;;  %vm1489_vm4 = vmpackc.low %vm5163_vm3, %vm5163_vm3 }
  0x82   :  { %v1490_v34 = vsel %vm1489_vm4, 65537, %v4943_v0  ;;  %vm939_vm11 = vmpackc.low %vm4946_vm10, %vm4946_vm10 }
  0x83   :  { %v1494_v44 = vrot.slane %v1490_v34, %v5143_v7  ;;  %vm5225_vm7 = vcmp.ne.s16.totalorder %v2294_v11, 0  ;;  %vm943_vm12 = vmpackc.low %vm4945_vm8, %vm4945_vm8 }
  0x84   :  { %3895 = vmatpush3.bf16.msra.mxu1 %v4606_v13  ;;  %3943 = vmatpush3.bf16.msra.mxu0 %v4618_v18  ;;  %v2926_v13 = vrot.slane %v5156_v12, %v5143_v7 }
  0x85   :  { %3896 = vmatprep.subr.bf16.mxu1 %v4607_v16  ;;  %3944 = vmatprep.subr.bf16.mxu0 %v4620_v23  ;;  %vm5204_vm5 = vcmp.ne.s16.totalorder %v1494_v44, 0 }
  0x86   :  { %vm5232_vm9 = vcmp.ne.s16.totalorder %v2926_v13, 0 }
  0x87   :  { %v6412_v8 = vsel %vm5232_vm9, 4294967295, %v6411_v8 }
  0x88   :  { %3897 = vmatpush3.bf16.msra.mxu1 %v4607_v16  ;;  %3945 = vmatpush3.bf16.msra.mxu0 %v4620_v23  ;;  %v3564_v16 = vld [vmem:[%s6355_s4] ss:$0 sm:$0xff]  ;;  %6413 = vst [vmem:[#allocation20_spill] sm:$0xff] %v6412_v8 }
  0x89   :  { %3898 = vmatprep.subr.bf16.mxu1 %v4609_v19  ;;  %3946 = vmatprep.subr.bf16.mxu0 %v4622_v37 }
  0x8c   :  { %3899 = vmatpush3.bf16.msra.mxu1 %v4609_v19  ;;  %3947 = vmatpush3.bf16.msra.mxu0 %v4622_v37  ;;  %v3582_v37 = vld [vmem:[%s6359_s8] ss:$0 sm:$0xff] }
  0x8d   :  { %3908 = vmatprep.subr.bf16.mxu1 %v4611_v29  ;;  %3976 = vmatprep.subr.bf16.mxu0 %v6363_v38 }
  0x8f   :  { %3901 = vmatmul.mubr.bf16.vlgmr.msra.gmra.mrb[0].mxu1 %v141_v32  ;;  %3949 = vmatmul.mubr.bf16.vlgmr.msra.gmra.mrb[0].mxu0 %v145_v56 }
  0x90   :  { %3909 = vmatpush3.bf16.msra.mxu1 %v4611_v29  ;;  %3904 = vmatprep.mubr.bf16.mxu1 %v142_v33 }
  0x91   :  { %3910 = vmatprep.subr.bf16.mxu1 %v4613_v36  ;;  %3952 = vmatprep.mubr.bf16.mxu0 %v146_v60 }
  0x94   :  { %3911 = vmatpush3.bf16.msra.mxu1 %v4613_v36 }
  0x95   :  { %3912 = vmatprep.subr.bf16.mxu1 %v4615_v48 }
  0x97   :  { %3905 = vmatmul.mubr.bf16.gmra.mrb[4].mxu1 %v143_v58  ;;  %3953 = vmatmul.mubr.bf16.gmra.mrb[4].mxu0 %v147_v2 }
  0x98   :  { %3913 = vmatpush3.bf16.msra.mxu1 %v4615_v48  ;;  %3924 = vmatprep.mubr.bf16.mxu1 %v5104_v28 }
  0x99   :  { %3914 = vmatprep.subr.bf16.mxu1 %v4617_v59  ;;  %3992 = vmatprep.mubr.msk.bf16.mxu0 %vm4945_vm8, %v6363_v38 }
  0x9c   :  { %3915 = vmatpush3.bf16.msra.mxu1 %v4617_v59 }
  0x9d   :  { %3916 = vmatprep.subr.bf16.mxu1 %v4619_v62 }
  0xa0   :  { %3917 = vmatpush3.bf16.msra.mxu1 %v4619_v62 }
  0xa1   :  { %3918 = vmatprep.subr.bf16.mxu1 %v4621_v3 }
  0xa4   :  { %3919 = vmatpush3.bf16.msra.mxu1 %v4621_v3 }
  0xa5   :  { %3920 = vmatprep.subr.bf16.mxu1 %v4623_v4 }
  0xa8   :  { %3921 = vmatpush3.bf16.msra.mxu1 %v4623_v4 }
  0xa9   :  { %3922 = vmatprep.subr.bf16.mxu1 %v4624_v5 }
  0xac   :  { %3923 = vmatpush3.bf16.msra.mxu1 %v4624_v5 }
  0xad   :  { %3956 = vmatprep.subr.bf16.mxu1 %v6363_v38 }
  0xaf   :  { %3925 = vmatmul.mubr.bf16.vlgmr.msra.gmra.mrb[8].mxu1 %v145_v56 }
  0xb0   :  { %3928 = vmatprep.mubr.bf16.mxu1 %v146_v60 }
  0xb7   :  { %3929 = vmatmul.mubr.bf16.gmra.mrb[12].mxu1 %v147_v2 }
  0xb8   :  { %3972 = vmatprep.mubr.msk.bf16.mxu1 %vm4945_vm8, %v6363_v38 }
  0xf9   :  { %v4414_v14 = vpop.permute.xlu0 %4413 }
  0xfa   :  { %v4425_v17 = vpop.permute.xlu1 %4424  ;;  %v5169_v20 = vunpack.i.l.bf16 %v4414_v14  ;;  %v5176_v25 = vunpack.i.h.bf16 %v4414_v14 }
  0xfb   :  { %v5186_v41 = vunpack.i.h.bf16 %v4425_v17  ;;  %v5191_v47 = vunpack.i.l.bf16 %v4425_v17 }
  0xfd   :  { %v4419_v15 = vpop.permute.xlu0 %4418 }
  0xfe   :  { %v5167_v19 = vunpack.i.l.bf16 %v4419_v15  ;;  %v5171_v23 = vunpack.i.h.bf16 %v4419_v15  ;;  %v4430_v33 = vpop.permute.xlu1 %4429 }
  0xff   :  { %v5188_v42 = vunpack.i.l.bf16 %v4430_v33  ;;  %v5195_v54 = vunpack.i.h.bf16 %v4430_v33 }
 0x162   :  { %v3902_v21 = vpop.f32.mrb[0].mxu1  ;;  %v3950_v43 = vpop.f32.mrb[0].mxu0 }
 0x163   :  { %v262_v22 = vadd.f32 %v3902_v21, %v3564_v16  ;;  %v253_v24 = vpop.f32.mrb[1].mxu1  ;;  %v534_v49 = vadd.f32 %v3950_v43, %v3582_v37  ;;  %v525_v50 = vpop.f32.mrb[1].mxu0 }
 0x164   :  { %v254_v26 = vadd.f32 %v3564_v16, %v253_v24  ;;  %v3903_v27 = vpop.f32.mrb[2].mxu1  ;;  %v526_v55 = vadd.f32 %v3582_v37, %v525_v50  ;;  %v3951_v56 = vpop.f32.mrb[2].mxu0 }
 0x165   :  { %v265_v28 = vadd.f32 %v3903_v27, %v3564_v16  ;;  %v645_v29 = vmul.f32 %v5167_v19, %v262_v22  ;;  %v256_v30 = vpop.f32.mrb[3].mxu1  ;;  %v661_v60 = vmul.f32 %v5167_v19, %v534_v49  ;;  %v537_v61 = vadd.f32 %v3951_v56, %v3582_v37  ;;  %v528_v62 = vpop.f32.mrb[3].mxu0 }
 0x166   :  { %v643_v31 = vmul.f32 %v5169_v20, %v254_v26  ;;  %v257_v32 = vadd.f32 %v3564_v16, %v256_v30  ;;  %v659_v3 = vmul.f32 %v5169_v20, %v526_v55  ;;  %v529_v4 = vadd.f32 %v3582_v37, %v528_v62 }
 0x167   :  { %v646_v35 = vmul.f32 %v5171_v23, %v265_v28  ;;  %v669_v36 = vmul.f32 0.088388346, %v645_v29  ;;  %v662_v14 = vmul.f32 %v5171_v23, %v537_v61  ;;  %v6408_v30 = vmov 0 }
 0x168   :  { %v644_v39 = vmul.f32 %v5176_v25, %v257_v32  ;;  %v667_v45 = vmul.f32 0.088388346, %v643_v31  ;;  %v660_v21 = vmul.f32 %v5176_v25, %v529_v4  ;;  %v6409_v30 = vsel %vm5225_vm7, 4294967295, %v6408_v30 }
 0x169   :  { %v670_v40 = vmul.f32 0.088388346, %v646_v35  ;;  %v5218_v26 = vpack.c.bf16 %v662_v14, %v661_v60  ;;  %6410 = vst [vmem:[#allocation19_spill] sm:$0xff] %v6409_v30 }
 0x16a   :  { %v668_v46 = vmul.f32 0.088388346, %v644_v39  ;;  %v3906_v48 = vpop.f32.mrb[4].mxu1  ;;  %v5220_v28 = vpack.c.bf16 %v660_v21, %v659_v3  ;;  %v3954_v29 = vpop.f32.mrb[4].mxu0 }
 0x16b   :  { %v5193_v51 = vpack.c.bf16 %v670_v40, %v669_v36  ;;  %v278_v52 = vadd.f32 %v3906_v48, %v3564_v16  ;;  %v269_v53 = vpop.f32.mrb[5].mxu1  ;;  %v550_v31 = vadd.f32 %v3954_v29, %v3582_v37  ;;  %v541_v32 = vpop.f32.mrb[5].mxu0 }
 0x16c   :  { %v5197_v57 = vpack.c.bf16 %v668_v46, %v667_v45  ;;  %v270_v58 = vadd.f32 %v3564_v16, %v269_v53  ;;  %v3907_v59 = vpop.f32.mrb[6].mxu1  ;;  %v542_v11 = vadd.f32 %v3582_v37, %v541_v32  ;;  %v3955_v34 = vpop.f32.mrb[6].mxu0 }
 0x16d   :  { %v281_v63 = vadd.f32 %v3907_v59, %v3564_v16  ;;  %v649_v1 = vmul.f32 %v5188_v42, %v278_v52  ;;  %v272_v2 = vpop.f32.mrb[7].mxu1  ;;  %v665_v36 = vmul.f32 %v5188_v42, %v550_v31  ;;  %v553_v39 = vadd.f32 %v3955_v34, %v3582_v37  ;;  %v544_v40 = vpop.f32.mrb[7].mxu0 }
 0x16e   :  { %v647_v5 = vmul.f32 %v5191_v47, %v270_v58  ;;  %v273_v6 = vadd.f32 %v3564_v16, %v272_v2  ;;  %v663_v44 = vmul.f32 %v5191_v47, %v542_v11  ;;  %v545_v45 = vadd.f32 %v3582_v37, %v544_v40 }
 0x16f   :  { %v650_v17 = vmul.f32 %v5195_v54, %v281_v63  ;;  %v673_v18 = vmul.f32 0.088388346, %v649_v1  ;;  %v666_v49 = vmul.f32 %v5195_v54, %v553_v39  ;;  %v3573_v1 = vld [vmem:[%s6357_s6] ss:$0 sm:$0xff] }
 0x170   :  { %v671_v24 = vmul.f32 0.088388346, %v647_v5  ;;  %v648_v16 = vmul.f32 %v5186_v41, %v273_v6  ;;  %v664_v52 = vmul.f32 %v5186_v41, %v545_v45 }
 0x171   :  { %v674_v27 = vmul.f32 0.088388346, %v650_v17  ;;  %v5268_v53 = vpack.c.bf16 %v666_v49, %v665_v36 }
 0x172   :  { %v672_v9 = vmul.f32 0.088388346, %v648_v16  ;;  %v5270_v55 = vpack.c.bf16 %v664_v52, %v663_v44 }
 0x173   :  { %v5242_v35 = vpack.c.bf16 %v674_v27, %v673_v18 }
 0x174   :  { %v5250_v13 = vpack.c.bf16 %v672_v9, %v671_v24 }
 0x175   :  { %6414 = vst [vmem:[#allocation21_spill] sm:$0xff] %v5242_v35 }
 0x176   :  { %6415 = vst [vmem:[#allocation22_spill] sm:$0xff] %v5250_v13 }
 0x182   :  { %v3926_v2 = vpop.f32.mrb[8].mxu1 }
 0x183   :  { %v398_v3 = vadd.f32 %v3926_v2, %v3573_v1  ;;  %v389_v4 = vpop.f32.mrb[9].mxu1  ;;  %v959_v2 = vsel %vm943_vm12, 65537, %v4943_v0 }
 0x184   :  { %v390_v5 = vadd.f32 %v3573_v1, %v389_v4  ;;  %v3927_v6 = vpop.f32.mrb[10].mxu1 }
 0x185   :  { %v653_v14 = vmul.f32 %v5167_v19, %v398_v3  ;;  %v401_v17 = vadd.f32 %v3927_v6, %v3573_v1  ;;  %v392_v18 = vpop.f32.mrb[11].mxu1  ;;  %v6516_v6 = vsel %vm5232_vm9, %v5218_v26, 0 }
 0x186   :  { %v651_v21 = vmul.f32 %v5169_v20, %v390_v5  ;;  %v393_v24 = vadd.f32 %v3573_v1, %v392_v18 }
 0x187   :  { %v654_v16 = vmul.f32 %v5171_v23, %v401_v17 }
 0x188   :  { %v652_v27 = vmul.f32 %v5176_v25, %v393_v24  ;;  %v4433_v29 = vpack.i.bf16 %v653_v14, %v651_v21 }
 0x18a   :  { %v4435_v9 = vpack.i.bf16 %v654_v16, %v652_v27  ;;  %4434 = vxpose.xlu0.b32.start [1/2] (short) %v4433_v29, 128  ;;  %v3930_v31 = vpop.f32.mrb[12].mxu1 }
 0x18b   :  { %v414_v32 = vadd.f32 %v3930_v31, %v3573_v1  ;;  %v405_v11 = vpop.f32.mrb[13].mxu1 }
 0x18c   :  { %v406_v34 = vadd.f32 %v3573_v1, %v405_v11  ;;  %v3931_v36 = vpop.f32.mrb[14].mxu1 }
 0x18d   :  { %v657_v39 = vmul.f32 %v5188_v42, %v414_v32  ;;  %v417_v19 = vadd.f32 %v3931_v36, %v3573_v1  ;;  %v408_v40 = vpop.f32.mrb[15].mxu1  ;;  %v955_v42 = vsel %vm939_vm11, 65537, %v4943_v0 }
 0x18e   :  { %4436 = vxpose.xlu0.b32.end [2/2] (short) %v4435_v9, 128  ;;  %v655_v20 = vmul.f32 %v5191_v47, %v406_v34  ;;  %v409_v44 = vadd.f32 %v3573_v1, %v408_v40  ;;  %v3603_v47 = vcombine.low %v955_v42, %v955_v42  ;;  %v3605_v1 = vcombine.low %v959_v2, %v959_v2 }
 0x18f   :  { %v658_v23 = vmul.f32 %v5195_v54, %v417_v19 }
 0x190   :  { %v656_v25 = vmul.f32 %v5186_v41, %v409_v44  ;;  %v4517_v45 = vpack.i.bf16 %v657_v39, %v655_v20  ;;  %vm5311_vm13 = vcmp.ne.s16.totalorder %v3603_v47, 0  ;;  %vm5315_vm14 = vcmp.ne.s16.totalorder %v3605_v1, 0 }
 0x192   :  { %v4519_v49 = vpack.i.bf16 %v658_v23, %v656_v25  ;;  %4518 = vxpose.xlu1.b32.start [1/2] (short) %v4517_v45, 128 }
 0x196   :  { %4520 = vxpose.xlu1.b32.end [2/2] (short) %v4519_v49, 128 }
 0x20a   :  { %v4437_v52 = vpop.trf.xlu0 }
 0x20b   :  { %v4441_v3 = vunpack.i.h.bf16 %v4437_v52  ;;  %v4438_v54 = vunpack.i.l.bf16 %v4437_v52 }
 0x20e   :  { %v4442_v4 = vpop.trf.xlu0 }
 0x20f   :  { %v4446_v41 = vunpack.i.h.bf16 %v4442_v4  ;;  %v4443_v5 = vunpack.i.l.bf16 %v4442_v4 }
 0x211   :  { %v811_v14 = vpack.c.bf16 %v4443_v5, %v4438_v54  ;;  %v819_v17 = vpack.c.bf16 %v4446_v41, %v4441_v3 }
 0x212   :  { %v4447_v21 = vpop.trf.xlu0  ;;  %v4521_v24 = vpop.trf.xlu1 }
 0x213   :  { %v1003_v0 = vsel %vm5311_vm13, %v811_v14, 0  ;;  %v1011_v16 = vsel %vm5311_vm13, %v819_v17, 0  ;;  %v5325_v27 = vsel %vm5315_vm14, %v811_v14, 0  ;;  %v5329_v29 = vsel %vm5315_vm14, %v819_v17, 0 }
 0x214   :  { %3957 = vmatpush3.bf16.msra.mxu1 %v1003_v0  ;;  %3977 = vmatpush3.bf16.msra.mxu0 %v1011_v16  ;;  %v4451_v9 = vunpack.i.h.bf16 %v4447_v21  ;;  %v4448_v31 = vunpack.i.l.bf16 %v4447_v21  ;;  %v4525_v11 = vunpack.i.h.bf16 %v4521_v24  ;;  %v4522_v34 = vunpack.i.l.bf16 %v4521_v24 }
 0x215   :  { %3958 = vmatprep.subr.bf16.mxu1 %v6363_v38  ;;  %3978 = vmatprep.subr.bf16.mxu0 %v6363_v38 }
 0x216   :  { %v4452_v32 = vpop.trf.xlu0  ;;  %v4526_v36 = vpop.trf.xlu1 }
 0x217   :  { %v4456_v39 = vunpack.i.h.bf16 %v4452_v32  ;;  %v4453_v19 = vunpack.i.l.bf16 %v4452_v32  ;;  %v4530_v40 = vunpack.i.h.bf16 %v4526_v36  ;;  %v4527_v20 = vunpack.i.l.bf16 %v4526_v36 }
 0x219   :  { %v812_v44 = vpack.c.bf16 %v4453_v19, %v4448_v31  ;;  %v820_v23 = vpack.c.bf16 %v4456_v39, %v4451_v9  ;;  %v5333_v49 = vpack.c.bf16 %v4527_v20, %v4522_v34  ;;  %v5335_v42 = vpack.c.bf16 %v4530_v40, %v4525_v11 }
 0x21a   :  { %v4457_v25 = vpop.trf.xlu0  ;;  %v4531_v45 = vpop.trf.xlu1 }
 0x21b   :  { %v4461_v52 = vunpack.i.h.bf16 %v4457_v25  ;;  %v1004_v2 = vsel %vm5311_vm13, %v812_v44, 0  ;;  %v1012_v47 = vsel %vm5311_vm13, %v820_v23, 0  ;;  %v4458_v1 = vunpack.i.l.bf16 %v4457_v25 }
 0x21c   :  { %3959 = vmatpush3.bf16.msra.mxu1 %v1004_v2  ;;  %3979 = vmatpush3.bf16.msra.mxu0 %v1012_v47  ;;  %v4535_v3 = vunpack.i.h.bf16 %v4531_v45  ;;  %v4532_v54 = vunpack.i.l.bf16 %v4531_v45  ;;  %v5345_v5 = vsel %vm5315_vm14, %v812_v44, 0  ;;  %v5349_v14 = vsel %vm5315_vm14, %v820_v23, 0 }
 0x21d   :  { %3960 = vmatprep.subr.bf16.mxu1 %v6363_v38  ;;  %3980 = vmatprep.subr.bf16.mxu0 %v6363_v38  ;;  %v5354_v17 = vsel %vm5315_vm14, %v5333_v49, 0  ;;  %v5359_v21 = vsel %vm5315_vm14, %v5335_v42, 0 }
 0x21e   :  { %v4462_v4 = vpop.trf.xlu0  ;;  %v4536_v41 = vpop.trf.xlu1 }
 0x21f   :  { %v4466_v24 = vunpack.i.h.bf16 %v4462_v4  ;;  %v4463_v0 = vunpack.i.l.bf16 %v4462_v4  ;;  %v4540_v16 = vunpack.i.h.bf16 %v4536_v41  ;;  %v4537_v9 = vunpack.i.l.bf16 %v4536_v41 }
 0x221   :  { %v5361_v31 = vpack.c.bf16 %v4463_v0, %v4458_v1  ;;  %v5363_v32 = vpack.c.bf16 %v4466_v24, %v4461_v52  ;;  %v5365_v36 = vpack.c.bf16 %v4537_v9, %v4532_v54  ;;  %v5367_v39 = vpack.c.bf16 %v4540_v16, %v4535_v3 }
 0x222   :  { %v4467_v11 = vpop.trf.xlu0  ;;  %v4541_v34 = vpop.trf.xlu1 }
 0x223   :  { %v4471_v19 = vunpack.i.h.bf16 %v4467_v11  ;;  %v5372_v40 = vsel %vm5315_vm14, %v5361_v31, 0  ;;  %v5377_v20 = vsel %vm5315_vm14, %v5363_v32, 0  ;;  %v4468_v44 = vunpack.i.l.bf16 %v4467_v11 }
 0x224   :  { %6420 = vst [vmem:[#allocation23_spill] sm:$0xff] %v5377_v20  ;;  %3961 = vmatpush3.bf16.msra.mxu1 %v5372_v40  ;;  %3981 = vmatpush3.bf16.msra.mxu0 %v5377_v20  ;;  %v4545_v23 = vunpack.i.h.bf16 %v4541_v34  ;;  %v4542_v25 = vunpack.i.l.bf16 %v4541_v34  ;;  %v5392_v1 = vsel %vm5315_vm14, %v5365_v36, 0  ;;  %v5397_v3 = vsel %vm5315_vm14, %v5367_v39, 0 }
 0x225   :  { %3962 = vmatprep.subr.bf16.mxu1 %v6363_v38  ;;  %3982 = vmatprep.subr.bf16.mxu0 %v6363_v38  ;;  %v6448_v18 = vsel %vm5311_vm13, %v5361_v31, 0 }
 0x226   :  { %v4472_v45 = vpop.trf.xlu0  ;;  %v4546_v52 = vpop.trf.xlu1 }
 0x227   :  { %v4476_v54 = vunpack.i.h.bf16 %v4472_v45  ;;  %v4473_v4 = vunpack.i.l.bf16 %v4472_v45  ;;  %v4550_v41 = vunpack.i.h.bf16 %v4546_v52  ;;  %v4547_v24 = vunpack.i.l.bf16 %v4546_v52 }
 0x229   :  { %v5399_v0 = vpack.c.bf16 %v4473_v4, %v4468_v44  ;;  %v5401_v16 = vpack.c.bf16 %v4476_v54, %v4471_v19  ;;  %v5403_v34 = vpack.c.bf16 %v4547_v24, %v4542_v25  ;;  %v5405_v59 = vpack.c.bf16 %v4550_v41, %v4545_v23 }
 0x22a   :  { %v4477_v9 = vpop.trf.xlu0  ;;  %v4551_v11 = vpop.trf.xlu1 }
 0x22b   :  { %v4481_v63 = vunpack.i.h.bf16 %v4477_v9  ;;  %v5410_v50 = vsel %vm5315_vm14, %v5399_v0, 0  ;;  %v5415_v45 = vsel %vm5315_vm14, %v5401_v16, 0  ;;  %v4478_v44 = vunpack.i.l.bf16 %v4477_v9  ;;  %v6464_v22 = vld [vmem:[#allocation23_spill] sm:$0xff] }
 0x22c   :  { %6421 = vst [vmem:[#allocation24_spill] sm:$0xff] %v5415_v45  ;;  %3963 = vmatpush3.bf16.msra.mxu1 %v5410_v50  ;;  %3983 = vmatpush3.bf16.msra.mxu0 %v5415_v45  ;;  %v4555_v19 = vunpack.i.h.bf16 %v4551_v11  ;;  %v4552_v25 = vunpack.i.l.bf16 %v4551_v11  ;;  %v6452_v31 = vsel %vm5311_vm13, %v5403_v34, 0 }
 0x22d   :  { %3964 = vmatprep.subr.bf16.mxu1 %v6363_v38  ;;  %3984 = vmatprep.subr.bf16.mxu0 %v6363_v38 }
 0x22e   :  { %v4482_v23 = vpop.trf.xlu0  ;;  %v4556_v52 = vpop.trf.xlu1 }
 0x22f   :  { %v4486_v9 = vunpack.i.h.bf16 %v4482_v23  ;;  %v4483_v11 = vunpack.i.l.bf16 %v4482_v23  ;;  %v4560_v48 = vunpack.i.h.bf16 %v4556_v52  ;;  %v4557_v58 = vunpack.i.l.bf16 %v4556_v52 }
 0x231   :  { %v5433_v62 = vpack.c.bf16 %v4483_v11, %v4478_v44  ;;  %v5435_v46 = vpack.c.bf16 %v4486_v9, %v4481_v63  ;;  %v5437_v61 = vpack.c.bf16 %v4557_v58, %v4552_v25  ;;  %v5439_v10 = vpack.c.bf16 %v4560_v48, %v4555_v19 }
 0x232   :  { %v4487_v43 = vpop.trf.xlu0  ;;  %v4561_v56 = vpop.trf.xlu1 }
 0x233   :  { %6422 = vst [vmem:[#allocation25_spill] sm:$0xff] %v5433_v62  ;;  %6423 = vst [vmem:[#allocation26_spill] sm:$0xff] %v5435_v46  ;;  %v4491_v12 = vunpack.i.h.bf16 %v4487_v43  ;;  %v5444_v37 = vsel %vm5315_vm14, %v5433_v62, 0  ;;  %v5449_v23 = vsel %vm5315_vm14, %v5435_v46, 0  ;;  %v4488_v44 = vunpack.i.l.bf16 %v4487_v43 }
 0x234   :  { %6424 = vst [vmem:[#allocation27_spill] sm:$0xff] %v5444_v37  ;;  %6425 = vst [vmem:[#allocation28_spill] sm:$0xff] %v5449_v23  ;;  %3965 = vmatpush3.bf16.msra.mxu1 %v5444_v37  ;;  %3985 = vmatpush3.bf16.msra.mxu0 %v5449_v23  ;;  %v4565_v58 = vunpack.i.h.bf16 %v4561_v56  ;;  %v4562_v63 = vunpack.i.l.bf16 %v4561_v56 }
 0x235   :  { %3966 = vmatprep.subr.bf16.mxu1 %v6363_v38  ;;  %3986 = vmatprep.subr.bf16.mxu0 %v6363_v38 }
 0x236   :  { %v4492_v48 = vpop.trf.xlu0  ;;  %v4566_v19 = vpop.trf.xlu1 }
 0x237   :  { %v4496_v9 = vunpack.i.h.bf16 %v4492_v48  ;;  %v4493_v11 = vunpack.i.l.bf16 %v4492_v48  ;;  %v4570_v60 = vunpack.i.h.bf16 %v4566_v19  ;;  %v4567_v33 = vunpack.i.l.bf16 %v4566_v19 }
 0x239   :  { %v5467_v7 = vpack.c.bf16 %v4493_v11, %v4488_v44  ;;  %v5469_v24 = vpack.c.bf16 %v4496_v9, %v4491_v12  ;;  %v5471_v4 = vpack.c.bf16 %v4567_v33, %v4562_v63  ;;  %v5473_v43 = vpack.c.bf16 %v4570_v60, %v4565_v58 }
 0x23a   :  { %v4497_v25 = vpop.trf.xlu0  ;;  %v4571_v41 = vpop.trf.xlu1 }
 0x23b   :  { %6426 = vst [vmem:[#allocation29_spill] sm:$0xff] %v5467_v7  ;;  %6427 = vst [vmem:[#allocation30_spill] sm:$0xff] %v5469_v24  ;;  %v4501_v54 = vunpack.i.h.bf16 %v4497_v25  ;;  %v5478_v52 = vsel %vm5315_vm14, %v5467_v7, 0  ;;  %v5483_v48 = vsel %vm5315_vm14, %v5469_v24, 0  ;;  %v4498_v44 = vunpack.i.l.bf16 %v4497_v25 }
 0x23c   :  { %6428 = vst [vmem:[#allocation31_spill] sm:$0xff] %v5478_v52  ;;  %6429 = vst [vmem:[#allocation32_spill] sm:$0xff] %v5483_v48  ;;  %3967 = vmatpush3.bf16.msra.mxu1 %v5478_v52  ;;  %3987 = vmatpush3.bf16.msra.mxu0 %v5483_v48  ;;  %v4575_v33 = vunpack.i.h.bf16 %v4571_v41  ;;  %v4572_v12 = vunpack.i.l.bf16 %v4571_v41 }
 0x23d   :  { %3968 = vmatprep.subr.bf16.mxu1 %v6363_v38  ;;  %3988 = vmatprep.subr.bf16.mxu0 %v6363_v38 }
 0x23e   :  { %v4502_v60 = vpop.trf.xlu0  ;;  %v4576_v58 = vpop.trf.xlu1 }
 0x23f   :  { %v4506_v9 = vunpack.i.h.bf16 %v4502_v60  ;;  %v4503_v11 = vunpack.i.l.bf16 %v4502_v60  ;;  %v4580_v56 = vunpack.i.h.bf16 %v4576_v58  ;;  %v4577_v47 = vunpack.i.l.bf16 %v4576_v58 }
 0x241   :  { %v5501_v2 = vpack.c.bf16 %v4503_v11, %v4498_v44  ;;  %v5503_v38 = vpack.c.bf16 %v4506_v9, %v4501_v54  ;;  %v5505_v30 = vpack.c.bf16 %v4577_v47, %v4572_v12  ;;  %v5507_v19 = vpack.c.bf16 %v4580_v56, %v4575_v33 }
 0x242   :  { %v4507_v63 = vpop.trf.xlu0  ;;  %v4581_v8 = vpop.trf.xlu1  ;;  %v6433_v33 = vmov 0.0  }
 0x243   :  { %6430 = vst [vmem:[#allocation33_spill] sm:$0xff] %v5501_v2  ;;  %6431 = vst [vmem:[#allocation34_spill] sm:$0xff] %v5503_v38  ;;  %v4511_v24 = vunpack.i.h.bf16 %v4507_v63  ;;  %v5512_v25 = vsel %vm5315_vm14, %v5501_v2, 0  ;;  %v5517_v60 = vsel %vm5315_vm14, %v5503_v38, 0  ;;  %v4508_v44 = vunpack.i.l.bf16 %v4507_v63 }
 0x244   :  { %6432 = vst [vmem:[#allocation35_spill] sm:$0xff] %v5507_v19  ;;  %3969 = vmatpush3.bf16.msra.mxu1 %v5512_v25  ;;  %3989 = vmatpush3.bf16.msra.mxu0 %v5517_v60  ;;  %v4585_v47 = vunpack.i.h.bf16 %v4581_v8  ;;  %v4582_v54 = vunpack.i.l.bf16 %v4581_v8 }
 0x245   :  { %3970 = vmatprep.subr.bf16.mxu1 %v6433_v33  ;;  %3990 = vmatprep.subr.bf16.mxu0 %v6433_v33 }
 0x246   :  { %v4512_v56 = vpop.trf.xlu0  ;;  %v4586_v12 = vpop.trf.xlu1 }
 0x247   :  { %v4516_v11 = vunpack.i.h.bf16 %v4512_v56  ;;  %v4513_v41 = vunpack.i.l.bf16 %v4512_v56  ;;  %v4590_v46 = vunpack.i.h.bf16 %v4586_v12  ;;  %v4587_v7 = vunpack.i.l.bf16 %v4586_v12 }
 0x248   :  { %v1027_v12 = vsel %vm5311_vm13, %v5335_v42, 0  ;;  %v1020_v42 = vsel %vm5311_vm13, %v5365_v36, 0  ;;  %v5604_v36 = vsel %vm5315_vm14, %v5403_v34, 0 }
 0x249   :  { %v5535_v45 = vpack.c.bf16 %v4513_v41, %v4508_v44  ;;  %v5537_v62 = vpack.c.bf16 %v4516_v11, %v4511_v24  ;;  %v5539_v20 = vpack.c.bf16 %v4587_v7, %v4582_v54  ;;  %v5541_v63 = vpack.c.bf16 %v4590_v46, %v4585_v47 }
 0x24a   :  { %v4591_v58 = vpop.trf.xlu1  ;;  %v1019_v54 = vsel %vm5311_vm13, %v5333_v49, 0  ;;  %v6449_v7 = vsel %vm5311_vm13, %v5363_v32, 0  ;;  %v6453_v32 = vsel %vm5311_vm13, %v5405_v59, 0 }
 0x24b   :  { %6434 = vst [vmem:[#allocation36_spill] sm:$0xff] %v5535_v45  ;;  %6435 = vst [vmem:[#allocation37_spill] sm:$0xff] %v5537_v62  ;;  %v5546_v9 = vsel %vm5315_vm14, %v5535_v45, 0  ;;  %v5551_v56 = vsel %vm5315_vm14, %v5537_v62, 0  ;;  %v4595_v24 = vunpack.i.h.bf16 %v4591_v58  ;;  %v4592_v41 = vunpack.i.l.bf16 %v4591_v58 }
 0x24c   :  { %6436 = vst [vmem:[#allocation38_spill] sm:$0xff] %v5539_v20  ;;  %6437 = vst [vmem:[#allocation39_spill] sm:$0xff] %v5541_v63  ;;  %3971 = vmatpush3.bf16.msra.mxu1 %v5546_v9  ;;  %3991 = vmatpush3.bf16.msra.mxu0 %v5551_v56 }
 0x24d   :  { %3996 = vmatprep.subr.bf16.mxu1 %v6433_v33  ;;  %4016 = vmatprep.subr.bf16.mxu0 %v6433_v33 }
 0x24e   :  { %v4596_v58 = vpop.trf.xlu1 }
 0x24f   :  { %3973 = vmatmul.mubr.bf16.vlgmr.msra.gmra.mrb[16].mxu1 %v5197_v57  ;;  %3993 = vmatmul.mubr.bf16.vlgmr.msra.gmra.mrb[8].mxu0 %v5193_v51  ;;  %v4600_v11 = vunpack.i.h.bf16 %v4596_v58  ;;  %v4597_v46 = vunpack.i.l.bf16 %v4596_v58  ;;  %v5632_v58 = vsel %vm5315_vm14, %v5471_v4, 0 }
 0x250   :  { %3997 = vmatpush3.bf16.msra.mxu1 %v1019_v54  ;;  %4017 = vmatpush3.bf16.msra.mxu0 %v1027_v12  ;;  %v1028_v54 = vsel %vm5311_vm13, %v5367_v39, 0  ;;  %v5609_v39 = vsel %vm5315_vm14, %v5405_v59, 0  ;;  %v5623_v12 = vsel %vm5315_vm14, %v5439_v10, 0  ;;  %6440 = vst [vmem:[#allocation42_spill] sm:$0xff] %v5632_v58  ;;  %v6457_v59 = vsel %vm5204_vm5, %v5218_v26, 0 }
 0x251   :  { %3998 = vmatprep.subr.bf16.mxu1 %v6433_v33  ;;  %4018 = vmatprep.subr.bf16.mxu0 %v6433_v33  ;;  %v5579_v47 = vpack.c.bf16 %v4597_v46, %v4592_v41  ;;  %v5581_v49 = vpack.c.bf16 %v4600_v11, %v4595_v24  ;;  %v5618_v46 = vsel %vm5315_vm14, %v5437_v61, 0  ;;  %v5637_v11 = vsel %vm5315_vm14, %v5473_v43, 0 }
 0x252   :  { %4012 = vmatprep.mubr.msk.bf16.mxu1 %vm4945_vm8, %v6433_v33  ;;  %4032 = vmatprep.mubr.msk.bf16.mxu0 %vm4945_vm8, %v6433_v33  ;;  %6441 = vst [vmem:[#allocation43_spill] sm:$0xff] %v5637_v11  ;;  %v5660_v24 = vsel %vm5315_vm14, %v5539_v20, 0  ;;  %v5665_v41 = vsel %vm5315_vm14, %v5541_v63, 0  ;;  %v6451_v63 = vsel %vm5311_vm13, %v5401_v16, 0  ;;  %v6455_v16 = vsel %vm5311_vm13, %v5439_v10, 0 }
 0x253   :  { %6438 = vst [vmem:[#allocation40_spill] sm:$0xff] %v5579_v47  ;;  %6439 = vst [vmem:[#allocation41_spill] sm:$0xff] %v5581_v49  ;;  %v5674_v44 = vsel %vm5315_vm14, %v5579_v47, 0  ;;  %v5679_v8 = vsel %vm5315_vm14, %v5581_v49, 0  ;;  %v6450_v49 = vsel %vm5311_vm13, %v5399_v0, 0  ;;  %v6454_v0 = vsel %vm5311_vm13, %v5437_v61, 0 }
 0x254   :  { %3999 = vmatpush3.bf16.msra.mxu1 %v1020_v42  ;;  %4019 = vmatpush3.bf16.msra.mxu0 %v1028_v54  ;;  %v5646_v42 = vsel %vm5315_vm14, %v5505_v30, 0  ;;  %v5651_v54 = vsel %vm5315_vm14, %v5507_v19, 0  ;;  %6444 = vst [vmem:[#allocation46_spill] sm:$0xff] %v5660_v24  ;;  %6445 = vst [vmem:[#allocation47_spill] sm:$0xff] %v5665_v41  ;;  %v6456_v10 = vsel %vm5204_vm5, %v5220_v28, 0 }
 0x255   :  { %4000 = vmatprep.subr.bf16.mxu1 %v6433_v33  ;;  %4020 = vmatprep.subr.bf16.mxu0 %v6433_v33  ;;  %6442 = vst [vmem:[#allocation44_spill] sm:$0xff] %v5646_v42  ;;  %6443 = vst [vmem:[#allocation45_spill] sm:$0xff] %v5651_v54 }
 0x256   :  { %6446 = vst [vmem:[#allocation48_spill] sm:$0xff] %v5674_v44  ;;  %6447 = vst [vmem:[#allocation49_spill] sm:$0xff] %v5679_v8 }
 0x258   :  { %4001 = vmatpush3.bf16.msra.mxu1 %v5604_v36  ;;  %4021 = vmatpush3.bf16.msra.mxu0 %v5609_v39 }
 0x259   :  { %4002 = vmatprep.subr.bf16.mxu1 %v6433_v33  ;;  %4022 = vmatprep.subr.bf16.mxu0 %v6433_v33 }
 0x25c   :  { %4003 = vmatpush3.bf16.msra.mxu1 %v5618_v46  ;;  %4023 = vmatpush3.bf16.msra.mxu0 %v5623_v12 }
 0x25d   :  { %4004 = vmatprep.subr.bf16.mxu1 %v6433_v33  ;;  %4024 = vmatprep.subr.bf16.mxu0 %v6433_v33 }
 0x260   :  { %4005 = vmatpush3.bf16.msra.mxu1 %v5632_v58  ;;  %4025 = vmatpush3.bf16.msra.mxu0 %v5637_v11 }
 0x261   :  { %4006 = vmatprep.subr.bf16.mxu1 %v6433_v33  ;;  %4026 = vmatprep.subr.bf16.mxu0 %v6433_v33 }
 0x264   :  { %4007 = vmatpush3.bf16.msra.mxu1 %v5646_v42  ;;  %4027 = vmatpush3.bf16.msra.mxu0 %v5651_v54 }
 0x265   :  { %4008 = vmatprep.subr.bf16.mxu1 %v6433_v33  ;;  %4028 = vmatprep.subr.bf16.mxu0 %v6433_v33 }
 0x268   :  { %4009 = vmatpush3.bf16.msra.mxu1 %v5660_v24  ;;  %4029 = vmatpush3.bf16.msra.mxu0 %v5665_v41 }
 0x269   :  { %4010 = vmatprep.subr.bf16.mxu1 %v6433_v33  ;;  %4030 = vmatprep.subr.bf16.mxu0 %v6433_v33 }
 0x26c   :  { %4011 = vmatpush3.bf16.msra.mxu1 %v5674_v44  ;;  %4031 = vmatpush3.bf16.msra.mxu0 %v5679_v8 }
 0x26d   :  { %4036 = vmatprep.subr.bf16.mxu1 %v6433_v33  ;;  %4056 = vmatprep.subr.bf16.mxu0 %v6433_v33 }
 0x26f   :  { %4013 = vmatmul.mubr.bf16.vlgmr.msra.gmra.mrb[20].mxu1 %v5250_v13  ;;  %4033 = vmatmul.mubr.bf16.vlgmr.msra.gmra.mrb[12].mxu0 %v5242_v35 }
 0x270   :  { %4037 = vmatpush3.bf16.msra.mxu1 %v5325_v27  ;;  %4057 = vmatpush3.bf16.msra.mxu0 %v5329_v29 }
 0x271   :  { %4038 = vmatprep.subr.bf16.mxu1 %v6433_v33  ;;  %4058 = vmatprep.subr.bf16.mxu0 %v6433_v33 }
 0x272   :  { %4052 = vmatprep.mubr.msk.bf16.mxu1 %vm4945_vm8, %v6433_v33  ;;  %4072 = vmatprep.mubr.msk.bf16.mxu0 %vm4945_vm8, %v6433_v33 }
 0x274   :  { %4039 = vmatpush3.bf16.msra.mxu1 %v5345_v5  ;;  %4059 = vmatpush3.bf16.msra.mxu0 %v5349_v14 }
 0x275   :  { %4040 = vmatprep.subr.bf16.mxu1 %v6433_v33  ;;  %4060 = vmatprep.subr.bf16.mxu0 %v6433_v33 }
 0x278   :  { %4041 = vmatpush3.bf16.msra.mxu1 %v6448_v18  ;;  %4061 = vmatpush3.bf16.msra.mxu0 %v6449_v7 }
 0x279   :  { %4042 = vmatprep.subr.bf16.mxu1 %v6433_v33  ;;  %4062 = vmatprep.subr.bf16.mxu0 %v6433_v33 }
 0x27c   :  { %4043 = vmatpush3.bf16.msra.mxu1 %v6450_v49  ;;  %4063 = vmatpush3.bf16.msra.mxu0 %v6451_v63 }
 0x27d   :  { %4044 = vmatprep.subr.bf16.mxu1 %v6433_v33  ;;  %4064 = vmatprep.subr.bf16.mxu0 %v6433_v33 }
 0x280   :  { %4045 = vmatpush3.bf16.msra.mxu1 %v5444_v37  ;;  %4065 = vmatpush3.bf16.msra.mxu0 %v5449_v23 }
 0x281   :  { %4046 = vmatprep.subr.bf16.mxu1 %v6433_v33  ;;  %4066 = vmatprep.subr.bf16.mxu0 %v6433_v33 }
 0x284   :  { %4047 = vmatpush3.bf16.msra.mxu1 %v5478_v52  ;;  %4067 = vmatpush3.bf16.msra.mxu0 %v5483_v48 }
 0x285   :  { %4048 = vmatprep.subr.bf16.mxu1 %v6433_v33  ;;  %4068 = vmatprep.subr.bf16.mxu0 %v6433_v33 }
 0x288   :  { %4049 = vmatpush3.bf16.msra.mxu1 %v5512_v25  ;;  %4069 = vmatpush3.bf16.msra.mxu0 %v5517_v60 }
 0x289   :  { %4050 = vmatprep.subr.bf16.mxu1 %v6433_v33  ;;  %4070 = vmatprep.subr.bf16.mxu0 %v6433_v33 }
 0x28c   :  { %4051 = vmatpush3.bf16.msra.mxu1 %v5546_v9  ;;  %4071 = vmatpush3.bf16.msra.mxu0 %v5551_v56 }
 0x28d   :  { %4076 = vmatprep.subr.bf16.mxu1 %v6433_v33  ;;  %4096 = vmatprep.subr.bf16.mxu0 %v6433_v33 }
 0x28f   :  { %4053 = vmatmul.mubr.bf16.vlgmr.msra.gmra.mrb[24].mxu1 %v5197_v57  ;;  %4073 = vmatmul.mubr.bf16.vlgmr.msra.gmra.mrb[16].mxu0 %v5193_v51 }
 0x290   :  { %4077 = vmatpush3.bf16.msra.mxu1 %v5354_v17  ;;  %4097 = vmatpush3.bf16.msra.mxu0 %v5359_v21 }
 0x291   :  { %4078 = vmatprep.subr.bf16.mxu1 %v6433_v33  ;;  %4098 = vmatprep.subr.bf16.mxu0 %v6433_v33 }
 0x292   :  { %4092 = vmatprep.mubr.msk.bf16.mxu1 %vm4945_vm8, %v6433_v33  ;;  %4112 = vmatprep.mubr.msk.bf16.mxu0 %vm4945_vm8, %v6433_v33 }
 0x294   :  { %4079 = vmatpush3.bf16.msra.mxu1 %v5392_v1  ;;  %4099 = vmatpush3.bf16.msra.mxu0 %v5397_v3 }
 0x295   :  { %4080 = vmatprep.subr.bf16.mxu1 %v6433_v33  ;;  %4100 = vmatprep.subr.bf16.mxu0 %v6433_v33 }
 0x298   :  { %4081 = vmatpush3.bf16.msra.mxu1 %v6452_v31  ;;  %4101 = vmatpush3.bf16.msra.mxu0 %v6453_v32 }
 0x299   :  { %4082 = vmatprep.subr.bf16.mxu1 %v6433_v33  ;;  %4102 = vmatprep.subr.bf16.mxu0 %v6433_v33 }
 0x29c   :  { %4083 = vmatpush3.bf16.msra.mxu1 %v6454_v0  ;;  %4103 = vmatpush3.bf16.msra.mxu0 %v6455_v16 }
 0x29d   :  { %4084 = vmatprep.subr.bf16.mxu1 %v6433_v33  ;;  %4104 = vmatprep.subr.bf16.mxu0 %v6433_v33 }
 0x2a0   :  { %4085 = vmatpush3.bf16.msra.mxu1 %v5632_v58  ;;  %4105 = vmatpush3.bf16.msra.mxu0 %v5637_v11 }
 0x2a1   :  { %4086 = vmatprep.subr.bf16.mxu1 %v6433_v33  ;;  %4106 = vmatprep.subr.bf16.mxu0 %v6433_v33 }
 0x2a4   :  { %4087 = vmatpush3.bf16.msra.mxu1 %v5646_v42  ;;  %4107 = vmatpush3.bf16.msra.mxu0 %v5651_v54 }
 0x2a5   :  { %4088 = vmatprep.subr.bf16.mxu1 %v6433_v33  ;;  %4108 = vmatprep.subr.bf16.mxu0 %v6433_v33 }
 0x2a8   :  { %4089 = vmatpush3.bf16.msra.mxu1 %v5660_v24  ;;  %4109 = vmatpush3.bf16.msra.mxu0 %v5665_v41 }
 0x2a9   :  { %4090 = vmatprep.subr.bf16.mxu1 %v6433_v33  ;;  %4110 = vmatprep.subr.bf16.mxu0 %v6433_v33 }
 0x2ac   :  { %4091 = vmatpush3.bf16.msra.mxu1 %v5674_v44  ;;  %4111 = vmatpush3.bf16.msra.mxu0 %v5679_v8 }
 0x2ad   :  { %4116 = vmatprep.subr.bf16.mxu0 %v6433_v33  ;;  %4122 = vmatprep.subr.bf16.mxu1 %v6433_v33 }
 0x2af   :  { %4093 = vmatmul.mubr.bf16.vlgmr.msra.gmra.mrb[28].mxu1 %v5250_v13  ;;  %4113 = vmatmul.mubr.bf16.vlgmr.msra.gmra.mrb[20].mxu0 %v5242_v35 }
 0x2b0   :  { %4117 = vmatpush3.bf16.msra.mxu0 %v6456_v10  ;;  %4123 = vmatpush3.bf16.msra.mxu1 %v6457_v59 }
 0x2b1   :  { %4124 = vmatprep.mubr.msk.bf16.mxu1 %vm4945_vm8, %v6433_v33  ;;  %4128 = vmatprep.subr.bf16.mxu1 %v6433_v33 }
 0x2b2   :  { %4118 = vmatprep.mubr.msk.bf16.mxu0 %vm4945_vm8, %v6433_v33  ;;  %4140 = vmatprep.subr.bf16.mxu0 %v6433_v33 }
 0x322   :  { %v5801_v61 = vpop.f32.mrb[16].mxu1  ;;  %v5803_v34 = vpop.f32.mrb[8].mxu0 }
 0x323   :  { %v3974_v63 = vpop.f32.mrb[17].mxu1  ;;  %v3994_v7 = vpop.f32.mrb[9].mxu0 }
 0x324   :  { %v5805_v49 = vpop.f32.mrb[18].mxu1  ;;  %v5807_v18 = vpop.f32.mrb[10].mxu0 }
 0x325   :  { %v3975_v31 = vpop.f32.mrb[19].mxu1  ;;  %v3995_v32 = vpop.f32.mrb[11].mxu0 }
 0x342   :  { %v5809_v0 = vpop.f32.mrb[20].mxu1  ;;  %v5811_v16 = vpop.f32.mrb[12].mxu0 }
 0x343   :  { %v4014_v10 = vpop.f32.mrb[21].mxu1  ;;  %v4034_v59 = vpop.f32.mrb[13].mxu0 }
 0x344   :  { %v5813_v47 = vpop.f32.mrb[22].mxu1  ;;  %v5815_v54 = vpop.f32.mrb[14].mxu0 }
 0x345   :  { %v4015_v20 = vpop.f32.mrb[23].mxu1  ;;  %v4035_v11 = vpop.f32.mrb[15].mxu0 }
 0x362   :  { %v5817_v63 = vpop.f32.mrb[24].mxu1  ;;  %v1575_v7 = vpop.f32.mrb[16].mxu0 }
 0x363   :  { %v4054_v42 = vpop.f32.mrb[25].mxu1  ;;  %v4074_v58 = vpop.f32.mrb[17].mxu0  ;;  %v1670_v31 = vsel %vm1215_vm15, %v1575_v7, -inf  ;;  %v1664_v20 = vsel %vm1215_vm15, %v5817_v63, -inf }
 0x364   :  { %1671 = vmax.xlane.f32.xlu0 %v1670_v31  ;;  %v5820_v32 = vpop.f32.mrb[26].mxu1  ;;  %v1578_v62 = vpop.f32.mrb[18].mxu0 }
 0x365   :  { %v4055_v10 = vpop.f32.mrb[27].mxu1  ;;  %v4075_v59 = vpop.f32.mrb[19].mxu0  ;;  %v1673_v38 = vsel %vm1215_vm15, %v1578_v62, -inf }
 0x366   :  { %1674 = vmax.xlane.f32.xlu1 %v1673_v38  ;;  %v1216_v38 = vsel %vm1215_vm15, %v5801_v61, -inf }
 0x36a   :  { %1665 = vmax.xlane.f32.xlu1 %v1664_v20 }
 0x382   :  { %v1616_v11 = vpop.f32.mrb[28].mxu1  ;;  %v1657_v45 = vpop.f32.mrb[20].mxu0 }
 0x383   :  { %v4094_v48 = vpop.f32.mrb[29].mxu1  ;;  %v4114_v42 = vpop.f32.mrb[21].mxu0  ;;  %v1682_v58 = vsel %vm1215_vm15, %v1657_v45, -inf  ;;  %v1676_v31 = vsel %vm1215_vm15, %v1616_v11, -inf }
 0x384   :  { %v5827_v2 = vpop.f32.mrb[22].mxu0  ;;  %1683 = vmax.xlane.f32.xlu1 %v1682_v58  ;;  %1677 = vmax.xlane.f32.xlu0 %v1676_v31  ;;  %v1619_v10 = vpop.f32.mrb[30].mxu1  ;;  %v1222_v48 = vsel %vm1215_vm15, %v5803_v34, -inf  ;;  %v1667_v42 = vsel %vm1215_vm15, %v5820_v32, -inf  ;;  %v1228_v58 = vsel %vm1215_vm15, %v5809_v0, -inf  ;;  %v1234_v31 = vsel %vm1215_vm15, %v5811_v16, -inf }
 0x385   :  { %v4095_v59 = vpop.f32.mrb[31].mxu1  ;;  %v4115_v23 = vpop.f32.mrb[23].mxu0  ;;  %v1679_v20 = vsel %vm1215_vm15, %v1619_v10, -inf }
 0x386   :  { %v1685_v23 = vsel %vm1215_vm15, %v5827_v2, -inf  ;;  %v1219_v59 = vsel %vm1215_vm15, %v5805_v49, -inf }
 0x388   :  { %1217 = vmax.xlane.f32.xlu1 %v1216_v38  ;;  %1680 = vmax.xlane.f32.xlu0 %v1679_v20  ;;  %v1225_v38 = vsel %vm1215_vm15, %v5807_v18, -inf  ;;  %v1231_v20 = vsel %vm1215_vm15, %v5813_v47, -inf }
 0x38c   :  { %1223 = vmax.xlane.f32.xlu1 %v1222_v48  ;;  %1668 = vmax.xlane.f32.xlu0 %v1667_v42  ;;  %v1237_v48 = vsel %vm1215_vm15, %v5815_v54, -inf }
 0x390   :  { %1229 = vmax.xlane.f32.xlu1 %v1228_v58  ;;  %1686 = vmax.xlane.f32.xlu0 %v1685_v23 }
 0x394   :  { %1235 = vmax.xlane.f32.xlu1 %v1234_v31  ;;  %1220 = vmax.xlane.f32.xlu0 %v1219_v59 }
 0x398   :  { %1226 = vmax.xlane.f32.xlu0 %v1225_v38 }
 0x39c   :  { %1232 = vmax.xlane.f32.xlu0 %v1231_v20 }
 0x3a0   :  { %1238 = vmax.xlane.f32.xlu0 %v1237_v48 }
 0x3f1   :  { %v1672_v42 = vpop.xlane.xlu0 %1671 }
 0x3f2   :  { %v1690_v58 = vsub.f32 %v1575_v7, %v1672_v42 }
 0x3f3   :  { %v1675_v23 = vpop.xlane.xlu1 %1674 }
 0x3f4   :  { %v1700_v52 = vmul.f32 1.442695, %v1690_v58  ;;  %v1691_v37 = vsub.f32 %v1578_v62, %v1675_v23 }
 0x3f6   :  { %4633 = vpow2.f32 %v1700_v52  ;;  %v1702_v31 = vmul.f32 1.442695, %v1691_v37 }
 0x3f7   :  { %v1666_v48 = vpop.xlane.xlu1 %1665 }
 0x3f8   :  { %4635 = vpow2.f32 %v1702_v31  ;;  %v1688_v7 = vsub.f32 %v5817_v63, %v1666_v48 }
 0x3fa   :  { %v1696_v58 = vmul.f32 1.442695, %v1688_v7 }
 0x400   :  { %v5850_v59 = vpop.eup %4633 }
 0x401   :  { %v1718_v38 = vsel %vm1215_vm15, %v5850_v59, 0.0 }
 0x402   :  { %v5854_v35 = vpop.eup %4635  ;;  %1719 = vadd.xlane.f32.xlu1 %v1718_v38 }
 0x403   :  { %v1721_v20 = vsel %vm1215_vm15, %v5854_v35, 0.0 }
 0x404   :  { %1722 = vadd.xlane.f32.xlu0 %v1721_v20 }
 0x411   :  { %v1684_v42 = vpop.xlane.xlu1 %1683  ;;  %v1678_v62 = vpop.xlane.xlu0 %1677 }
 0x412   :  { %v1692_v52 = vsub.f32 %v1616_v11, %v1678_v62  ;;  %v1694_v23 = vsub.f32 %v1657_v45, %v1684_v42 }
 0x414   :  { %v1704_v37 = vmul.f32 1.442695, %v1692_v52  ;;  %v1708_v38 = vmul.f32 1.442695, %v1694_v23 }
 0x415   :  { %v1218_v31 = vpop.xlane.xlu1 %1217  ;;  %v1681_v8 = vpop.xlane.xlu0 %1680 }
 0x416   :  { %v1693_v13 = vsub.f32 %v1619_v10, %v1681_v8  ;;  %4637 = vpow2.f32 %v1704_v37  ;;  %v1240_v44 = vsub.f32 %v5801_v61, %v1218_v31 }
 0x417   :  { %4639 = vpow2.f32 %v1696_v58 }
 0x418   :  { %v1706_v41 = vmul.f32 1.442695, %v1693_v13  ;;  %v1248_v11 = vmul.f32 1.442695, %v1240_v44 }
 0x419   :  { %v1224_v19 = vpop.xlane.xlu1 %1223  ;;  %v1669_v20 = vpop.xlane.xlu0 %1668 }
 0x41a   :  { %v1689_v24 = vsub.f32 %v5820_v32, %v1669_v20  ;;  %4641 = vpow2.f32 %v1706_v41  ;;  %v1242_v48 = vsub.f32 %v5803_v34, %v1224_v19 }
 0x41b   :  { %4643 = vpow2.f32 %v1708_v38 }
 0x41c   :  { %v1698_v63 = vmul.f32 1.442695, %v1689_v24  ;;  %v1252_v61 = vmul.f32 1.442695, %v1242_v48 }
 0x41d   :  { %v1230_v45 = vpop.xlane.xlu1 %1229  ;;  %v1687_v7 = vpop.xlane.xlu0 %1686 }
 0x41e   :  { %v1695_v8 = vsub.f32 %v5827_v2, %v1687_v7  ;;  %4645 = vpow2.f32 %v1698_v63  ;;  %v1244_v42 = vsub.f32 %v5809_v0, %v1230_v45 }
 0x41f   :  { %4647 = vpow2.f32 %v1248_v11 }
 0x420   :  { %v1710_v13 = vmul.f32 1.442695, %v1695_v8  ;;  %v5863_v10 = vpop.eup %4637  ;;  %v1256_v34 = vmul.f32 1.442695, %v1244_v42 }
 0x421   :  { %v1221_v62 = vpop.xlane.xlu0 %1220  ;;  %v1236_v32 = vpop.xlane.xlu1 %1235  ;;  %v1724_v44 = vsel %vm1215_vm15, %v5863_v10, 0.0 }
 0x422   :  { %v1241_v41 = vsub.f32 %v5805_v49, %v1221_v62  ;;  %v5869_v19 = vpop.eup %4639  ;;  %4649 = vpow2.f32 %v1710_v13  ;;  %1725 = vadd.xlane.f32.xlu1 %v1724_v44  ;;  %v1246_v52 = vsub.f32 %v5811_v16, %v1236_v32 }
 0x423   :  { %4651 = vpow2.f32 %v1252_v61  ;;  %v1712_v49 = vsel %vm1215_vm15, %v5869_v19, 0.0 }
 0x424   :  { %v1250_v2 = vmul.f32 1.442695, %v1241_v41  ;;  %v5871_v24 = vpop.eup %4641  ;;  %v1260_v20 = vmul.f32 1.442695, %v1246_v52 }
 0x425   :  { %v1227_v37 = vpop.xlane.xlu0 %1226  ;;  %v1727_v58 = vsel %vm1215_vm15, %v5871_v24, 0.0  ;;  %v5879_v23 = vpop.eup %4643 }
 0x426   :  { %v1243_v0 = vsub.f32 %v5807_v18, %v1227_v37  ;;  %4653 = vpow2.f32 %v1250_v2  ;;  %1713 = vadd.xlane.f32.xlu1 %v1712_v49  ;;  %1728 = vadd.xlane.f32.xlu0 %v1727_v58  ;;  %v1730_v63 = vsel %vm1215_vm15, %v5879_v23, 0.0 }
 0x427   :  { %4655 = vpow2.f32 %v1256_v34 }
 0x428   :  { %v1254_v31 = vmul.f32 1.442695, %v1243_v0  ;;  %v5881_v38 = vpop.eup %4645 }
 0x429   :  { %v1233_v16 = vpop.xlane.xlu0 %1232  ;;  %v1715_v11 = vsel %vm1215_vm15, %v5881_v38, 0.0  ;;  %v5888_v48 = vpop.eup %4647 }
 0x42a   :  { %4657 = vpow2.f32 %v1254_v31  ;;  %v1245_v18 = vsub.f32 %v5813_v47, %v1233_v16  ;;  %1731 = vadd.xlane.f32.xlu1 %v1730_v63  ;;  %1716 = vadd.xlane.f32.xlu0 %v1715_v11  ;;  %v1264_v47 = vsel %vm1215_vm15, %v5888_v48, 0.0 }
 0x42b   :  { %4659 = vpow2.f32 %v1260_v20 }
 0x42c   :  { %v1258_v45 = vmul.f32 1.442695, %v1245_v18  ;;  %v5890_v7 = vpop.eup %4649 }
 0x42d   :  { %v1239_v8 = vpop.xlane.xlu0 %1238  ;;  %v1733_v61 = vsel %vm1215_vm15, %v5890_v7, 0.0  ;;  %v5897_v42 = vpop.eup %4651 }
 0x42e   :  { %4661 = vpow2.f32 %v1258_v45  ;;  %v1247_v13 = vsub.f32 %v5815_v54, %v1239_v8  ;;  %1265 = vadd.xlane.f32.xlu1 %v1264_v47  ;;  %1734 = vadd.xlane.f32.xlu0 %v1733_v61  ;;  %v1270_v41 = vsel %vm1215_vm15, %v5897_v42, 0.0  ;;  %v6458_v47 = vsel %vm5204_vm5, %v5270_v55, 0 }
 0x430   :  { %v1262_v62 = vmul.f32 1.442695, %v1247_v13  ;;  %v5899_v32 = vpop.eup %4653 }
 0x431   :  { %v1267_v54 = vsel %vm1215_vm15, %v5899_v32, 0.0  ;;  %v5905_v44 = vpop.eup %4655 }
 0x432   :  { %4663 = vpow2.f32 %v1262_v62  ;;  %1271 = vadd.xlane.f32.xlu1 %v1270_v41  ;;  %1268 = vadd.xlane.f32.xlu0 %v1267_v54  ;;  %v1276_v52 = vsel %vm1215_vm15, %v5905_v44, 0.0 }
 0x434   :  { %v5907_v2 = vpop.eup %4657 }
 0x435   :  { %v1273_v34 = vsel %vm1215_vm15, %v5907_v2, 0.0  ;;  %v5913_v37 = vpop.eup %4659 }
 0x436   :  { %1277 = vadd.xlane.f32.xlu1 %v1276_v52  ;;  %1274 = vadd.xlane.f32.xlu0 %v1273_v34  ;;  %v1282_v58 = vsel %vm1215_vm15, %v5913_v37, 0.0 }
 0x438   :  { %v5915_v0 = vpop.eup %4661 }
 0x439   :  { %v1279_v49 = vsel %vm1215_vm15, %v5915_v0, 0.0 }
 0x43a   :  { %1283 = vadd.xlane.f32.xlu1 %v1282_v58  ;;  %1280 = vadd.xlane.f32.xlu0 %v1279_v49 }
 0x43c   :  { %v5921_v31 = vpop.eup %4663 }
 0x43d   :  { %v1285_v20 = vsel %vm1215_vm15, %v5921_v31, 0.0 }
 0x43e   :  { %1286 = vadd.xlane.f32.xlu0 %v1285_v20 }
 0x48f   :  { %v1720_v16 = vpop.xlane.xlu1 %1719 }
 0x490   :  { %4665 = vrcp.f32 %v1720_v16 }
 0x491   :  { %v1723_v18 = vpop.xlane.xlu0 %1722 }
 0x492   :  { %4667 = vrcp.f32 %v1723_v18 }
 0x49a   :  { %v4666_v63 = vpop.eup %4665 }
 0x49b   :  { %v1746_v45 = vmul.f32 %v4666_v63, %v5850_v59 }
 0x49c   :  { %v4668_v11 = vpop.eup %4667 }
 0x49d   :  { %v1747_v8 = vmul.f32 %v4668_v11, %v5854_v35 }
 0x49f   :  { %v1753_v13 = vpack.c.bf16 %v1747_v8, %v1746_v45 }
 0x4a1   :  { %4125 = vmatmul.mubr.msk.bf16.vlgmr.msra.gmra.mrb[32].mxu1 %vm1215_vm15, %v1753_v13 }
 0x4a2   :  { %4129 = vmatpush3.bf16.msra.mxu1 %v6458_v47  ;;  %4130 = vmatprep.mubr.msk.bf16.mxu1 %vm4945_vm8, %v6433_v33 }
 0x4a3   :  { %4134 = vmatprep.subr.bf16.mxu1 %v6433_v33 }
 0x4af   :  { %v1726_v61 = vpop.xlane.xlu1 %1725 }
 0x4b0   :  { %4669 = vrcp.f32 %v1726_v61 }
 0x4b3   :  { %v1714_v62 = vpop.xlane.xlu1 %1713  ;;  %v1729_v41 = vpop.xlane.xlu0 %1728 }
 0x4b4   :  { %4671 = vrcp.f32 %v1729_v41 }
 0x4b5   :  { %4673 = vrcp.f32 %v1714_v62 }
 0x4b7   :  { %v1732_v35 = vpop.xlane.xlu1 %1731  ;;  %v1717_v59 = vpop.xlane.xlu0 %1716 }
 0x4b8   :  { %4675 = vrcp.f32 %v1717_v59 }
 0x4b9   :  { %4677 = vrcp.f32 %v1732_v35 }
 0x4ba   :  { %v4670_v52 = vpop.eup %4669 }
 0x4bb   :  { %v1266_v54 = vpop.xlane.xlu1 %1265  ;;  %v1735_v34 = vpop.xlane.xlu0 %1734  ;;  %v1748_v16 = vmul.f32 %v4670_v52, %v5863_v10  ;;  %v6459_v10 = vsel %vm5204_vm5, %v5268_v53, 0 }
 0x4bc   :  { %4679 = vrcp.f32 %v1735_v34 }
 0x4bd   :  { %4681 = vrcp.f32 %v1266_v54  ;;  %v6460_v54 = vsel %vm5213_vm6, %v5220_v28, 0 }
 0x4be   :  { %v4672_v49 = vpop.eup %4671 }
 0x4bf   :  { %v1272_v58 = vpop.xlane.xlu1 %1271  ;;  %v1269_v20 = vpop.xlane.xlu0 %1268  ;;  %v1749_v18 = vmul.f32 %v4672_v49, %v5871_v24 }
 0x4c0   :  { %v4674_v63 = vpop.eup %4673  ;;  %4683 = vrcp.f32 %v1269_v20  ;;  %v6461_v20 = vsel %vm5213_vm6, %v5218_v26, 0 }
 0x4c1   :  { %v1754_v11 = vpack.c.bf16 %v1749_v18, %v1748_v16  ;;  %4685 = vrcp.f32 %v1272_v58  ;;  %v1744_v47 = vmul.f32 %v4674_v63, %v5869_v19 }
 0x4c2   :  { %v4676_v45 = vpop.eup %4675 }
 0x4c3   :  { %v1278_v8 = vpop.xlane.xlu1 %1277  ;;  %v1275_v13 = vpop.xlane.xlu0 %1274  ;;  %v1745_v61 = vmul.f32 %v4676_v45, %v5881_v38  ;;  %4131 = vmatmul.mubr.msk.bf16.vlgmr.msra.gmra.mrb[36].mxu1 %vm1215_vm15, %v1754_v11  ;;  %v6462_v11 = vsel %vm5213_vm6, %v5270_v55, 0 }
 0x4c4   :  { %v4678_v62 = vpop.eup %4677  ;;  %4135 = vmatpush3.bf16.msra.mxu1 %v6459_v10  ;;  %4687 = vrcp.f32 %v1275_v13  ;;  %4136 = vmatprep.mubr.msk.bf16.mxu1 %vm4945_vm8, %v6433_v33 }
 0x4c5   :  { %v1752_v24 = vpack.c.bf16 %v1745_v61, %v1744_v47  ;;  %4146 = vmatprep.subr.bf16.mxu1 %v6433_v33  ;;  %4689 = vrcp.f32 %v1278_v8  ;;  %v1750_v38 = vmul.f32 %v4678_v62, %v5879_v23  ;;  %v6463_v47 = vsel %vm5213_vm6, %v5268_v53, 0 }
 0x4c6   :  { %v4680_v41 = vpop.eup %4679 }
 0x4c7   :  { %v1284_v19 = vpop.xlane.xlu1 %1283  ;;  %v1281_v35 = vpop.xlane.xlu0 %1280  ;;  %v1751_v59 = vmul.f32 %v4680_v41, %v5890_v7  ;;  %4119 = vmatmul.mubr.msk.bf16.vlgmr.msra.gmra.mrb[24].mxu0 %vm1215_vm15, %v1752_v24  ;;  %v6467_v24 = vld [vmem:[#allocation24_spill] sm:$0xff]  ;;  %v6468_v41 = vld [vmem:[#allocation29_spill] sm:$0xff] }
 0x4c8   :  { %v4682_v15 = vpop.eup %4681  ;;  %4141 = vmatpush3.bf16.msra.mxu0 %v6460_v54  ;;  %4691 = vrcp.f32 %v1281_v35  ;;  %4142 = vmatprep.mubr.msk.bf16.mxu0 %vm4945_vm8, %v6433_v33  ;;  %v6470_v35 = vld [vmem:[#allocation26_spill] sm:$0xff] }
 0x4c9   :  { %4693 = vrcp.f32 %v1284_v19  ;;  %v1755_v34 = vpack.c.bf16 %v1751_v59, %v1750_v38  ;;  %4152 = vmatprep.subr.bf16.mxu0 %v6433_v33  ;;  %v1296_v7 = vmul.f32 %v4682_v15, %v5888_v48  ;;  %v6469_v19 = vsel %vm5311_vm13, %v6468_v41, 0  ;;  %v6472_v59 = vld [vmem:[#allocation30_spill] sm:$0xff] }
 0x4ca   :  { %v4684_v52 = vpop.eup %4683  ;;  %v6471_v38 = vsel %vm5311_vm13, %v6470_v35, 0  ;;  %v6473_v15 = vsel %vm5311_vm13, %v6472_v59, 0 }
 0x4cb   :  { %v1287_v23 = vpop.xlane.xlu0 %1286  ;;  %v1297_v49 = vmul.f32 %v4684_v52, %v5899_v32  ;;  %4137 = vmatmul.mubr.msk.bf16.vlgmr.msra.gmra.mrb[40].mxu1 %vm1215_vm15, %v1755_v34  ;;  %v4686_v58 = vpop.eup %4685  ;;  %v6481_v34 = vld [vmem:[#allocation47_spill] sm:$0xff]  ;;  %v6483_v52 = vld [vmem:[#allocation49_spill] sm:$0xff] }
 0x4cc   :  { %4695 = vrcp.f32 %v1287_v23  ;;  %4147 = vmatpush3.bf16.msra.mxu1 %v6461_v20  ;;  %4148 = vmatprep.mubr.msk.bf16.mxu1 %vm4945_vm8, %v6433_v33  ;;  %v1298_v48 = vmul.f32 %v4686_v58, %v5897_v42  ;;  %v6487_v58 = vsel %vm5225_vm7, %v5218_v26, 0 }
 0x4cd   :  { %v1304_v16 = vpack.c.bf16 %v1297_v49, %v1296_v7  ;;  %4158 = vmatprep.subr.bf16.mxu1 %v6433_v33  ;;  %v6485_v7 = vsel %vm5225_vm7, %v5220_v28, 0  ;;  %v6486_v49 = vld [vmem:[#allocation21_spill] sm:$0xff] }
 0x4ce   :  { %v4688_v18 = vpop.eup %4687 }
 0x4cf   :  { %v1299_v32 = vmul.f32 %v4688_v18, %v5907_v2  ;;  %4143 = vmatmul.mubr.msk.bf16.vlgmr.msra.gmra.mrb[28].mxu0 %vm1215_vm15, %v1304_v16  ;;  %v4690_v63 = vpop.eup %4689 }
 0x4d0   :  { %4153 = vmatpush3.bf16.msra.mxu0 %v6462_v11  ;;  %4154 = vmatprep.mubr.msk.bf16.mxu0 %vm4945_vm8, %v6433_v33  ;;  %v1300_v42 = vmul.f32 %v4690_v63, %v5905_v44 }
 0x4d1   :  { %v1305_v45 = vpack.c.bf16 %v1299_v32, %v1298_v48  ;;  %4164 = vmatprep.subr.bf16.mxu0 %v6433_v33 }
 0x4d2   :  { %v4692_v8 = vpop.eup %4691 }
 0x4d3   :  { %v4694_v13 = vpop.eup %4693  ;;  %v1301_v2 = vmul.f32 %v4692_v8, %v5915_v0  ;;  %4149 = vmatmul.mubr.msk.bf16.vlgmr.msra.gmra.mrb[44].mxu1 %vm1215_vm15, %v1305_v45 }
 0x4d4   :  { %4159 = vmatpush3.bf16.msra.mxu1 %v6463_v47  ;;  %4160 = vmatprep.mubr.msk.bf16.mxu1 %vm4945_vm8, %v6433_v33  ;;  %v1302_v10 = vmul.f32 %v4694_v13, %v5913_v37  ;;  %v6465_v37 = vld [vmem:[#allocation25_spill] sm:$0xff] }
 0x4d5   :  { %v1306_v62 = vpack.c.bf16 %v1301_v2, %v1300_v42  ;;  %4184 = vmatprep.subr.bf16.mxu1 %v6433_v33 }
 0x4d6   :  { %v4696_v61 = vpop.eup %4695 }
 0x4d7   :  { %v1303_v44 = vmul.f32 %v4696_v61, %v5921_v31  ;;  %4155 = vmatmul.mubr.msk.bf16.vlgmr.msra.gmra.mrb[32].mxu0 %vm1215_vm15, %v1306_v62  ;;  %v6466_v31 = vsel %vm5311_vm13, %v6465_v37, 0 }
 0x4d8   :  { %4165 = vmatpush3.bf16.msra.mxu0 %v5325_v27  ;;  %4180 = vmatprep.mubr.msk.bf16.mxu0 %vm4945_vm8, %v6433_v33 }
 0x4d9   :  { %v1307_v0 = vpack.c.bf16 %v1303_v44, %v1302_v10  ;;  %4166 = vmatprep.subr.bf16.mxu0 %v6433_v33 }
 0x4db   :  { %4161 = vmatmul.mubr.msk.bf16.vlgmr.msra.gmra.mrb[48].mxu1 %vm1215_vm15, %v1307_v0 }
 0x4dc   :  { %4167 = vmatpush3.bf16.msra.mxu0 %v5345_v5  ;;  %4185 = vmatpush3.bf16.msra.mxu1 %v5329_v29 }
 0x4dd   :  { %4168 = vmatprep.subr.bf16.mxu0 %v6433_v33  ;;  %4186 = vmatprep.subr.bf16.mxu1 %v6433_v33 }
 0x4de   :  { %4200 = vmatprep.mubr.msk.bf16.mxu1 %vm4945_vm8, %v6433_v33 }
 0x4e0   :  { %4169 = vmatpush3.bf16.msra.mxu0 %v5372_v40  ;;  %4187 = vmatpush3.bf16.msra.mxu1 %v5349_v14 }
 0x4e1   :  { %4170 = vmatprep.subr.bf16.mxu0 %v6433_v33  ;;  %4188 = vmatprep.subr.bf16.mxu1 %v6433_v33 }
 0x4e4   :  { %4171 = vmatpush3.bf16.msra.mxu0 %v5410_v50  ;;  %4189 = vmatpush3.bf16.msra.mxu1 %v6464_v22 }
 0x4e5   :  { %4172 = vmatprep.subr.bf16.mxu0 %v6433_v33  ;;  %4190 = vmatprep.subr.bf16.mxu1 %v6433_v33 }
 0x4e8   :  { %4173 = vmatpush3.bf16.msra.mxu0 %v6466_v31  ;;  %4191 = vmatpush3.bf16.msra.mxu1 %v6467_v24 }
 0x4e9   :  { %4174 = vmatprep.subr.bf16.mxu0 %v6433_v33  ;;  %4192 = vmatprep.subr.bf16.mxu1 %v6433_v33 }
 0x4ec   :  { %4175 = vmatpush3.bf16.msra.mxu0 %v6469_v19  ;;  %4193 = vmatpush3.bf16.msra.mxu1 %v6471_v38 }
 0x4ed   :  { %4176 = vmatprep.subr.bf16.mxu0 %v6433_v33  ;;  %4194 = vmatprep.subr.bf16.mxu1 %v6433_v33 }
 0x4f0   :  { %4177 = vmatpush3.bf16.msra.mxu0 %v5512_v25  ;;  %4195 = vmatpush3.bf16.msra.mxu1 %v6473_v15  ;;  %v6474_v25 = vsel %vm5311_vm13, %v5471_v4, 0  ;;  %v6477_v4 = vld [vmem:[#allocation46_spill] sm:$0xff] }
 0x4f1   :  { %4178 = vmatprep.subr.bf16.mxu0 %v6433_v33  ;;  %4196 = vmatprep.subr.bf16.mxu1 %v6433_v33 }
 0x4f4   :  { %4179 = vmatpush3.bf16.msra.mxu0 %v5546_v9  ;;  %4197 = vmatpush3.bf16.msra.mxu1 %v5517_v60  ;;  %v6475_v60 = vsel %vm5311_vm13, %v5505_v30, 0  ;;  %v6476_v9 = vsel %vm5311_vm13, %v5473_v43, 0  ;;  %v6480_v30 = vld [vmem:[#allocation48_spill] sm:$0xff]  ;;  %v6482_v43 = vld [vmem:[#allocation22_spill] sm:$0xff] }
 0x4f5   :  { %4198 = vmatprep.subr.bf16.mxu1 %v6433_v33  ;;  %4204 = vmatprep.subr.bf16.mxu0 %v6433_v33 }
 0x4f7   :  { %4181 = vmatmul.mubr.bf16.vlgmr.msra.gmra.mrb[36].mxu0 %v5197_v57 }
 0x4f8   :  { %4199 = vmatpush3.bf16.msra.mxu1 %v5551_v56  ;;  %4205 = vmatpush3.bf16.msra.mxu0 %v5354_v17  ;;  %v6478_v56 = vld [vmem:[#allocation35_spill] sm:$0xff] }
 0x4f9   :  { %4206 = vmatprep.subr.bf16.mxu0 %v6433_v33  ;;  %4224 = vmatprep.subr.bf16.mxu1 %v6433_v33  ;;  %v6479_v54 = vsel %vm5311_vm13, %v6478_v56, 0 }
 0x4fa   :  { %4220 = vmatprep.mubr.msk.bf16.mxu0 %vm4945_vm8, %v6433_v33 }
 0x4fb   :  { %4201 = vmatmul.mubr.bf16.vlgmr.msra.gmra.mrb[52].mxu1 %v5193_v51 }
 0x4fc   :  { %4207 = vmatpush3.bf16.msra.mxu0 %v5392_v1  ;;  %4225 = vmatpush3.bf16.msra.mxu1 %v5359_v21 }
 0x4fd   :  { %4208 = vmatprep.subr.bf16.mxu0 %v6433_v33  ;;  %4226 = vmatprep.subr.bf16.mxu1 %v6433_v33 }
 0x4fe   :  { %4240 = vmatprep.mubr.msk.bf16.mxu1 %vm4945_vm8, %v6433_v33 }
 0x500   :  { %4209 = vmatpush3.bf16.msra.mxu0 %v5604_v36  ;;  %4227 = vmatpush3.bf16.msra.mxu1 %v5397_v3 }
 0x501   :  { %4210 = vmatprep.subr.bf16.mxu0 %v6433_v33  ;;  %4228 = vmatprep.subr.bf16.mxu1 %v6433_v33 }
 0x504   :  { %4211 = vmatpush3.bf16.msra.mxu0 %v5618_v46  ;;  %4229 = vmatpush3.bf16.msra.mxu1 %v5609_v39 }
 0x505   :  { %4212 = vmatprep.subr.bf16.mxu0 %v6433_v33  ;;  %4230 = vmatprep.subr.bf16.mxu1 %v6433_v33 }
 0x508   :  { %4213 = vmatpush3.bf16.msra.mxu0 %v6474_v25  ;;  %4231 = vmatpush3.bf16.msra.mxu1 %v5623_v12 }
 0x509   :  { %4214 = vmatprep.subr.bf16.mxu0 %v6433_v33  ;;  %4232 = vmatprep.subr.bf16.mxu1 %v6433_v33 }
 0x50c   :  { %4215 = vmatpush3.bf16.msra.mxu0 %v6475_v60  ;;  %4233 = vmatpush3.bf16.msra.mxu1 %v6476_v9 }
 0x50d   :  { %4216 = vmatprep.subr.bf16.mxu0 %v6433_v33  ;;  %4234 = vmatprep.subr.bf16.mxu1 %v6433_v33 }
 0x510   :  { %4217 = vmatpush3.bf16.msra.mxu0 %v6477_v4  ;;  %4235 = vmatpush3.bf16.msra.mxu1 %v6479_v54 }
 0x511   :  { %4218 = vmatprep.subr.bf16.mxu0 %v6433_v33  ;;  %4236 = vmatprep.subr.bf16.mxu1 %v6433_v33 }
 0x514   :  { %4219 = vmatpush3.bf16.msra.mxu0 %v6480_v30  ;;  %4237 = vmatpush3.bf16.msra.mxu1 %v6481_v34 }
 0x515   :  { %4238 = vmatprep.subr.bf16.mxu1 %v6433_v33  ;;  %4244 = vmatprep.subr.bf16.mxu0 %v6433_v33 }
 0x517   :  { %4221 = vmatmul.mubr.bf16.vlgmr.msra.gmra.mrb[40].mxu0 %v6482_v43 }
 0x518   :  { %4239 = vmatpush3.bf16.msra.mxu1 %v6483_v52  ;;  %4245 = vmatpush3.bf16.msra.mxu0 %v6485_v7 }
 0x519   :  { %4250 = vmatprep.subr.bf16.mxu1 %v6433_v33  ;;  %4246 = vmatprep.mubr.msk.bf16.mxu0 %vm4945_vm8, %v6433_v33 }
 0x51a   :  { %4256 = vmatprep.subr.bf16.mxu0 %v6433_v33 }
 0x51b   :  { %4241 = vmatmul.mubr.bf16.vlgmr.msra.gmra.mrb[56].mxu1 %v6486_v49 }
 0x51c   :  { %4251 = vmatpush3.bf16.msra.mxu1 %v6487_v58  ;;  %4252 = vmatprep.mubr.msk.bf16.mxu1 %vm4945_vm8, %v6433_v33 }
 0x51d   :  { %4262 = vmatprep.subr.bf16.mxu1 %v6433_v33 }
 0x574   :  { %v1837_v20 = vpop.f32.mrb[32].mxu1 }
 0x575   :  { %v4126_v16 = vpop.f32.mrb[33].mxu1 }
 0x576   :  { %v1840_v18 = vpop.f32.mrb[34].mxu1 }
 0x577   :  { %v4127_v48 = vpop.f32.mrb[35].mxu1 }
 0x596   :  { %v1881_v32 = vpop.f32.mrb[36].mxu1 }
 0x597   :  { %v4132_v63 = vpop.f32.mrb[37].mxu1 }
 0x598   :  { %v1884_v11 = vpop.f32.mrb[38].mxu1 }
 0x599   :  { %v4133_v45 = vpop.f32.mrb[39].mxu1 }
 0x59a   :  { %v1793_v8 = vpop.f32.mrb[24].mxu0 }
 0x59b   :  { %v4120_v13 = vpop.f32.mrb[25].mxu0 }
 0x59c   :  { %v1796_v42 = vpop.f32.mrb[26].mxu0 }
 0x59d   :  { %v4121_v2 = vpop.f32.mrb[27].mxu0 }
 0x59e   :  { %v1925_v47 = vpop.f32.mrb[40].mxu1 }
 0x59f   :  { %v4138_v61 = vpop.f32.mrb[41].mxu1 }
 0x5a0   :  { %v1928_v62 = vpop.f32.mrb[42].mxu1 }
 0x5a1   :  { %v4139_v10 = vpop.f32.mrb[43].mxu1 }
 0x5a2   :  { %v1969_v44 = vpop.f32.mrb[28].mxu0 }
 0x5a3   :  { %v6105_v0 = vadd.f32 %v1969_v44, %v1793_v8  ;;  %v4144_v37 = vpop.f32.mrb[29].mxu0 }
 0x5a4   :  { %v1972_v31 = vpop.f32.mrb[30].mxu0 }
 0x5a5   :  { %v6107_v41 = vadd.f32 %v1972_v31, %v1796_v42  ;;  %v4145_v19 = vpop.f32.mrb[31].mxu0 }
 0x5a6   :  { %v2013_v35 = vpop.f32.mrb[44].mxu1 }
 0x5a7   :  { %v6109_v38 = vadd.f32 %v2013_v35, %v1837_v20  ;;  %v4150_v59 = vpop.f32.mrb[45].mxu1 }
 0x5a8   :  { %v2016_v15 = vpop.f32.mrb[46].mxu1 }
 0x5a9   :  { %v6111_v25 = vadd.f32 %v2016_v15, %v1840_v18  ;;  %v4151_v60 = vpop.f32.mrb[47].mxu1 }
 0x5aa   :  { %v2057_v9 = vpop.f32.mrb[32].mxu0 }
 0x5ab   :  { %v6113_v4 = vadd.f32 %v2057_v9, %v1881_v32  ;;  %v4156_v56 = vpop.f32.mrb[33].mxu0 }
 0x5ac   :  { %v2060_v54 = vpop.f32.mrb[34].mxu0 }
 0x5ad   :  { %v6115_v30 = vadd.f32 %v2060_v54, %v1884_v11  ;;  %v4157_v34 = vpop.f32.mrb[35].mxu0 }
 0x5ae   :  { %v2101_v52 = vpop.f32.mrb[48].mxu1 }
 0x5af   :  { %v6117_v7 = vadd.f32 %v2101_v52, %v1925_v47  ;;  %v4162_v58 = vpop.f32.mrb[49].mxu1 }
 0x5b0   :  { %v2104_v16 = vpop.f32.mrb[50].mxu1 }
 0x5b1   :  { %v6119_v20 = vadd.f32 %v2104_v16, %v1928_v62  ;;  %v4163_v48 = vpop.f32.mrb[51].mxu1 }
 0x5ca   :  { %v2334_v63 = vpop.f32.mrb[36].mxu0 }
 0x5cb   :  { %v4182_v18 = vpop.f32.mrb[37].mxu0  ;;  %v2464_v45 = vsel %vm1215_vm15, %v2334_v63, -inf }
 0x5cc   :  { %2465 = vmax.xlane.f32.xlu1 %v2464_v45  ;;  %v2337_v32 = vpop.f32.mrb[38].mxu0 }
 0x5cd   :  { %v4183_v8 = vpop.f32.mrb[39].mxu0  ;;  %v2467_v13 = vsel %vm1215_vm15, %v2337_v32, -inf }
 0x5ce   :  { %2468 = vmax.xlane.f32.xlu0 %v2467_v13  ;;  %v2375_v11 = vpop.f32.mrb[52].mxu1 }
 0x5cf   :  { %v4202_v42 = vpop.f32.mrb[53].mxu1  ;;  %v2470_v2 = vsel %vm1215_vm15, %v2375_v11, -inf }
 0x5d0   :  { %2471 = vmax.xlane.f32.xlu1 %v2470_v2  ;;  %v2378_v47 = vpop.f32.mrb[54].mxu1 }
 0x5d1   :  { %v4203_v61 = vpop.f32.mrb[55].mxu1  ;;  %v2473_v62 = vsel %vm1215_vm15, %v2378_v47, -inf }
 0x5d2   :  { %2474 = vmax.xlane.f32.xlu0 %v2473_v62 }
 0x5ea   :  { %v2416_v10 = vpop.f32.mrb[40].mxu0 }
 0x5eb   :  { %v4222_v44 = vpop.f32.mrb[41].mxu0  ;;  %v2476_v37 = vsel %vm1215_vm15, %v2416_v10, -inf }
 0x5ec   :  { %v2419_v31 = vpop.f32.mrb[42].mxu0  ;;  %2477 = vmax.xlane.f32.xlu1 %v2476_v37 }
 0x5ed   :  { %v4223_v19 = vpop.f32.mrb[43].mxu0  ;;  %v2479_v35 = vsel %vm1215_vm15, %v2419_v31, -inf }
 0x5ee   :  { %2480 = vmax.xlane.f32.xlu0 %v2479_v35  ;;  %v2457_v59 = vpop.f32.mrb[56].mxu1 }
 0x5ef   :  { %v4242_v15 = vpop.f32.mrb[57].mxu1  ;;  %v2482_v60 = vsel %vm1215_vm15, %v2457_v59, -inf }
 0x5f0   :  { %2483 = vmax.xlane.f32.xlu1 %v2482_v60  ;;  %v2460_v9 = vpop.f32.mrb[58].mxu1 }
 0x5f1   :  { %v4243_v56 = vpop.f32.mrb[59].mxu1  ;;  %v2485_v54 = vsel %vm1215_vm15, %v2460_v9, -inf }
 0x5f2   :  { %2486 = vmax.xlane.f32.xlu0 %v2485_v54 }
 0x659   :  { %v2466_v34 = vpop.xlane.xlu1 %2465 }
 0x65a   :  { %v2488_v52 = vsub.f32 %v2334_v63, %v2466_v34 }
 0x65b   :  { %v2469_v58 = vpop.xlane.xlu0 %2468 }
 0x65c   :  { %v2496_v16 = vmul.f32 1.442695, %v2488_v52  ;;  %v2489_v48 = vsub.f32 %v2337_v32, %v2469_v58 }
 0x65d   :  { %v2472_v18 = vpop.xlane.xlu1 %2471 }
 0x65e   :  { %4697 = vpow2.f32 %v2496_v16  ;;  %v2498_v45 = vmul.f32 1.442695, %v2489_v48  ;;  %v2490_v8 = vsub.f32 %v2375_v11, %v2472_v18 }
 0x65f   :  { %v2475_v13 = vpop.xlane.xlu0 %2474 }
 0x660   :  { %4699 = vpow2.f32 %v2498_v45  ;;  %v2500_v42 = vmul.f32 1.442695, %v2490_v8  ;;  %v2491_v2 = vsub.f32 %v2378_v47, %v2475_v13 }
 0x662   :  { %4701 = vpow2.f32 %v2500_v42  ;;  %v2502_v61 = vmul.f32 1.442695, %v2491_v2 }
 0x664   :  { %4703 = vpow2.f32 %v2502_v61 }
 0x668   :  { %v4698_v62 = vpop.eup %4697 }
 0x669   :  { %v2512_v44 = vsel %vm1215_vm15, %v4698_v62, 0.0 }
 0x66a   :  { %v4700_v37 = vpop.eup %4699  ;;  %2513 = vadd.xlane.f32.xlu1 %v2512_v44 }
 0x66b   :  { %v2515_v63 = vsel %vm1215_vm15, %v4700_v37, 0.0 }
 0x66c   :  { %v4702_v19 = vpop.eup %4701  ;;  %2516 = vadd.xlane.f32.xlu0 %v2515_v63 }
 0x66d   :  { %v2518_v32 = vsel %vm1215_vm15, %v4702_v19, 0.0 }
 0x66e   :  { %v4704_v35 = vpop.eup %4703  ;;  %2519 = vadd.xlane.f32.xlu1 %v2518_v32 }
 0x66f   :  { %v2521_v11 = vsel %vm1215_vm15, %v4704_v35, 0.0 }
 0x670   :  { %2522 = vadd.xlane.f32.xlu0 %v2521_v11 }
 0x679   :  { %v2478_v47 = vpop.xlane.xlu1 %2477 }
 0x67a   :  { %v2492_v15 = vsub.f32 %v2416_v10, %v2478_v47 }
 0x67b   :  { %v2481_v60 = vpop.xlane.xlu0 %2480 }
 0x67c   :  { %v2504_v56 = vmul.f32 1.442695, %v2492_v15  ;;  %v2493_v54 = vsub.f32 %v2419_v31, %v2481_v60 }
 0x67d   :  { %v2484_v34 = vpop.xlane.xlu1 %2483 }
 0x67e   :  { %4705 = vpow2.f32 %v2504_v56  ;;  %v2506_v52 = vmul.f32 1.442695, %v2493_v54  ;;  %v2494_v58 = vsub.f32 %v2457_v59, %v2484_v34 }
 0x67f   :  { %v2487_v16 = vpop.xlane.xlu0 %2486 }
 0x680   :  { %4707 = vpow2.f32 %v2506_v52  ;;  %v2508_v48 = vmul.f32 1.442695, %v2494_v58  ;;  %v2495_v18 = vsub.f32 %v2460_v9, %v2487_v16  ;;  %v6488_v16 = vsel %vm5225_vm7, %v5270_v55, 0 }
 0x682   :  { %4709 = vpow2.f32 %v2508_v48  ;;  %v2510_v45 = vmul.f32 1.442695, %v2495_v18 }
 0x684   :  { %4711 = vpow2.f32 %v2510_v45 }
 0x688   :  { %v4706_v8 = vpop.eup %4705 }
 0x689   :  { %v2524_v13 = vsel %vm1215_vm15, %v4706_v8, 0.0 }
 0x68a   :  { %v4708_v42 = vpop.eup %4707  ;;  %2525 = vadd.xlane.f32.xlu1 %v2524_v13 }
 0x68b   :  { %v2527_v10 = vsel %vm1215_vm15, %v4708_v42, 0.0 }
 0x68c   :  { %v4710_v2 = vpop.eup %4709  ;;  %2528 = vadd.xlane.f32.xlu0 %v2527_v10 }
 0x68d   :  { %v2530_v31 = vsel %vm1215_vm15, %v4710_v2, 0.0 }
 0x68e   :  { %v4712_v61 = vpop.eup %4711  ;;  %2531 = vadd.xlane.f32.xlu1 %v2530_v31 }
 0x68f   :  { %v2533_v59 = vsel %vm1215_vm15, %v4712_v61, 0.0 }
 0x690   :  { %2534 = vadd.xlane.f32.xlu0 %v2533_v59 }
 0x6f7   :  { %v2514_v9 = vpop.xlane.xlu1 %2513 }
 0x6f8   :  { %4713 = vrcp.f32 %v2514_v9 }
 0x6f9   :  { %v2517_v44 = vpop.xlane.xlu0 %2516 }
 0x6fa   :  { %4715 = vrcp.f32 %v2517_v44 }
 0x6fb   :  { %v2520_v63 = vpop.xlane.xlu1 %2519 }
 0x6fc   :  { %4717 = vrcp.f32 %v2520_v63 }
 0x6fd   :  { %v2523_v32 = vpop.xlane.xlu0 %2522 }
 0x6fe   :  { %4719 = vrcp.f32 %v2523_v32 }
 0x702   :  { %v4714_v11 = vpop.eup %4713 }
 0x703   :  { %v2544_v15 = vmul.f32 %v4714_v11, %v4698_v62  ;;  %v6489_v62 = vsel %vm5225_vm7, %v5268_v53, 0  ;;  %v6512_v11 = vld [vmem:[#allocation41_spill] sm:$0xff] }
 0x704   :  { %v4716_v47 = vpop.eup %4715 }
 0x705   :  { %v2545_v60 = vmul.f32 %v4716_v47, %v4700_v37  ;;  %v6513_v47 = vsel %vm5311_vm13, %v6512_v11, 0 }
 0x706   :  { %v4718_v56 = vpop.eup %4717 }
 0x707   :  { %v2552_v54 = vpack.c.bf16 %v2545_v60, %v2544_v15  ;;  %v2546_v52 = vmul.f32 %v4718_v56, %v4702_v19  ;;  %v6515_v60 = vsel %vm5232_vm9, %v5220_v28, 0 }
 0x708   :  { %v4720_v34 = vpop.eup %4719 }
 0x709   :  { %v2547_v58 = vmul.f32 %v4720_v34, %v4704_v35  ;;  %4247 = vmatmul.mubr.msk.bf16.vlgmr.msra.gmra.mrb[44].mxu0 %vm1215_vm15, %v2552_v54 }
 0x70a   :  { %4257 = vmatpush3.bf16.msra.mxu0 %v6488_v16  ;;  %4258 = vmatprep.mubr.msk.bf16.mxu0 %vm4945_vm8, %v6433_v33 }
 0x70b   :  { %v2553_v48 = vpack.c.bf16 %v2547_v58, %v2546_v52  ;;  %4268 = vmatprep.subr.bf16.mxu0 %v6433_v33 }
 0x70d   :  { %4253 = vmatmul.mubr.msk.bf16.vlgmr.msra.gmra.mrb[60].mxu1 %vm1215_vm15, %v2553_v48 }
 0x70e   :  { %4263 = vmatpush3.bf16.msra.mxu1 %v6489_v62  ;;  %4264 = vmatprep.mubr.msk.bf16.mxu1 %vm4945_vm8, %v6433_v33 }
 0x70f   :  { %4288 = vmatprep.subr.bf16.mxu1 %v6433_v33 }
 0x717   :  { %v2526_v37 = vpop.xlane.xlu1 %2525 }
 0x718   :  { %4721 = vrcp.f32 %v2526_v37 }
 0x719   :  { %v2529_v19 = vpop.xlane.xlu0 %2528 }
 0x71a   :  { %4723 = vrcp.f32 %v2529_v19 }
 0x71b   :  { %v2532_v35 = vpop.xlane.xlu1 %2531 }
 0x71c   :  { %4725 = vrcp.f32 %v2532_v35 }
 0x71d   :  { %v2535_v18 = vpop.xlane.xlu0 %2534 }
 0x71e   :  { %4727 = vrcp.f32 %v2535_v18 }
 0x722   :  { %v4722_v45 = vpop.eup %4721 }
 0x723   :  { %v2548_v10 = vmul.f32 %v4722_v45, %v4706_v8  ;;  %v6498_v8 = vld [vmem:[#allocation34_spill] sm:$0xff] }
 0x724   :  { %v4724_v13 = vpop.eup %4723 }
 0x725   :  { %v2549_v23 = vmul.f32 %v4724_v13, %v4708_v42  ;;  %v6499_v42 = vsel %vm5311_vm13, %v6498_v8, 0 }
 0x726   :  { %v4726_v31 = vpop.eup %4725 }
 0x727   :  { %v2554_v59 = vpack.c.bf16 %v2549_v23, %v2548_v10  ;;  %v2550_v44 = vmul.f32 %v4726_v31, %v4710_v2  ;;  %v6500_v2 = vld [vmem:[#allocation37_spill] sm:$0xff] }
 0x728   :  { %v4728_v9 = vpop.eup %4727 }
 0x729   :  { %v2551_v63 = vmul.f32 %v4728_v9, %v4712_v61  ;;  %4259 = vmatmul.mubr.msk.bf16.vlgmr.msra.gmra.mrb[48].mxu0 %vm1215_vm15, %v2554_v59  ;;  %v6501_v61 = vsel %vm5311_vm13, %v6500_v2, 0 }
 0x72a   :  { %4269 = vmatpush3.bf16.msra.mxu0 %v5325_v27  ;;  %4284 = vmatprep.mubr.msk.bf16.mxu0 %vm4945_vm8, %v6433_v33  ;;  %v6490_v27 = vld [vmem:[#allocation27_spill] sm:$0xff] }
 0x72b   :  { %4270 = vmatprep.subr.bf16.mxu0 %v6433_v33  ;;  %v2555_v32 = vpack.c.bf16 %v2551_v63, %v2550_v44 }
 0x72d   :  { %4265 = vmatmul.mubr.msk.bf16.vlgmr.msra.gmra.mrb[64].mxu1 %vm1215_vm15, %v2555_v32 }
 0x72e   :  { %4271 = vmatpush3.bf16.msra.mxu0 %v5345_v5  ;;  %4289 = vmatpush3.bf16.msra.mxu1 %v5329_v29  ;;  %v6491_v29 = vld [vmem:[#allocation31_spill] sm:$0xff]  ;;  %v6492_v5 = vld [vmem:[#allocation28_spill] sm:$0xff] }
 0x72f   :  { %4272 = vmatprep.subr.bf16.mxu0 %v6433_v33  ;;  %4290 = vmatprep.subr.bf16.mxu1 %v6433_v33 }
 0x730   :  { %4304 = vmatprep.mubr.msk.bf16.mxu1 %vm4945_vm8, %v6433_v33 }
 0x732   :  { %4273 = vmatpush3.bf16.msra.mxu0 %v5372_v40  ;;  %4291 = vmatpush3.bf16.msra.mxu1 %v5349_v14  ;;  %v6495_v40 = vld [vmem:[#allocation32_spill] sm:$0xff] }
 0x733   :  { %4274 = vmatprep.subr.bf16.mxu0 %v6433_v33  ;;  %4292 = vmatprep.subr.bf16.mxu1 %v6433_v33 }
 0x736   :  { %4275 = vmatpush3.bf16.msra.mxu0 %v5410_v50  ;;  %4293 = vmatpush3.bf16.msra.mxu1 %v6464_v22  ;;  %v6493_v50 = vld [vmem:[#allocation33_spill] sm:$0xff]  ;;  %v6496_v22 = vld [vmem:[#allocation36_spill] sm:$0xff] }
 0x737   :  { %4276 = vmatprep.subr.bf16.mxu0 %v6433_v33  ;;  %4294 = vmatprep.subr.bf16.mxu1 %v6433_v33  ;;  %v6494_v14 = vsel %vm5311_vm13, %v6493_v50, 0 }
 0x73a   :  { %4277 = vmatpush3.bf16.msra.mxu0 %v6490_v27  ;;  %4295 = vmatpush3.bf16.msra.mxu1 %v6467_v24  ;;  %v6497_v24 = vsel %vm5311_vm13, %v6496_v22, 0 }
 0x73b   :  { %4278 = vmatprep.subr.bf16.mxu0 %v6433_v33  ;;  %4296 = vmatprep.subr.bf16.mxu1 %v6433_v33 }
 0x73e   :  { %4279 = vmatpush3.bf16.msra.mxu0 %v6491_v29  ;;  %4297 = vmatpush3.bf16.msra.mxu1 %v6492_v5 }
 0x73f   :  { %4280 = vmatprep.subr.bf16.mxu0 %v6433_v33  ;;  %4298 = vmatprep.subr.bf16.mxu1 %v6433_v33 }
 0x742   :  { %4281 = vmatpush3.bf16.msra.mxu0 %v6494_v14  ;;  %4299 = vmatpush3.bf16.msra.mxu1 %v6495_v40 }
 0x743   :  { %4282 = vmatprep.subr.bf16.mxu0 %v6433_v33  ;;  %4300 = vmatprep.subr.bf16.mxu1 %v6433_v33 }
 0x746   :  { %4283 = vmatpush3.bf16.msra.mxu0 %v6497_v24  ;;  %4301 = vmatpush3.bf16.msra.mxu1 %v6499_v42 }
 0x747   :  { %4302 = vmatprep.subr.bf16.mxu1 %v6433_v33  ;;  %4308 = vmatprep.subr.bf16.mxu0 %v6433_v33 }
 0x749   :  { %4285 = vmatmul.mubr.bf16.vlgmr.msra.gmra.mrb[52].mxu0 %v5197_v57  ;;  %v6503_v57 = vld [vmem:[#allocation44_spill] sm:$0xff] }
 0x74a   :  { %4303 = vmatpush3.bf16.msra.mxu1 %v6501_v61  ;;  %4309 = vmatpush3.bf16.msra.mxu0 %v5354_v17  ;;  %v6504_v17 = vld [vmem:[#allocation43_spill] sm:$0xff] }
 0x74b   :  { %4310 = vmatprep.subr.bf16.mxu0 %v6433_v33  ;;  %4328 = vmatprep.subr.bf16.mxu1 %v6433_v33 }
 0x74c   :  { %4324 = vmatprep.mubr.msk.bf16.mxu0 %vm4945_vm8, %v6433_v33 }
 0x74d   :  { %4305 = vmatmul.mubr.bf16.vlgmr.msra.gmra.mrb[68].mxu1 %v5193_v51  ;;  %v6502_v51 = vld [vmem:[#allocation42_spill] sm:$0xff] }
 0x74e   :  { %4311 = vmatpush3.bf16.msra.mxu0 %v5392_v1  ;;  %4329 = vmatpush3.bf16.msra.mxu1 %v5359_v21  ;;  %v6505_v21 = vld [vmem:[#allocation38_spill] sm:$0xff] }
 0x74f   :  { %4312 = vmatprep.subr.bf16.mxu0 %v6433_v33  ;;  %4330 = vmatprep.subr.bf16.mxu1 %v6433_v33  ;;  %v6506_v1 = vsel %vm5311_vm13, %v6505_v21, 0 }
 0x750   :  { %4344 = vmatprep.mubr.msk.bf16.mxu1 %vm4945_vm8, %v6433_v33 }
 0x752   :  { %4313 = vmatpush3.bf16.msra.mxu0 %v5604_v36  ;;  %4331 = vmatpush3.bf16.msra.mxu1 %v5397_v3  ;;  %v6507_v3 = vld [vmem:[#allocation45_spill] sm:$0xff]  ;;  %v6508_v36 = vld [vmem:[#allocation40_spill] sm:$0xff] }
 0x753   :  { %4314 = vmatprep.subr.bf16.mxu0 %v6433_v33  ;;  %4332 = vmatprep.subr.bf16.mxu1 %v6433_v33 }
 0x756   :  { %4315 = vmatpush3.bf16.msra.mxu0 %v5618_v46  ;;  %4333 = vmatpush3.bf16.msra.mxu1 %v5609_v39  ;;  %v6509_v39 = vsel %vm5311_vm13, %v6508_v36, 0  ;;  %v6510_v46 = vld [vmem:[#allocation39_spill] sm:$0xff] }
 0x757   :  { %4316 = vmatprep.subr.bf16.mxu0 %v6433_v33  ;;  %4334 = vmatprep.subr.bf16.mxu1 %v6433_v33 }
 0x75a   :  { %4317 = vmatpush3.bf16.msra.mxu0 %v6502_v51  ;;  %4335 = vmatpush3.bf16.msra.mxu1 %v5623_v12  ;;  %v6511_v12 = vsel %vm5311_vm13, %v6510_v46, 0 }
 0x75b   :  { %4318 = vmatprep.subr.bf16.mxu0 %v6433_v33  ;;  %4336 = vmatprep.subr.bf16.mxu1 %v6433_v33 }
 0x75e   :  { %4319 = vmatpush3.bf16.msra.mxu0 %v6503_v57  ;;  %4337 = vmatpush3.bf16.msra.mxu1 %v6504_v17 }
 0x75f   :  { %4320 = vmatprep.subr.bf16.mxu0 %v6433_v33  ;;  %4338 = vmatprep.subr.bf16.mxu1 %v6433_v33 }
 0x762   :  { %4321 = vmatpush3.bf16.msra.mxu0 %v6506_v1  ;;  %4339 = vmatpush3.bf16.msra.mxu1 %v6507_v3 }
 0x763   :  { %4322 = vmatprep.subr.bf16.mxu0 %v6433_v33  ;;  %4340 = vmatprep.subr.bf16.mxu1 %v6433_v33 }
 0x766   :  { %4323 = vmatpush3.bf16.msra.mxu0 %v6509_v39  ;;  %4341 = vmatpush3.bf16.msra.mxu1 %v6511_v12 }
 0x767   :  { %4342 = vmatprep.subr.bf16.mxu1 %v6433_v33  ;;  %4348 = vmatprep.subr.bf16.mxu0 %v6433_v33 }
 0x769   :  { %4325 = vmatmul.mubr.bf16.vlgmr.msra.gmra.mrb[56].mxu0 %v6482_v43 }
 0x76a   :  { %4343 = vmatpush3.bf16.msra.mxu1 %v6513_v47  ;;  %4349 = vmatpush3.bf16.msra.mxu0 %v6515_v60 }
 0x76b   :  { %4354 = vmatprep.subr.bf16.mxu1 %v6433_v33  ;;  %4350 = vmatprep.mubr.msk.bf16.mxu0 %vm4945_vm8, %v6433_v33 }
 0x76c   :  { %4360 = vmatprep.subr.bf16.mxu0 %v6433_v33 }
 0x76d   :  { %4345 = vmatmul.mubr.bf16.vlgmr.msra.gmra.mrb[72].mxu1 %v6486_v49 }
 0x76e   :  { %4355 = vmatpush3.bf16.msra.mxu1 %v6516_v6  ;;  %4356 = vmatprep.mubr.msk.bf16.mxu1 %vm4945_vm8, %v6433_v33 }
 0x76f   :  { %4366 = vmatprep.subr.bf16.mxu1 %v6433_v33 }
 0x7dc   :  { %v2593_v28 = vpop.f32.mrb[44].mxu0 }
 0x7dd   :  { %v6270_v43 = vadd.f32 %v2593_v28, %v6105_v0  ;;  %v4248_v56 = vpop.f32.mrb[45].mxu0 }
 0x7de   :  { %v2596_v54 = vpop.f32.mrb[46].mxu0 }
 0x7df   :  { %v6273_v34 = vadd.f32 %v2596_v54, %v6107_v41  ;;  %v4249_v49 = vpop.f32.mrb[47].mxu0 }
 0x7e0   :  { %v2637_v52 = vpop.f32.mrb[60].mxu1 }
 0x7e1   :  { %v6276_v58 = vadd.f32 %v2637_v52, %v6109_v38  ;;  %v4254_v26 = vpop.f32.mrb[61].mxu1 }
 0x7e2   :  { %v2640_v16 = vpop.f32.mrb[62].mxu1 }
 0x7e3   :  { %v6279_v48 = vadd.f32 %v2640_v16, %v6111_v25  ;;  %v4255_v62 = vpop.f32.mrb[63].mxu1 }
 0x7fc   :  { %v2681_v37 = vpop.f32.mrb[48].mxu0 }
 0x7fd   :  { %v6282_v0 = vadd.f32 %v2681_v37, %v6113_v4  ;;  %v4260_v19 = vpop.f32.mrb[49].mxu0 }
 0x7fe   :  { %v2684_v35 = vpop.f32.mrb[50].mxu0 }
 0x7ff   :  { %v6285_v41 = vadd.f32 %v2684_v35, %v6115_v30  ;;  %v4261_v18 = vpop.f32.mrb[51].mxu0 }
 0x800   :  { %v2725_v45 = vpop.f32.mrb[64].mxu1 }
 0x801   :  { %v6288_v38 = vadd.f32 %v2725_v45, %v6117_v7  ;;  %v4266_v13 = vpop.f32.mrb[65].mxu1 }
 0x802   :  { %v2728_v10 = vpop.f32.mrb[66].mxu1 }
 0x803   :  { %v6291_v25 = vadd.f32 %v2728_v10, %v6119_v20  ;;  %v4267_v23 = vpop.f32.mrb[67].mxu1 }
 0x81c   :  { %v2966_v31 = vpop.f32.mrb[52].mxu0 }
 0x81d   :  { %v4286_v59 = vpop.f32.mrb[53].mxu0  ;;  %v3096_v4 = vsel %vm1215_vm15, %v2966_v31, -inf }
 0x81e   :  { %3097 = vmax.xlane.f32.xlu1 %v3096_v4  ;;  %v2969_v9 = vpop.f32.mrb[54].mxu0 }
 0x81f   :  { %v4287_v44 = vpop.f32.mrb[55].mxu0  ;;  %v3099_v30 = vsel %vm1215_vm15, %v2969_v9, -inf }
 0x820   :  { %3100 = vmax.xlane.f32.xlu0 %v3099_v30  ;;  %v3007_v63 = vpop.f32.mrb[68].mxu1 }
 0x821   :  { %v4306_v32 = vpop.f32.mrb[69].mxu1  ;;  %v3102_v7 = vsel %vm1215_vm15, %v3007_v63, -inf }
 0x822   :  { %3103 = vmax.xlane.f32.xlu1 %v3102_v7  ;;  %v3010_v27 = vpop.f32.mrb[70].mxu1 }
 0x823   :  { %v4307_v29 = vpop.f32.mrb[71].mxu1  ;;  %v3105_v20 = vsel %vm1215_vm15, %v3010_v27, -inf }
 0x824   :  { %3106 = vmax.xlane.f32.xlu0 %v3105_v20 }
 0x83c   :  { %v3048_v5 = vpop.f32.mrb[56].mxu0 }
 0x83d   :  { %v4326_v50 = vpop.f32.mrb[57].mxu0  ;;  %v3108_v14 = vsel %vm1215_vm15, %v3048_v5, -inf }
 0x83e   :  { %v3051_v40 = vpop.f32.mrb[58].mxu0  ;;  %3109 = vmax.xlane.f32.xlu1 %v3108_v14 }
 0x83f   :  { %v4327_v22 = vpop.f32.mrb[59].mxu0  ;;  %v3111_v24 = vsel %vm1215_vm15, %v3051_v40, -inf }
 0x840   :  { %3112 = vmax.xlane.f32.xlu0 %v3111_v24  ;;  %v3089_v8 = vpop.f32.mrb[72].mxu1 }
 0x841   :  { %v4346_v42 = vpop.f32.mrb[73].mxu1  ;;  %v3114_v2 = vsel %vm1215_vm15, %v3089_v8, -inf }
 0x842   :  { %3115 = vmax.xlane.f32.xlu1 %v3114_v2  ;;  %v3092_v61 = vpop.f32.mrb[74].mxu1 }
 0x843   :  { %v4347_v51 = vpop.f32.mrb[75].mxu1  ;;  %v3117_v57 = vsel %vm1215_vm15, %v3092_v61, -inf }
 0x844   :  { %3118 = vmax.xlane.f32.xlu0 %v3117_v57  ;;  %v4625_v51 = vld [vmem:[#allocation11] sm:$0xff]  }
 0x8ab   :  { %v3098_v17 = vpop.xlane.xlu1 %3097 }
 0x8ac   :  { %v3120_v21 = vsub.f32 %v2966_v31, %v3098_v17 }
 0x8ad   :  { %v3101_v1 = vpop.xlane.xlu0 %3100 }
 0x8ae   :  { %v3128_v3 = vmul.f32 1.442695, %v3120_v21  ;;  %v3121_v36 = vsub.f32 %v2969_v9, %v3101_v1  ;;  %v6517_v1 = vsel %vm5232_vm9, %v5270_v55, 0 }
 0x8af   :  { %v3104_v39 = vpop.xlane.xlu1 %3103 }
 0x8b0   :  { %4729 = vpow2.f32 %v3128_v3  ;;  %v3130_v46 = vmul.f32 1.442695, %v3121_v36  ;;  %v3122_v12 = vsub.f32 %v3007_v63, %v3104_v39  ;;  %v6518_v36 = vsel %vm5232_vm9, %v5268_v53, 0 }
 0x8b1   :  { %v3107_v11 = vpop.xlane.xlu0 %3106 }
 0x8b2   :  { %4731 = vpow2.f32 %v3130_v46  ;;  %v3132_v47 = vmul.f32 1.442695, %v3122_v12  ;;  %v3123_v60 = vsub.f32 %v3010_v27, %v3107_v11 }
 0x8b4   :  { %4733 = vpow2.f32 %v3132_v47  ;;  %v3134_v6 = vmul.f32 1.442695, %v3123_v60 }
 0x8b6   :  { %4735 = vpow2.f32 %v3134_v6 }
 0x8ba   :  { %v4730_v28 = vpop.eup %4729 }
 0x8bb   :  { %v3144_v56 = vsel %vm1215_vm15, %v4730_v28, 0.0 }
 0x8bc   :  { %v4732_v54 = vpop.eup %4731  ;;  %3145 = vadd.xlane.f32.xlu1 %v3144_v56  ;;  %v4626_v56 = vld [vmem:[#allocation11 + $0x8] sm:$0xff]  }
 0x8bd   :  { %v3147_v49 = vsel %vm1215_vm15, %v4732_v54, 0.0 }
 0x8be   :  { %v4734_v52 = vpop.eup %4733  ;;  %3148 = vadd.xlane.f32.xlu0 %v3147_v49 }
 0x8bf   :  { %v3150_v26 = vsel %vm1215_vm15, %v4734_v52, 0.0 }
 0x8c0   :  { %v4736_v16 = vpop.eup %4735  ;;  %3151 = vadd.xlane.f32.xlu1 %v3150_v26  ;;  %v4628_v26 = vld [vmem:[#allocation11 + $0x18] sm:$0xff]  }
 0x8c1   :  { %v3153_v62 = vsel %vm1215_vm15, %v4736_v16, 0.0 }
 0x8c2   :  { %3154 = vadd.xlane.f32.xlu0 %v3153_v62  ;;  %v4630_v62 = vld [vmem:[#allocation11 + $0x28] sm:$0xff]  }
 0x8cb   :  { %v3110_v37 = vpop.xlane.xlu1 %3109 }
 0x8cc   :  { %v3124_v19 = vsub.f32 %v3048_v5, %v3110_v37  ;;  %v4631_v37 = vld [vmem:[#allocation11 + $0x30] sm:$0xff]  }
 0x8cd   :  { %v3113_v35 = vpop.xlane.xlu0 %3112 }
 0x8ce   :  { %v3136_v18 = vmul.f32 1.442695, %v3124_v19  ;;  %v3125_v45 = vsub.f32 %v3051_v40, %v3113_v35  ;;  %v4632_v19 = vld [vmem:[#allocation11 + $0x38] sm:$0xff]  }
 0x8cf   :  { %v3116_v13 = vpop.xlane.xlu1 %3115 }
 0x8d0   :  { %4737 = vpow2.f32 %v3136_v18  ;;  %v3138_v10 = vmul.f32 1.442695, %v3125_v45  ;;  %v3126_v23 = vsub.f32 %v3089_v8, %v3116_v13 }
 0x8d1   :  { %v3119_v31 = vpop.xlane.xlu0 %3118 }
 0x8d2   :  { %4739 = vpow2.f32 %v3138_v10  ;;  %v3140_v59 = vmul.f32 1.442695, %v3126_v23  ;;  %v3127_v4 = vsub.f32 %v3092_v61, %v3119_v31 }
 0x8d4   :  { %4741 = vpow2.f32 %v3140_v59  ;;  %v3142_v9 = vmul.f32 1.442695, %v3127_v4  ;;  %v4761_v59 = vld [vmem:[#allocation2] sm:$0xff] }
 0x8d6   :  { %4743 = vpow2.f32 %v3142_v9  ;;  %v4762_v9 = vld [vmem:[#allocation2 + $0x8] sm:$0xff] }
 0x8da   :  { %v4738_v44 = vpop.eup %4737 }
 0x8db   :  { %v3156_v30 = vsel %vm1215_vm15, %v4738_v44, 0.0 }
 0x8dc   :  { %v4740_v63 = vpop.eup %4739  ;;  %3157 = vadd.xlane.f32.xlu1 %v3156_v30 }
 0x8dd   :  { %v3159_v32 = vsel %vm1215_vm15, %v4740_v63, 0.0 }
 0x8de   :  { %v4742_v7 = vpop.eup %4741  ;;  %3160 = vadd.xlane.f32.xlu0 %v3159_v32 }
 0x8df   :  { %v3162_v27 = vsel %vm1215_vm15, %v4742_v7, 0.0 }
 0x8e0   :  { %v4744_v29 = vpop.eup %4743  ;;  %3163 = vadd.xlane.f32.xlu1 %v3162_v27 }
 0x8e1   :  { %v3165_v20 = vsel %vm1215_vm15, %v4744_v29, 0.0 }
 0x8e2   :  { %3166 = vadd.xlane.f32.xlu0 %v3165_v20  ;;  %v4763_v20 = vld [vmem:[#allocation2 + $0x10] sm:$0xff] }
 0x949   :  { %v3146_v5 = vpop.xlane.xlu1 %3145 }
 0x94a   :  { %4745 = vrcp.f32 %v3146_v5  ;;  %v4764_v5 = vld [vmem:[#allocation2 + $0x18] sm:$0xff] }
 0x94b   :  { %v3149_v50 = vpop.xlane.xlu0 %3148 }
 0x94c   :  { %4747 = vrcp.f32 %v3149_v50 }
 0x94d   :  { %v3152_v14 = vpop.xlane.xlu1 %3151 }
 0x94e   :  { %4749 = vrcp.f32 %v3152_v14 }
 0x94f   :  { %v3155_v40 = vpop.xlane.xlu0 %3154 }
 0x950   :  { %4751 = vrcp.f32 %v3155_v40 }
 0x954   :  { %v4746_v22 = vpop.eup %4745 }
 0x955   :  { %v3176_v8 = vmul.f32 %v4746_v22, %v4730_v28 }
 0x956   :  { %v4748_v24 = vpop.eup %4747 }
 0x957   :  { %v3177_v42 = vmul.f32 %v4748_v24, %v4732_v54 }
 0x958   :  { %v4750_v2 = vpop.eup %4749 }
 0x959   :  { %v3184_v61 = vpack.c.bf16 %v3177_v42, %v3176_v8  ;;  %v3178_v17 = vmul.f32 %v4750_v2, %v4734_v52  ;;  %v4627_v52 = vld [vmem:[#allocation11 + $0x10] sm:$0xff]   ;;  %v4765_v2 = vld [vmem:[#allocation2 + $0x20] sm:$0xff] }
 0x95a   :  { %v4752_v57 = vpop.eup %4751 }
 0x95b   :  { %v3179_v21 = vmul.f32 %v4752_v57, %v4736_v16  ;;  %4351 = vmatmul.mubr.msk.bf16.vlgmr.msra.gmra.mrb[60].mxu0 %vm1215_vm15, %v3184_v61  ;;  %v4629_v16 = vld [vmem:[#allocation11 + $0x20] sm:$0xff]   ;;  %v4766_v61 = vld [vmem:[#allocation2 + $0x28] sm:$0xff] }
 0x95c   :  { %4361 = vmatpush3.bf16.msra.mxu0 %v6517_v1  ;;  %4362 = vmatprep.mubr.msk.bf16.mxu0 %vm4945_vm8, %v6433_v33 }
 0x95d   :  { %v3185_v3 = vpack.c.bf16 %v3179_v21, %v3178_v17  ;;  %4372 = vmatprep.subr.bf16.mxu0 %v4625_v51 }
 0x95f   :  { %4357 = vmatmul.mubr.msk.bf16.vlgmr.msra.gmra.mrb[76].mxu1 %vm1215_vm15, %v3185_v3 }
 0x960   :  { %4367 = vmatpush3.bf16.msra.mxu1 %v6518_v36  ;;  %4368 = vmatprep.mubr.msk.bf16.mxu1 %vm4945_vm8, %v6433_v33 }
 0x969   :  { %v3158_v39 = vpop.xlane.xlu1 %3157 }
 0x96a   :  { %4753 = vrcp.f32 %v3158_v39  ;;  %v4767_v39 = vld [vmem:[#allocation2 + $0x30] sm:$0xff] }
 0x96b   :  { %v3161_v46 = vpop.xlane.xlu0 %3160 }
 0x96c   :  { %4755 = vrcp.f32 %v3161_v46  ;;  %v4768_v46 = vld [vmem:[#allocation2 + $0x38] sm:$0xff] }
 0x96d   :  { %v3164_v55 = vpop.xlane.xlu1 %3163 }
 0x96e   :  { %4757 = vrcp.f32 %v3164_v55 }
 0x96f   :  { %v3167_v12 = vpop.xlane.xlu0 %3166 }
 0x970   :  { %4759 = vrcp.f32 %v3167_v12  ;;  %v3651_v12 = vld [vmem:[%s6361_s10] ss:$0 sm:$0xff]  ;;  %s4947_s10 = smov [#allocation13]  }
 0x971   :  { %s3549_s30 = sshll.u32 %s4947_s10, 4  ;;  %s3550_s30 = int_to_ptr.vmem [resolvable:$true] %s3549_s30 }
 0x972   :  { %s4901_s12 = scalar_lea.vmem %s3550_s30, 1024  ;;  %p4906_p7 = scmp.lt.s32.totalorder %s3550_s30, %s3550_s30 }
 0x973   :  { %p4902_p6 = scmp.ne.s32.totalorder %s3550_s30, %s4901_s12  ;;  %p4907_p8 = scmp.lt.s32.totalorder %s4901_s12, %s4901_s12 }
 0x974   :  { %v4754_v11 = vpop.eup %4753 }
 0x975   :  { %v3180_v60 = vmul.f32 %v4754_v11, %v4738_v44  ;;  %p4908_p9 = por %p4907_p8, %p4906_p7 }
 0x976   :  { %v4756_v47 = vpop.eup %4755 }
 0x977   :  { %v3181_v6 = vmul.f32 %v4756_v47, %v4740_v63  ;;  %p4909_p10 = pnand %p4908_p9, %p4902_p6 }
 0x978   :  { %v4758_v28 = vpop.eup %4757 }
 0x979   :  { %v3186_v15 = vpack.c.bf16 %v3181_v6, %v3180_v60  ;;  %v3182_v54 = vmul.f32 %v4758_v28, %v4742_v7 }
 0x97a   :  { %v4760_v53 = vpop.eup %4759 }
 0x97b   :  { %v3183_v49 = vmul.f32 %v4760_v53, %v4744_v29  ;;  %4363 = vmatmul.mubr.msk.bf16.vlgmr.msra.gmra.mrb[64].mxu0 %vm1215_vm15, %v3186_v15 }
 0x97c   :  { %4373 = vmatpush3.bf16.msra.mxu0 %v4625_v51 }
 0x97d   :  { %v3187_v33 = vpack.c.bf16 %v3183_v49, %v3182_v54  ;;  %4374 = vmatprep.subr.bf16.mxu0 %v4626_v56 }
 0x97f   :  { %4369 = vmatmul.mubr.msk.bf16.vlgmr.msra.gmra.mrb[80].mxu1 %vm1215_vm15, %v3187_v33 }
 0x980   :  { %4375 = vmatpush3.bf16.msra.mxu0 %v4626_v56 }
 0x981   :  { %4376 = vmatprep.subr.bf16.mxu0 %v4627_v52 }
 0x984   :  { %4377 = vmatpush3.bf16.msra.mxu0 %v4627_v52 }
 0x985   :  { %4378 = vmatprep.subr.bf16.mxu0 %v4628_v26 }
 0x988   :  { %4379 = vmatpush3.bf16.msra.mxu0 %v4628_v26 }
 0x989   :  { %4380 = vmatprep.subr.bf16.mxu0 %v4629_v16 }
 0x98c   :  { %4381 = vmatpush3.bf16.msra.mxu0 %v4629_v16 }
 0x98d   :  { %4382 = vmatprep.subr.bf16.mxu0 %v4630_v62 }
 0x990   :  { %4383 = vmatpush3.bf16.msra.mxu0 %v4630_v62 }
 0x991   :  { %4384 = vmatprep.subr.bf16.mxu0 %v4631_v37 }
 0x994   :  { %4385 = vmatpush3.bf16.msra.mxu0 %v4631_v37 }
 0x995   :  { %4386 = vmatprep.subr.bf16.mxu0 %v4632_v19 }
 0x998   :  { %4387 = vmatpush3.bf16.msra.mxu0 %v4632_v19 }
 0xa2e   :  { %v3225_v35 = vpop.f32.mrb[60].mxu0 }
 0xa2f   :  { %v3364_v18 = vadd.f32 %v3225_v35, %v6270_v43  ;;  %v4352_v45 = vpop.f32.mrb[61].mxu0 }
 0xa30   :  { %v3228_v13 = vpop.f32.mrb[62].mxu0 }
 0xa31   :  { %v3365_v10 = vadd.f32 %v3228_v13, %v6273_v34  ;;  %v4353_v23 = vpop.f32.mrb[63].mxu0  ;;  %v3372_v4 = vadd.f32 %v4761_v59, %v3364_v18 }
 0xa32   :  { %v3269_v31 = vpop.f32.mrb[76].mxu1 }
 0xa33   :  { %v3373_v44 = vadd.f32 %v4762_v9, %v3365_v10  ;;  %v3366_v30 = vadd.f32 %v3269_v31, %v6276_v58  ;;  %v4358_v63 = vpop.f32.mrb[77].mxu1 }
 0xa34   :  { %v3272_v32 = vpop.f32.mrb[78].mxu1 }
 0xa35   :  { %v3367_v7 = vadd.f32 %v3272_v32, %v6279_v48  ;;  %v4359_v27 = vpop.f32.mrb[79].mxu1  ;;  %v3380_v29 = vpack.c.bf16 %v3373_v44, %v3372_v4  ;;  %v3374_v43 = vadd.f32 %v4763_v20, %v3366_v30 }
 0xa37   :  { %v3375_v50 = vadd.f32 %v4764_v5, %v3367_v7  ;;  %4388 = vmatprep.mubr.bf16.mxu0 %v3380_v29 }
 0xa39   :  { %v3381_v34 = vpack.c.bf16 %v3375_v50, %v3374_v43 }
 0xa3b   :  { %4389 = vmatmul.mubr.bf16.vlgmr.msra.gmra.mrb[68].mxu0 %v3381_v34 }
 0xa4e   :  { %v3313_v14 = vpop.f32.mrb[64].mxu0 }
 0xa4f   :  { %v3368_v40 = vadd.f32 %v3313_v14, %v6282_v0  ;;  %v4364_v22 = vpop.f32.mrb[65].mxu0 }
 0xa50   :  { %v3316_v24 = vpop.f32.mrb[66].mxu0 }
 0xa51   :  { %v3369_v58 = vadd.f32 %v3316_v24, %v6285_v41  ;;  %v4365_v8 = vpop.f32.mrb[67].mxu0  ;;  %v3376_v48 = vadd.f32 %v4765_v2, %v3368_v40 }
 0xa52   :  { %v3357_v42 = vpop.f32.mrb[80].mxu1 }
 0xa53   :  { %v3377_v51 = vadd.f32 %v4766_v61, %v3369_v58  ;;  %v3370_v57 = vadd.f32 %v3357_v42, %v6288_v38  ;;  %v4370_v17 = vpop.f32.mrb[81].mxu1 }
 0xa54   :  { %v3360_v21 = vpop.f32.mrb[82].mxu1 }
 0xa55   :  { %v3371_v1 = vadd.f32 %v3360_v21, %v6291_v25  ;;  %v4371_v3 = vpop.f32.mrb[83].mxu1  ;;  %v3382_v36 = vpack.c.bf16 %v3377_v51, %v3376_v48  ;;  %v3378_v0 = vadd.f32 %v4767_v39, %v3370_v57 }
 0xa57   :  { %v3379_v55 = vadd.f32 %v4768_v46, %v3371_v1  ;;  %4392 = vmatprep.mubr.bf16.mxu0 %v3382_v36 }
 0xa59   :  { %v3383_v41 = vpack.c.bf16 %v3379_v55, %v3378_v0 }
 0xa5b   :  { %4393 = vmatmul.mubr.bf16.gmra.mrb[72].mxu0 %v3383_v41 }
 0xb0e   :  { %v4390_v11 = vpop.f32.mrb[68].mxu0 }
 0xb0f   :  { %v3498_v47 = vadd.f32 %v4390_v11, %v3651_v12  ;;  %v3489_v38 = vpop.f32.mrb[69].mxu0 }
 0xb10   :  { %v3490_v60 = vadd.f32 %v3651_v12, %v3489_v38  ;;  %v4391_v6 = vpop.f32.mrb[70].mxu0 }
 0xb11   :  { %v3522_v28 = vmax.f32 %v3498_v47, 0.0  ;;  %v3501_v25 = vadd.f32 %v4391_v6, %v3651_v12  ;;  %v3492_v15 = vpop.f32.mrb[71].mxu0 }
 0xb12   :  { %v3520_v56 = vmax.f32 %v3490_v60, 0.0  ;;  %v3493_v53 = vadd.f32 %v3651_v12, %v3492_v15 }
 0xb13   :  { %v3530_v54 = vadd.f32 %v3522_v28, %v3374_v43  ;;  %v3523_v49 = vmax.f32 %v3501_v25, 0.0 }
 0xb14   :  { %v3528_v33 = vadd.f32 %v3520_v56, %v3372_v4  ;;  %v3521_v52 = vmax.f32 %v3493_v53, 0.0 }
 0xb15   :  { %3538 = vst [vmem:[#allocation13 + $0x10] sm:$0xff] %v3530_v54  ;;  %v3531_v26 = vadd.f32 %v3523_v49, %v3375_v50 }
 0xb16   :  { %3536 = vst [vmem:[#allocation13] sm:$0xff] %v3528_v33  ;;  %v3529_v16 = vadd.f32 %v3521_v52, %v3373_v44 }
 0xb17   :  { %3539 = vst [vmem:[#allocation13 + $0x18] sm:$0xff] %v3531_v26 }
 0xb18   :  { %3537 = vst [vmem:[#allocation13 + $0x8] sm:$0xff] %v3529_v16 }
 0xb2e   :  { %v4394_v62 = vpop.f32.mrb[72].mxu0 }
 0xb2f   :  { %v3514_v37 = vadd.f32 %v4394_v62, %v3651_v12  ;;  %v3505_v19 = vpop.f32.mrb[73].mxu0 }
 0xb30   :  { %v3506_v35 = vadd.f32 %v3651_v12, %v3505_v19  ;;  %v4395_v18 = vpop.f32.mrb[74].mxu0 }
 0xb31   :  { %v3526_v45 = vmax.f32 %v3514_v37, 0.0  ;;  %v3517_v13 = vadd.f32 %v4395_v18, %v3651_v12  ;;  %v3508_v10 = vpop.f32.mrb[75].mxu0 }
 0xb32   :  { %v3524_v23 = vmax.f32 %v3506_v35, 0.0  ;;  %v3509_v31 = vadd.f32 %v3651_v12, %v3508_v10 }
 0xb33   :  { %v3534_v59 = vadd.f32 %v3526_v45, %v3378_v0  ;;  %v3527_v9 = vmax.f32 %v3517_v13, 0.0 }
 0xb34   :  { %v3532_v4 = vadd.f32 %v3524_v23, %v3376_v48  ;;  %v3525_v30 = vmax.f32 %v3509_v31, 0.0 }
 0xb35   :  { %3542 = vst [vmem:[#allocation13 + $0x30] sm:$0xff] %v3534_v59  ;;  %v3535_v44 = vadd.f32 %v3527_v9, %v3379_v55 }
 0xb36   :  { %3540 = vst [vmem:[#allocation13 + $0x20] sm:$0xff] %v3532_v4  ;;  %v3533_v63 = vadd.f32 %v3525_v30, %v3377_v51 }
 0xb37   :  { %3543 = vst [vmem:[#allocation13 + $0x38] sm:$0xff] %v3535_v44 }
 0xb38   :  { %3541 = vst [vmem:[#allocation13 + $0x28] sm:$0xff] %v3533_v63 }
 0xb39   :  { %4912 = shalt.err (!%p4909_p10)
}
 0xb3a   :  { %s4913_s1 = scalar_lea.hbm %s6362_s11, 1024 }
 0xb3b   :  { %p4914_p11 = scmp.ne.s32.totalorder %s6362_s11, %s4913_s1  ;;  %p4917_p12 = scmp.lt.u32.totalorder %s4913_s1, %s6362_s11 }
 0xb3d   :  { %p4919_p13 = pnand %p4917_p12, %p4914_p11 }
 0xb3f   :  { %4922 = shalt.err (!%p4919_p13)
}
 0xb40   :  { %3555 = dma.vmem_to_hbm [thread:$0]  %s3550_s30, 1024, %s6362_s11, [#allocation4], %s4934_s27, %s4934_s27, %s4935_s28  }
 0xb41   :  { %4931 = dma.done.wait [#allocation4], 1024  }
 0xb42   :  { %4932 = vsyncadd [#allocation4], 4294966272 }
 0xb43   :  { %3559 = vsyncpa [#allocation3], 1 }
 0xb44   :  { %3560 = vsyncpa [#allocation6], 1 }
 0xb45   :  { %3561 = vsyncpa [#allocation9], 1 }
 0xb46   :  { %3562 = vsyncpa [#allocation12], 1 }
 0xb47   :  { %3563 = vsyncpa [#allocation4], 1 }

</bundles_post_ra>
